<compile_context>
chip_gen: v7x
topology: tpu7x:2x2x1
jax: 0.10.0
libtpu: 0.0.40
codegen_flags: <defaults>
</compile_context>

<pallas_src>
import functools

import numpy as np

import jax
import jax.numpy as jnp
from jax.experimental import pallas as pl
from jax.experimental.pallas import tpu as pltpu

LEAKY_SLOPE = 0.2


# ------------------------------ Fused kernel --------------------------------

def _fused_encoder_kernel(*refs, n_conv, conv_acts):
    """Entire CNNFastEncoder forward for one image, resident in VMEM.

    refs = [x_ref,
            (S_l, W_l, b_l) * n_conv,      # conv layers as banded matmuls
            w1s, b1, w2, b2, w3, b3,       # MLP (fc_1 pre-permuted per row)
            o_ref]
    """
    x_ref = refs[0]
    o_ref = refs[-1]
    X = x_ref[0]                                       # (H0, W0*Cin)

    idx = 1
    for l in range(n_conv):
        s_ref, w_ref, b_ref = refs[idx], refs[idx + 1], refs[idx + 2]
        idx += 3
        y = None
        for kh in range(3):
            t = jnp.dot(s_ref[kh], X, preferred_element_type=jnp.float32)
            t = jnp.dot(t, w_ref[kh], preferred_element_type=jnp.float32)
            y = t if y is None else y + t
        y = y + b_ref[...]
        if conv_acts[l] == "relu":
            X = jnp.maximum(y, 0.0)
        else:
            X = jnp.where(y >= 0.0, y, LEAKY_SLOPE * y)

    w1s_ref, b1_ref, w2_ref, b2_ref, w3_ref, b3_ref = refs[idx:idx + 6]

    # fc_1: torch flatten(-3,-1) is (c, h, w)-ordered; w1s[r] is the matching
    # permuted slice of fc_1's weight, so the permutation is free at runtime.
    h = None
    for r in range(w1s_ref.shape[0]):
        t = jnp.dot(X[r:r + 1, :], w1s_ref[r], preferred_element_type=jnp.float32)
        h = t if h is None else h + t
    h = h + b1_ref[...]
    h = jnp.where(h >= 0.0, h, LEAKY_SLOPE * h)
    h = jnp.dot(h, w2_ref[...], preferred_element_type=jnp.float32) + b2_ref[...]
    h = jnp.where(h >= 0.0, h, LEAKY_SLOPE * h)
    y = jnp.dot(h, w3_ref[...], preferred_element_type=jnp.float32) + b3_ref[...]
    o_ref[0] = y.astype(o_ref.dtype)


# ------------------ Host-side one-time weight transformation ----------------

def _row_select_mats(H, OH, stride):
    """(3, OH, H): S[kh, i, r] = 1 iff r == stride*i + kh - 1 (zero if OOB)."""
    S = np.zeros((3, OH, H), np.float32)
    for kh in range(3):
        for i in range(OH):
            r = stride * i + kh - 1
            if 0 <= r < H:
                S[kh, i, r] = 1.0
    return jnp.asarray(S)


def _tap_weight_mats(w_oihw, W, OW, stride):
    """(3, W*Cin, OW*Cout) banded matrices encoding the horizontal taps."""
    cout, cin = int(w_oihw.shape[0]), int(w_oihw.shape[1])
    w_t = np.asarray(w_oihw).transpose(2, 3, 1, 0)      # (kh, kw, cin, cout)
    Wk = np.zeros((3, W * cin, OW * cout), np.float32)
    for kh in range(3):
        for kw in range(3):
            for j in range(OW):
                c = stride * j + kw - 1
                if 0 <= c < W:
                    Wk[kh, c * cin:(c + 1) * cin,
                       j * cout:(j + 1) * cout] = w_t[kh, kw]
    return jnp.asarray(Wk)


def prepare_params(params, spatial):
    """Transform torch-style params into the fused-kernel operand list."""
    convs = [(params["in_conv"], 2, "relu")]
    for wb1, wb2 in zip(params["hidden_conv_1"], params["hidden_conv_2"]):
        convs.append((wb1, 2, "leaky"))
        convs.append((wb2, 1, "leaky"))

    flat, acts = [], []
    H = spatial
    for (w, b), stride, act in convs:
        OH = (H + 2 - 3) // stride + 1
        flat.append(_row_select_mats(H, OH, stride))
        flat.append(_tap_weight_mats(w, H, OH, stride))
        flat.append(jnp.asarray(np.tile(np.asarray(b), OH))[None, :])
        acts.append(act)
        H = OH

    (w1, b1), (w2, b2), (w3, b3) = params["mlp"]
    c_last = int(convs[-1][0][0].shape[0])     # channels of the last conv
    HW = H                                     # final spatial size (4)
    w1_np = np.asarray(w1)
    stacks = []
    for h in range(HW):
        # kernel column k = w*c_last + c  ->  torch flatten row c*(HW*HW)+h*HW+w
        idx = [(k % c_last) * (HW * HW) + h * HW + (k // c_last)
               for k in range(HW * c_last)]
        stacks.append(w1_np[np.asarray(idx), :])
    flat.append(jnp.asarray(np.stack(stacks, axis=0)))   # (HW, HW*c_last, hid)
    flat.append(jnp.asarray(b1)[None, :])
    flat.append(jnp.asarray(w2))
    flat.append(jnp.asarray(b2)[None, :])
    flat.append(jnp.asarray(w3))
    flat.append(jnp.asarray(b3)[None, :])

    meta = dict(n_conv=len(convs), conv_acts=tuple(acts),
                out_dim=int(w3.shape[1]))
    return flat, meta


# ------------------------------ Pallas wrapper -------------------------------

def _zeros_map(rank):
    return lambda n: (0,) * rank


def make_forward(flat, meta):
    kernel = functools.partial(_fused_encoder_kernel,
                               n_conv=meta["n_conv"],
                               conv_acts=meta["conv_acts"])
    out_dim = meta["out_dim"]

    @jax.jit
    def fwd(flat_arrays, x_nchw):
        N, Cin, H, W = x_nchw.shape
        # Only XLA glue: NCHW -> per-image (H, W*Cin) row matrix (24 KiB).
        x3d = jnp.transpose(x_nchw, (0, 2, 3, 1)).reshape(N, H, W * Cin)

        in_specs = [pl.BlockSpec((1, H, W * Cin), lambda n: (n, 0, 0))]
        for a in flat_arrays:
            in_specs.append(pl.BlockSpec(a.shape, _zeros_map(a.ndim)))

        out = pl.pallas_call(
            kernel,
            out_shape=jax.ShapeDtypeStruct((N, 1, out_dim), jnp.float32),
            grid=(N,),
            in_specs=in_specs,
            out_specs=pl.BlockSpec((1, 1, out_dim), lambda n: (n, 0, 0)),
            compiler_params=pltpu.CompilerParams(
                dimension_semantics=("parallel",)),
        )(x3d, *flat_arrays)
        return out[:, 0, :]

    return lambda x: fwd(flat, x)


# ----------------------------- Model definition ------------------------------

def init_params(key, input_channels, output_dim, hidden_size, n_layers=2):
    def conv_init(k, cout, cin):
        k1, k2 = jax.random.split(k)
        fan_in = cin * 9
        w = jax.random.normal(k1, (cout, cin, 3, 3), jnp.float32) / jnp.sqrt(fan_in)
        b = 0.01 * jax.random.normal(k2, (cout,), jnp.float32)
        return w, b

    def lin_init(k, din, dout):
        k1, k2 = jax.random.split(k)
        w = jax.random.normal(k1, (din, dout), jnp.float32) / jnp.sqrt(din)
        b = 0.01 * jax.random.normal(k2, (dout,), jnp.float32)
        return w, b

    keys = jax.random.split(key, 1 + 2 * n_layers + 3)
    params = {
        "in_conv": conv_init(keys[0], hidden_size, input_channels),
        "hidden_conv_1": [conv_init(keys[1 + i], hidden_size, hidden_size)
                          for i in range(n_layers)],
        "hidden_conv_2": [conv_init(keys[1 + n_layers + i], hidden_size, hidden_size)
                          for i in range(n_layers)],
        "mlp": [lin_init(keys[-3], hidden_size * 4 * 4, hidden_size),
                lin_init(keys[-2], hidden_size, hidden_size),
                lin_init(keys[-1], hidden_size, output_dim)],
    }
    return params


def reference_forward(params, x_nchw):
    """Pure-JAX reference (NCHW throughout), mirrors the PyTorch module."""
    def conv(x, w, b, stride):
        y = jax.lax.conv_general_dilated(
            x, w, (stride, stride), ((1, 1), (1, 1)),
            dimension_numbers=("NCHW", "OIHW", "NCHW"))
        return y + b[None, :, None, None]

    w, b = params["in_conv"]
    x = jax.nn.relu(conv(x_nchw, w, b, 2))
    for (w1, b1), (w2, b2) in zip(params["hidden_conv_1"], params["hidden_conv_2"]):
        x = jax.nn.leaky_relu(conv(x, w1, b1, 2), LEAKY_SLOPE)
        x = jax.nn.leaky_relu(conv(x, w2, b2, 1), LEAKY_SLOPE)
    x = x.reshape(x.shape[0], -1)
    (w1, b1), (w2, b2), (w3, b3) = params["mlp"]
    h = jax.nn.leaky_relu(x @ w1 + b1, LEAKY_SLOPE)
    h = jax.nn.leaky_relu(h @ w2 + b2, LEAKY_SLOPE)
    return h @ w3 + b3


# ----------------------------------- Main ------------------------------------

if __name__ == "__main__":
    batch = 2
    input_channels = 3
    hidden_size = 32
    output_dim = 16
    spatial = 32  # MLP expects hidden_size*4*4 => three stride-2 convs => 32 -> 4

    key = jax.random.PRNGKey(0)
    k_params, k_x = jax.random.split(key)
    params = init_params(k_params, input_channels, output_dim, hidden_size, n_layers=2)
    x = jax.random.normal(k_x, (batch, input_channels, spatial, spatial), jnp.float32)

    flat, meta = prepare_params(params, spatial)          # one-time host prep
    forward = make_forward(flat, meta)

    out = jax.block_until_ready(forward(x))

    ref = jax.block_until_ready(reference_forward(params, x))
    assert out.shape == (batch, output_dim), out.shape
    max_err = float(jnp.max(jnp.abs(out - ref)))
    assert jnp.allclose(out, ref, rtol=1e-4, atol=1e-4), max_err

    print("KERNEL_OK")
</pallas_src>

<mosaic_0001>
module attributes {stable_mosaic.version = 11 : i64} {
  func.func @_fused_encoder_kernel(%arg0: i32, %arg1: memref<1x32x96xf32, #tpu.memory_space<vmem>>, %arg2: memref<3x16x32xf32, #tpu.memory_space<vmem>>, %arg3: memref<3x96x512xf32, #tpu.memory_space<vmem>>, %arg4: memref<1x512xf32, #tpu.memory_space<vmem>>, %arg5: memref<3x8x16xf32, #tpu.memory_space<vmem>>, %arg6: memref<3x512x256xf32, #tpu.memory_space<vmem>>, %arg7: memref<1x256xf32, #tpu.memory_space<vmem>>, %arg8: memref<3x8x8xf32, #tpu.memory_space<vmem>>, %arg9: memref<3x256x256xf32, #tpu.memory_space<vmem>>, %arg10: memref<1x256xf32, #tpu.memory_space<vmem>>, %arg11: memref<3x4x8xf32, #tpu.memory_space<vmem>>, %arg12: memref<3x256x128xf32, #tpu.memory_space<vmem>>, %arg13: memref<1x128xf32, #tpu.memory_space<vmem>>, %arg14: memref<3x4x4xf32, #tpu.memory_space<vmem>>, %arg15: memref<3x128x128xf32, #tpu.memory_space<vmem>>, %arg16: memref<1x128xf32, #tpu.memory_space<vmem>>, %arg17: memref<4x128x32xf32, #tpu.memory_space<vmem>>, %arg18: memref<1x32xf32, #tpu.memory_space<vmem>>, %arg19: memref<32x32xf32, #tpu.memory_space<vmem>>, %arg20: memref<1x32xf32, #tpu.memory_space<vmem>>, %arg21: memref<32x16xf32, #tpu.memory_space<vmem>>, %arg22: memref<1x16xf32, #tpu.memory_space<vmem>>, %arg23: memref<1x1x16xf32, #tpu.memory_space<vmem>>) attributes {dimension_semantics = [#tpu.dimension_semantics<parallel>], iteration_bounds = array<i64: 2>, scalar_prefetch = 0 : i64, scratch_operands = 0 : i64, tpu.core_type = #tpu.core_type<tc>, window_params = [{transform_indices = @transform_0, window_bounds = array<i64: 1, 32, 96>}, {pipeline_mode = #tpu.pipeline_mode<synchronous>, transform_indices = @transform_1, window_bounds = array<i64: 3, 16, 32>}, {pipeline_mode = #tpu.pipeline_mode<synchronous>, transform_indices = @transform_2, window_bounds = array<i64: 3, 96, 512>}, {pipeline_mode = #tpu.pipeline_mode<synchronous>, transform_indices = @transform_3, window_bounds = array<i64: 1, 512>}, {pipeline_mode = #tpu.pipeline_mode<synchronous>, transform_indices = @transform_4, window_bounds = array<i64: 3, 8, 16>}, {pipeline_mode = #tpu.pipeline_mode<synchronous>, transform_indices = @transform_5, window_bounds = array<i64: 3, 512, 256>}, {pipeline_mode = #tpu.pipeline_mode<synchronous>, transform_indices = @transform_6, window_bounds = array<i64: 1, 256>}, {pipeline_mode = #tpu.pipeline_mode<synchronous>, transform_indices = @transform_7, window_bounds = array<i64: 3, 8, 8>}, {pipeline_mode = #tpu.pipeline_mode<synchronous>, transform_indices = @transform_8, window_bounds = array<i64: 3, 256, 256>}, {pipeline_mode = #tpu.pipeline_mode<synchronous>, transform_indices = @transform_9, window_bounds = array<i64: 1, 256>}, {pipeline_mode = #tpu.pipeline_mode<synchronous>, transform_indices = @transform_10, window_bounds = array<i64: 3, 4, 8>}, {pipeline_mode = #tpu.pipeline_mode<synchronous>, transform_indices = @transform_11, window_bounds = array<i64: 3, 256, 128>}, {pipeline_mode = #tpu.pipeline_mode<synchronous>, transform_indices = @transform_12, window_bounds = array<i64: 1, 128>}, {pipeline_mode = #tpu.pipeline_mode<synchronous>, transform_indices = @transform_13, window_bounds = array<i64: 3, 4, 4>}, {pipeline_mode = #tpu.pipeline_mode<synchronous>, transform_indices = @transform_14, window_bounds = array<i64: 3, 128, 128>}, {pipeline_mode = #tpu.pipeline_mode<synchronous>, transform_indices = @transform_15, window_bounds = array<i64: 1, 128>}, {pipeline_mode = #tpu.pipeline_mode<synchronous>, transform_indices = @transform_16, window_bounds = array<i64: 4, 128, 32>}, {pipeline_mode = #tpu.pipeline_mode<synchronous>, transform_indices = @transform_17, window_bounds = array<i64: 1, 32>}, {pipeline_mode = #tpu.pipeline_mode<synchronous>, transform_indices = @transform_18, window_bounds = array<i64: 32, 32>}, {pipeline_mode = #tpu.pipeline_mode<synchronous>, transform_indices = @transform_19, window_bounds = array<i64: 1, 32>}, {pipeline_mode = #tpu.pipeline_mode<synchronous>, transform_indices = @transform_20, window_bounds = array<i64: 32, 16>}, {pipeline_mode = #tpu.pipeline_mode<synchronous>, transform_indices = @transform_21, window_bounds = array<i64: 1, 16>}, {transform_indices = @transform_22, window_bounds = array<i64: 1, 1, 16>}]} {
    %c0 = arith.constant 0 : index
    %c0_0 = arith.constant 0 : index
    %c0_1 = arith.constant 0 : index
    %0 = vector.load %arg1[%c0, %c0_0, %c0_1] : memref<1x32x96xf32, #tpu.memory_space<vmem>>, vector<1x32x96xf32>
    %1 = vector.shape_cast %0 : vector<1x32x96xf32> to vector<32x96xf32>
    %c0_2 = arith.constant 0 : index
    %c0_3 = arith.constant 0 : index
    %c0_4 = arith.constant 0 : index
    %2 = vector.load %arg2[%c0_2, %c0_3, %c0_4] : memref<3x16x32xf32, #tpu.memory_space<vmem>>, vector<1x16x32xf32>
    %3 = vector.shape_cast %2 : vector<1x16x32xf32> to vector<16x32xf32>
    %cst = arith.constant dense<0.000000e+00> : vector<16x96xf32>
    %4 = tpu.matmul %3, %1, %cst {dimension_numbers = #tpu.dot_dimension_numbers<[1], [0], [0], [1], [0, 0, 1, 1], [], []>} : vector<16x32xf32>, vector<32x96xf32>, vector<16x96xf32> -> vector<16x96xf32>
    %c0_5 = arith.constant 0 : index
    %c0_6 = arith.constant 0 : index
    %c0_7 = arith.constant 0 : index
    %5 = vector.load %arg3[%c0_5, %c0_6, %c0_7] : memref<3x96x512xf32, #tpu.memory_space<vmem>>, vector<1x96x512xf32>
    %6 = vector.shape_cast %5 : vector<1x96x512xf32> to vector<96x512xf32>
    %cst_8 = arith.constant dense<0.000000e+00> : vector<16x512xf32>
    %7 = tpu.matmul %4, %6, %cst_8 {dimension_numbers = #tpu.dot_dimension_numbers<[1], [0], [0], [1], [0, 0, 1, 1], [], []>} : vector<16x96xf32>, vector<96x512xf32>, vector<16x512xf32> -> vector<16x512xf32>
    %c1 = arith.constant 1 : index
    %c0_9 = arith.constant 0 : index
    %c0_10 = arith.constant 0 : index
    %8 = vector.load %arg2[%c1, %c0_9, %c0_10] : memref<3x16x32xf32, #tpu.memory_space<vmem>>, vector<1x16x32xf32>
    %9 = vector.shape_cast %8 : vector<1x16x32xf32> to vector<16x32xf32>
    %cst_11 = arith.constant dense<0.000000e+00> : vector<16x96xf32>
    %10 = tpu.matmul %9, %1, %cst_11 {dimension_numbers = #tpu.dot_dimension_numbers<[1], [0], [0], [1], [0, 0, 1, 1], [], []>} : vector<16x32xf32>, vector<32x96xf32>, vector<16x96xf32> -> vector<16x96xf32>
    %c1_12 = arith.constant 1 : index
    %c0_13 = arith.constant 0 : index
    %c0_14 = arith.constant 0 : index
    %11 = vector.load %arg3[%c1_12, %c0_13, %c0_14] : memref<3x96x512xf32, #tpu.memory_space<vmem>>, vector<1x96x512xf32>
    %12 = vector.shape_cast %11 : vector<1x96x512xf32> to vector<96x512xf32>
    %cst_15 = arith.constant dense<0.000000e+00> : vector<16x512xf32>
    %13 = tpu.matmul %10, %12, %cst_15 {dimension_numbers = #tpu.dot_dimension_numbers<[1], [0], [0], [1], [0, 0, 1, 1], [], []>} : vector<16x96xf32>, vector<96x512xf32>, vector<16x512xf32> -> vector<16x512xf32>
    %14 = arith.addf %7, %13 : vector<16x512xf32>
    %c2 = arith.constant 2 : index
    %c0_16 = arith.constant 0 : index
    %c0_17 = arith.constant 0 : index
    %15 = vector.load %arg2[%c2, %c0_16, %c0_17] : memref<3x16x32xf32, #tpu.memory_space<vmem>>, vector<1x16x32xf32>
    %16 = vector.shape_cast %15 : vector<1x16x32xf32> to vector<16x32xf32>
    %cst_18 = arith.constant dense<0.000000e+00> : vector<16x96xf32>
    %17 = tpu.matmul %16, %1, %cst_18 {dimension_numbers = #tpu.dot_dimension_numbers<[1], [0], [0], [1], [0, 0, 1, 1], [], []>} : vector<16x32xf32>, vector<32x96xf32>, vector<16x96xf32> -> vector<16x96xf32>
    %c2_19 = arith.constant 2 : index
    %c0_20 = arith.constant 0 : index
    %c0_21 = arith.constant 0 : index
    %18 = vector.load %arg3[%c2_19, %c0_20, %c0_21] : memref<3x96x512xf32, #tpu.memory_space<vmem>>, vector<1x96x512xf32>
    %19 = vector.shape_cast %18 : vector<1x96x512xf32> to vector<96x512xf32>
    %cst_22 = arith.constant dense<0.000000e+00> : vector<16x512xf32>
    %20 = tpu.matmul %17, %19, %cst_22 {dimension_numbers = #tpu.dot_dimension_numbers<[1], [0], [0], [1], [0, 0, 1, 1], [], []>} : vector<16x96xf32>, vector<96x512xf32>, vector<16x512xf32> -> vector<16x512xf32>
    %21 = arith.addf %14, %20 : vector<16x512xf32>
    %c0_23 = arith.constant 0 : index
    %c0_24 = arith.constant 0 : index
    %22 = vector.load %arg4[%c0_23, %c0_24] : memref<1x512xf32, #tpu.memory_space<vmem>>, vector<1x512xf32>
    %23 = vector.broadcast %22 : vector<1x512xf32> to vector<16x512xf32>
    %24 = arith.addf %21, %23 : vector<16x512xf32>
    %cst_25 = arith.constant 0.000000e+00 : f32
    %25 = vector.broadcast %cst_25 : f32 to vector<16x512xf32>
    %26 = arith.maximumf %24, %25 : vector<16x512xf32>
    %c0_26 = arith.constant 0 : index
    %c0_27 = arith.constant 0 : index
    %c0_28 = arith.constant 0 : index
    %27 = vector.load %arg5[%c0_26, %c0_27, %c0_28] : memref<3x8x16xf32, #tpu.memory_space<vmem>>, vector<1x8x16xf32>
    %28 = vector.shape_cast %27 : vector<1x8x16xf32> to vector<8x16xf32>
    %cst_29 = arith.constant dense<0.000000e+00> : vector<8x512xf32>
    %29 = tpu.matmul %28, %26, %cst_29 {dimension_numbers = #tpu.dot_dimension_numbers<[1], [0], [0], [1], [0, 0, 1, 1], [], []>} : vector<8x16xf32>, vector<16x512xf32>, vector<8x512xf32> -> vector<8x512xf32>
    %c0_30 = arith.constant 0 : index
    %c0_31 = arith.constant 0 : index
    %c0_32 = arith.constant 0 : index
    %30 = vector.load %arg6[%c0_30, %c0_31, %c0_32] : memref<3x512x256xf32, #tpu.memory_space<vmem>>, vector<1x512x256xf32>
    %31 = vector.shape_cast %30 : vector<1x512x256xf32> to vector<512x256xf32>
    %cst_33 = arith.constant dense<0.000000e+00> : vector<8x256xf32>
    %32 = tpu.matmul %29, %31, %cst_33 {dimension_numbers = #tpu.dot_dimension_numbers<[1], [0], [0], [1], [0, 0, 1, 1], [], []>} : vector<8x512xf32>, vector<512x256xf32>, vector<8x256xf32> -> vector<8x256xf32>
    %c1_34 = arith.constant 1 : index
    %c0_35 = arith.constant 0 : index
    %c0_36 = arith.constant 0 : index
    %33 = vector.load %arg5[%c1_34, %c0_35, %c0_36] : memref<3x8x16xf32, #tpu.memory_space<vmem>>, vector<1x8x16xf32>
    %34 = vector.shape_cast %33 : vector<1x8x16xf32> to vector<8x16xf32>
    %cst_37 = arith.constant dense<0.000000e+00> : vector<8x512xf32>
    %35 = tpu.matmul %34, %26, %cst_37 {dimension_numbers = #tpu.dot_dimension_numbers<[1], [0], [0], [1], [0, 0, 1, 1], [], []>} : vector<8x16xf32>, vector<16x512xf32>, vector<8x512xf32> -> vector<8x512xf32>
    %c1_38 = arith.constant 1 : index
    %c0_39 = arith.constant 0 : index
    %c0_40 = arith.constant 0 : index
    %36 = vector.load %arg6[%c1_38, %c0_39, %c0_40] : memref<3x512x256xf32, #tpu.memory_space<vmem>>, vector<1x512x256xf32>
    %37 = vector.shape_cast %36 : vector<1x512x256xf32> to vector<512x256xf32>
    %cst_41 = arith.constant dense<0.000000e+00> : vector<8x256xf32>
    %38 = tpu.matmul %35, %37, %cst_41 {dimension_numbers = #tpu.dot_dimension_numbers<[1], [0], [0], [1], [0, 0, 1, 1], [], []>} : vector<8x512xf32>, vector<512x256xf32>, vector<8x256xf32> -> vector<8x256xf32>
    %39 = arith.addf %32, %38 : vector<8x256xf32>
    %c2_42 = arith.constant 2 : index
    %c0_43 = arith.constant 0 : index
    %c0_44 = arith.constant 0 : index
    %40 = vector.load %arg5[%c2_42, %c0_43, %c0_44] : memref<3x8x16xf32, #tpu.memory_space<vmem>>, vector<1x8x16xf32>
    %41 = vector.shape_cast %40 : vector<1x8x16xf32> to vector<8x16xf32>
    %cst_45 = arith.constant dense<0.000000e+00> : vector<8x512xf32>
    %42 = tpu.matmul %41, %26, %cst_45 {dimension_numbers = #tpu.dot_dimension_numbers<[1], [0], [0], [1], [0, 0, 1, 1], [], []>} : vector<8x16xf32>, vector<16x512xf32>, vector<8x512xf32> -> vector<8x512xf32>
    %c2_46 = arith.constant 2 : index
    %c0_47 = arith.constant 0 : index
    %c0_48 = arith.constant 0 : index
    %43 = vector.load %arg6[%c2_46, %c0_47, %c0_48] : memref<3x512x256xf32, #tpu.memory_space<vmem>>, vector<1x512x256xf32>
    %44 = vector.shape_cast %43 : vector<1x512x256xf32> to vector<512x256xf32>
    %cst_49 = arith.constant dense<0.000000e+00> : vector<8x256xf32>
    %45 = tpu.matmul %42, %44, %cst_49 {dimension_numbers = #tpu.dot_dimension_numbers<[1], [0], [0], [1], [0, 0, 1, 1], [], []>} : vector<8x512xf32>, vector<512x256xf32>, vector<8x256xf32> -> vector<8x256xf32>
    %46 = arith.addf %39, %45 : vector<8x256xf32>
    %c0_50 = arith.constant 0 : index
    %c0_51 = arith.constant 0 : index
    %47 = vector.load %arg7[%c0_50, %c0_51] : memref<1x256xf32, #tpu.memory_space<vmem>>, vector<1x256xf32>
    %48 = vector.broadcast %47 : vector<1x256xf32> to vector<8x256xf32>
    %49 = arith.addf %46, %48 : vector<8x256xf32>
    %cst_52 = arith.constant 0.000000e+00 : f32
    %50 = vector.broadcast %cst_52 : f32 to vector<8x256xf32>
    %51 = arith.cmpf oge, %49, %50 : vector<8x256xf32>
    %cst_53 = arith.constant 2.000000e-01 : f32
    %52 = vector.broadcast %cst_53 : f32 to vector<8x256xf32>
    %53 = arith.mulf %52, %49 : vector<8x256xf32>
    %54 = arith.select %51, %49, %53 : vector<8x256xi1>, vector<8x256xf32>
    %c0_54 = arith.constant 0 : index
    %c0_55 = arith.constant 0 : index
    %c0_56 = arith.constant 0 : index
    %55 = vector.load %arg8[%c0_54, %c0_55, %c0_56] : memref<3x8x8xf32, #tpu.memory_space<vmem>>, vector<1x8x8xf32>
    %56 = vector.shape_cast %55 : vector<1x8x8xf32> to vector<8x8xf32>
    %cst_57 = arith.constant dense<0.000000e+00> : vector<8x256xf32>
    %57 = tpu.matmul %56, %54, %cst_57 {dimension_numbers = #tpu.dot_dimension_numbers<[1], [0], [0], [1], [0, 0, 1, 1], [], []>} : vector<8x8xf32>, vector<8x256xf32>, vector<8x256xf32> -> vector<8x256xf32>
    %c0_58 = arith.constant 0 : index
    %c0_59 = arith.constant 0 : index
    %c0_60 = arith.constant 0 : index
    %58 = vector.load %arg9[%c0_58, %c0_59, %c0_60] : memref<3x256x256xf32, #tpu.memory_space<vmem>>, vector<1x256x256xf32>
    %59 = vector.shape_cast %58 : vector<1x256x256xf32> to vector<256x256xf32>
    %cst_61 = arith.constant dense<0.000000e+00> : vector<8x256xf32>
    %60 = tpu.matmul %57, %59, %cst_61 {dimension_numbers = #tpu.dot_dimension_numbers<[1], [0], [0], [1], [0, 0, 1, 1], [], []>} : vector<8x256xf32>, vector<256x256xf32>, vector<8x256xf32> -> vector<8x256xf32>
    %c1_62 = arith.constant 1 : index
    %c0_63 = arith.constant 0 : index
    %c0_64 = arith.constant 0 : index
    %61 = vector.load %arg8[%c1_62, %c0_63, %c0_64] : memref<3x8x8xf32, #tpu.memory_space<vmem>>, vector<1x8x8xf32>
    %62 = vector.shape_cast %61 : vector<1x8x8xf32> to vector<8x8xf32>
    %cst_65 = arith.constant dense<0.000000e+00> : vector<8x256xf32>
    %63 = tpu.matmul %62, %54, %cst_65 {dimension_numbers = #tpu.dot_dimension_numbers<[1], [0], [0], [1], [0, 0, 1, 1], [], []>} : vector<8x8xf32>, vector<8x256xf32>, vector<8x256xf32> -> vector<8x256xf32>
    %c1_66 = arith.constant 1 : index
    %c0_67 = arith.constant 0 : index
    %c0_68 = arith.constant 0 : index
    %64 = vector.load %arg9[%c1_66, %c0_67, %c0_68] : memref<3x256x256xf32, #tpu.memory_space<vmem>>, vector<1x256x256xf32>
    %65 = vector.shape_cast %64 : vector<1x256x256xf32> to vector<256x256xf32>
    %cst_69 = arith.constant dense<0.000000e+00> : vector<8x256xf32>
    %66 = tpu.matmul %63, %65, %cst_69 {dimension_numbers = #tpu.dot_dimension_numbers<[1], [0], [0], [1], [0, 0, 1, 1], [], []>} : vector<8x256xf32>, vector<256x256xf32>, vector<8x256xf32> -> vector<8x256xf32>
    %67 = arith.addf %60, %66 : vector<8x256xf32>
    %c2_70 = arith.constant 2 : index
    %c0_71 = arith.constant 0 : index
    %c0_72 = arith.constant 0 : index
    %68 = vector.load %arg8[%c2_70, %c0_71, %c0_72] : memref<3x8x8xf32, #tpu.memory_space<vmem>>, vector<1x8x8xf32>
    %69 = vector.shape_cast %68 : vector<1x8x8xf32> to vector<8x8xf32>
    %cst_73 = arith.constant dense<0.000000e+00> : vector<8x256xf32>
    %70 = tpu.matmul %69, %54, %cst_73 {dimension_numbers = #tpu.dot_dimension_numbers<[1], [0], [0], [1], [0, 0, 1, 1], [], []>} : vector<8x8xf32>, vector<8x256xf32>, vector<8x256xf32> -> vector<8x256xf32>
    %c2_74 = arith.constant 2 : index
    %c0_75 = arith.constant 0 : index
    %c0_76 = arith.constant 0 : index
    %71 = vector.load %arg9[%c2_74, %c0_75, %c0_76] : memref<3x256x256xf32, #tpu.memory_space<vmem>>, vector<1x256x256xf32>
    %72 = vector.shape_cast %71 : vector<1x256x256xf32> to vector<256x256xf32>
    %cst_77 = arith.constant dense<0.000000e+00> : vector<8x256xf32>
    %73 = tpu.matmul %70, %72, %cst_77 {dimension_numbers = #tpu.dot_dimension_numbers<[1], [0], [0], [1], [0, 0, 1, 1], [], []>} : vector<8x256xf32>, vector<256x256xf32>, vector<8x256xf32> -> vector<8x256xf32>
    %74 = arith.addf %67, %73 : vector<8x256xf32>
    %c0_78 = arith.constant 0 : index
    %c0_79 = arith.constant 0 : index
    %75 = vector.load %arg10[%c0_78, %c0_79] : memref<1x256xf32, #tpu.memory_space<vmem>>, vector<1x256xf32>
    %76 = vector.broadcast %75 : vector<1x256xf32> to vector<8x256xf32>
    %77 = arith.addf %74, %76 : vector<8x256xf32>
    %cst_80 = arith.constant 0.000000e+00 : f32
    %78 = vector.broadcast %cst_80 : f32 to vector<8x256xf32>
    %79 = arith.cmpf oge, %77, %78 : vector<8x256xf32>
    %cst_81 = arith.constant 2.000000e-01 : f32
    %80 = vector.broadcast %cst_81 : f32 to vector<8x256xf32>
    %81 = arith.mulf %80, %77 : vector<8x256xf32>
    %82 = arith.select %79, %77, %81 : vector<8x256xi1>, vector<8x256xf32>
    %c0_82 = arith.constant 0 : index
    %c0_83 = arith.constant 0 : index
    %c0_84 = arith.constant 0 : index
    %83 = vector.load %arg11[%c0_82, %c0_83, %c0_84] : memref<3x4x8xf32, #tpu.memory_space<vmem>>, vector<1x4x8xf32>
    %84 = vector.shape_cast %83 : vector<1x4x8xf32> to vector<4x8xf32>
    %cst_85 = arith.constant dense<0.000000e+00> : vector<4x256xf32>
    %85 = tpu.matmul %84, %82, %cst_85 {dimension_numbers = #tpu.dot_dimension_numbers<[1], [0], [0], [1], [0, 0, 1, 1], [], []>} : vector<4x8xf32>, vector<8x256xf32>, vector<4x256xf32> -> vector<4x256xf32>
    %c0_86 = arith.constant 0 : index
    %c0_87 = arith.constant 0 : index
    %c0_88 = arith.constant 0 : index
    %86 = vector.load %arg12[%c0_86, %c0_87, %c0_88] : memref<3x256x128xf32, #tpu.memory_space<vmem>>, vector<1x256x128xf32>
    %87 = vector.shape_cast %86 : vector<1x256x128xf32> to vector<256x128xf32>
    %cst_89 = arith.constant dense<0.000000e+00> : vector<4x128xf32>
    %88 = tpu.matmul %85, %87, %cst_89 {dimension_numbers = #tpu.dot_dimension_numbers<[1], [0], [0], [1], [0, 0, 1, 1], [], []>} : vector<4x256xf32>, vector<256x128xf32>, vector<4x128xf32> -> vector<4x128xf32>
    %c1_90 = arith.constant 1 : index
    %c0_91 = arith.constant 0 : index
    %c0_92 = arith.constant 0 : index
    %89 = vector.load %arg11[%c1_90, %c0_91, %c0_92] : memref<3x4x8xf32, #tpu.memory_space<vmem>>, vector<1x4x8xf32>
    %90 = vector.shape_cast %89 : vector<1x4x8xf32> to vector<4x8xf32>
    %cst_93 = arith.constant dense<0.000000e+00> : vector<4x256xf32>
    %91 = tpu.matmul %90, %82, %cst_93 {dimension_numbers = #tpu.dot_dimension_numbers<[1], [0], [0], [1], [0, 0, 1, 1], [], []>} : vector<4x8xf32>, vector<8x256xf32>, vector<4x256xf32> -> vector<4x256xf32>
    %c1_94 = arith.constant 1 : index
    %c0_95 = arith.constant 0 : index
    %c0_96 = arith.constant 0 : index
    %92 = vector.load %arg12[%c1_94, %c0_95, %c0_96] : memref<3x256x128xf32, #tpu.memory_space<vmem>>, vector<1x256x128xf32>
    %93 = vector.shape_cast %92 : vector<1x256x128xf32> to vector<256x128xf32>
    %cst_97 = arith.constant dense<0.000000e+00> : vector<4x128xf32>
    %94 = tpu.matmul %91, %93, %cst_97 {dimension_numbers = #tpu.dot_dimension_numbers<[1], [0], [0], [1], [0, 0, 1, 1], [], []>} : vector<4x256xf32>, vector<256x128xf32>, vector<4x128xf32> -> vector<4x128xf32>
    %95 = arith.addf %88, %94 : vector<4x128xf32>
    %c2_98 = arith.constant 2 : index
    %c0_99 = arith.constant 0 : index
    %c0_100 = arith.constant 0 : index
    %96 = vector.load %arg11[%c2_98, %c0_99, %c0_100] : memref<3x4x8xf32, #tpu.memory_space<vmem>>, vector<1x4x8xf32>
    %97 = vector.shape_cast %96 : vector<1x4x8xf32> to vector<4x8xf32>
    %cst_101 = arith.constant dense<0.000000e+00> : vector<4x256xf32>
    %98 = tpu.matmul %97, %82, %cst_101 {dimension_numbers = #tpu.dot_dimension_numbers<[1], [0], [0], [1], [0, 0, 1, 1], [], []>} : vector<4x8xf32>, vector<8x256xf32>, vector<4x256xf32> -> vector<4x256xf32>
    %c2_102 = arith.constant 2 : index
    %c0_103 = arith.constant 0 : index
    %c0_104 = arith.constant 0 : index
    %99 = vector.load %arg12[%c2_102, %c0_103, %c0_104] : memref<3x256x128xf32, #tpu.memory_space<vmem>>, vector<1x256x128xf32>
    %100 = vector.shape_cast %99 : vector<1x256x128xf32> to vector<256x128xf32>
    %cst_105 = arith.constant dense<0.000000e+00> : vector<4x128xf32>
    %101 = tpu.matmul %98, %100, %cst_105 {dimension_numbers = #tpu.dot_dimension_numbers<[1], [0], [0], [1], [0, 0, 1, 1], [], []>} : vector<4x256xf32>, vector<256x128xf32>, vector<4x128xf32> -> vector<4x128xf32>
    %102 = arith.addf %95, %101 : vector<4x128xf32>
    %c0_106 = arith.constant 0 : index
    %c0_107 = arith.constant 0 : index
    %103 = vector.load %arg13[%c0_106, %c0_107] : memref<1x128xf32, #tpu.memory_space<vmem>>, vector<1x128xf32>
    %104 = vector.broadcast %103 : vector<1x128xf32> to vector<4x128xf32>
    %105 = arith.addf %102, %104 : vector<4x128xf32>
    %cst_108 = arith.constant 0.000000e+00 : f32
    %106 = vector.broadcast %cst_108 : f32 to vector<4x128xf32>
    %107 = arith.cmpf oge, %105, %106 : vector<4x128xf32>
    %cst_109 = arith.constant 2.000000e-01 : f32
    %108 = vector.broadcast %cst_109 : f32 to vector<4x128xf32>
    %109 = arith.mulf %108, %105 : vector<4x128xf32>
    %110 = arith.select %107, %105, %109 : vector<4x128xi1>, vector<4x128xf32>
    %c0_110 = arith.constant 0 : index
    %c0_111 = arith.constant 0 : index
    %c0_112 = arith.constant 0 : index
    %111 = vector.load %arg14[%c0_110, %c0_111, %c0_112] : memref<3x4x4xf32, #tpu.memory_space<vmem>>, vector<1x4x4xf32>
    %112 = vector.shape_cast %111 : vector<1x4x4xf32> to vector<4x4xf32>
    %cst_113 = arith.constant dense<0.000000e+00> : vector<4x128xf32>
    %113 = tpu.matmul %112, %110, %cst_113 {dimension_numbers = #tpu.dot_dimension_numbers<[1], [0], [0], [1], [0, 0, 1, 1], [], []>} : vector<4x4xf32>, vector<4x128xf32>, vector<4x128xf32> -> vector<4x128xf32>
    %c0_114 = arith.constant 0 : index
    %c0_115 = arith.constant 0 : index
    %c0_116 = arith.constant 0 : index
    %114 = vector.load %arg15[%c0_114, %c0_115, %c0_116] : memref<3x128x128xf32, #tpu.memory_space<vmem>>, vector<1x128x128xf32>
    %115 = vector.shape_cast %114 : vector<1x128x128xf32> to vector<128x128xf32>
    %cst_117 = arith.constant dense<0.000000e+00> : vector<4x128xf32>
    %116 = tpu.matmul %113, %115, %cst_117 {dimension_numbers = #tpu.dot_dimension_numbers<[1], [0], [0], [1], [0, 0, 1, 1], [], []>} : vector<4x128xf32>, vector<128x128xf32>, vector<4x128xf32> -> vector<4x128xf32>
    %c1_118 = arith.constant 1 : index
    %c0_119 = arith.constant 0 : index
    %c0_120 = arith.constant 0 : index
    %117 = vector.load %arg14[%c1_118, %c0_119, %c0_120] : memref<3x4x4xf32, #tpu.memory_space<vmem>>, vector<1x4x4xf32>
    %118 = vector.shape_cast %117 : vector<1x4x4xf32> to vector<4x4xf32>
    %cst_121 = arith.constant dense<0.000000e+00> : vector<4x128xf32>
    %119 = tpu.matmul %118, %110, %cst_121 {dimension_numbers = #tpu.dot_dimension_numbers<[1], [0], [0], [1], [0, 0, 1, 1], [], []>} : vector<4x4xf32>, vector<4x128xf32>, vector<4x128xf32> -> vector<4x128xf32>
    %c1_122 = arith.constant 1 : index
    %c0_123 = arith.constant 0 : index
    %c0_124 = arith.constant 0 : index
    %120 = vector.load %arg15[%c1_122, %c0_123, %c0_124] : memref<3x128x128xf32, #tpu.memory_space<vmem>>, vector<1x128x128xf32>
    %121 = vector.shape_cast %120 : vector<1x128x128xf32> to vector<128x128xf32>
    %cst_125 = arith.constant dense<0.000000e+00> : vector<4x128xf32>
    %122 = tpu.matmul %119, %121, %cst_125 {dimension_numbers = #tpu.dot_dimension_numbers<[1], [0], [0], [1], [0, 0, 1, 1], [], []>} : vector<4x128xf32>, vector<128x128xf32>, vector<4x128xf32> -> vector<4x128xf32>
    %123 = arith.addf %116, %122 : vector<4x128xf32>
    %c2_126 = arith.constant 2 : index
    %c0_127 = arith.constant 0 : index
    %c0_128 = arith.constant 0 : index
    %124 = vector.load %arg14[%c2_126, %c0_127, %c0_128] : memref<3x4x4xf32, #tpu.memory_space<vmem>>, vector<1x4x4xf32>
    %125 = vector.shape_cast %124 : vector<1x4x4xf32> to vector<4x4xf32>
    %cst_129 = arith.constant dense<0.000000e+00> : vector<4x128xf32>
    %126 = tpu.matmul %125, %110, %cst_129 {dimension_numbers = #tpu.dot_dimension_numbers<[1], [0], [0], [1], [0, 0, 1, 1], [], []>} : vector<4x4xf32>, vector<4x128xf32>, vector<4x128xf32> -> vector<4x128xf32>
    %c2_130 = arith.constant 2 : index
    %c0_131 = arith.constant 0 : index
    %c0_132 = arith.constant 0 : index
    %127 = vector.load %arg15[%c2_130, %c0_131, %c0_132] : memref<3x128x128xf32, #tpu.memory_space<vmem>>, vector<1x128x128xf32>
    %128 = vector.shape_cast %127 : vector<1x128x128xf32> to vector<128x128xf32>
    %cst_133 = arith.constant dense<0.000000e+00> : vector<4x128xf32>
    %129 = tpu.matmul %126, %128, %cst_133 {dimension_numbers = #tpu.dot_dimension_numbers<[1], [0], [0], [1], [0, 0, 1, 1], [], []>} : vector<4x128xf32>, vector<128x128xf32>, vector<4x128xf32> -> vector<4x128xf32>
    %130 = arith.addf %123, %129 : vector<4x128xf32>
    %c0_134 = arith.constant 0 : index
    %c0_135 = arith.constant 0 : index
    %131 = vector.load %arg16[%c0_134, %c0_135] : memref<1x128xf32, #tpu.memory_space<vmem>>, vector<1x128xf32>
    %132 = vector.broadcast %131 : vector<1x128xf32> to vector<4x128xf32>
    %133 = arith.addf %130, %132 : vector<4x128xf32>
    %cst_136 = arith.constant 0.000000e+00 : f32
    %134 = vector.broadcast %cst_136 : f32 to vector<4x128xf32>
    %135 = arith.cmpf oge, %133, %134 : vector<4x128xf32>
    %cst_137 = arith.constant 2.000000e-01 : f32
    %136 = vector.broadcast %cst_137 : f32 to vector<4x128xf32>
    %137 = arith.mulf %136, %133 : vector<4x128xf32>
    %138 = arith.select %135, %133, %137 : vector<4x128xi1>, vector<4x128xf32>
    %139 = vector.extract_strided_slice %138 {offsets = [0, 0], sizes = [1, 128], strides = [1, 1]} : vector<4x128xf32> to vector<1x128xf32>
    %c0_138 = arith.constant 0 : index
    %c0_139 = arith.constant 0 : index
    %c0_140 = arith.constant 0 : index
    %140 = vector.load %arg17[%c0_138, %c0_139, %c0_140] : memref<4x128x32xf32, #tpu.memory_space<vmem>>, vector<1x128x32xf32>
    %141 = vector.shape_cast %140 : vector<1x128x32xf32> to vector<128x32xf32>
    %cst_141 = arith.constant dense<0.000000e+00> : vector<1x32xf32>
    %142 = tpu.matmul %139, %141, %cst_141 {dimension_numbers = #tpu.dot_dimension_numbers<[1], [0], [0], [1], [0, 0, 1, 1], [], []>} : vector<1x128xf32>, vector<128x32xf32>, vector<1x32xf32> -> vector<1x32xf32>
    %143 = vector.extract_strided_slice %138 {offsets = [1, 0], sizes = [1, 128], strides = [1, 1]} : vector<4x128xf32> to vector<1x128xf32>
    %c1_142 = arith.constant 1 : index
    %c0_143 = arith.constant 0 : index
    %c0_144 = arith.constant 0 : index
    %144 = vector.load %arg17[%c1_142, %c0_143, %c0_144] : memref<4x128x32xf32, #tpu.memory_space<vmem>>, vector<1x128x32xf32>
    %145 = vector.shape_cast %144 : vector<1x128x32xf32> to vector<128x32xf32>
    %cst_145 = arith.constant dense<0.000000e+00> : vector<1x32xf32>
    %146 = tpu.matmul %143, %145, %cst_145 {dimension_numbers = #tpu.dot_dimension_numbers<[1], [0], [0], [1], [0, 0, 1, 1], [], []>} : vector<1x128xf32>, vector<128x32xf32>, vector<1x32xf32> -> vector<1x32xf32>
    %147 = arith.addf %142, %146 : vector<1x32xf32>
    %148 = vector.extract_strided_slice %138 {offsets = [2, 0], sizes = [1, 128], strides = [1, 1]} : vector<4x128xf32> to vector<1x128xf32>
    %c2_146 = arith.constant 2 : index
    %c0_147 = arith.constant 0 : index
    %c0_148 = arith.constant 0 : index
    %149 = vector.load %arg17[%c2_146, %c0_147, %c0_148] : memref<4x128x32xf32, #tpu.memory_space<vmem>>, vector<1x128x32xf32>
    %150 = vector.shape_cast %149 : vector<1x128x32xf32> to vector<128x32xf32>
    %cst_149 = arith.constant dense<0.000000e+00> : vector<1x32xf32>
    %151 = tpu.matmul %148, %150, %cst_149 {dimension_numbers = #tpu.dot_dimension_numbers<[1], [0], [0], [1], [0, 0, 1, 1], [], []>} : vector<1x128xf32>, vector<128x32xf32>, vector<1x32xf32> -> vector<1x32xf32>
    %152 = arith.addf %147, %151 : vector<1x32xf32>
    %153 = vector.extract_strided_slice %138 {offsets = [3, 0], sizes = [1, 128], strides = [1, 1]} : vector<4x128xf32> to vector<1x128xf32>
    %c3 = arith.constant 3 : index
    %c0_150 = arith.constant 0 : index
    %c0_151 = arith.constant 0 : index
    %154 = vector.load %arg17[%c3, %c0_150, %c0_151] : memref<4x128x32xf32, #tpu.memory_space<vmem>>, vector<1x128x32xf32>
    %155 = vector.shape_cast %154 : vector<1x128x32xf32> to vector<128x32xf32>
    %cst_152 = arith.constant dense<0.000000e+00> : vector<1x32xf32>
    %156 = tpu.matmul %153, %155, %cst_152 {dimension_numbers = #tpu.dot_dimension_numbers<[1], [0], [0], [1], [0, 0, 1, 1], [], []>} : vector<1x128xf32>, vector<128x32xf32>, vector<1x32xf32> -> vector<1x32xf32>
    %157 = arith.addf %152, %156 : vector<1x32xf32>
    %c0_153 = arith.constant 0 : index
    %c0_154 = arith.constant 0 : index
    %158 = vector.load %arg18[%c0_153, %c0_154] : memref<1x32xf32, #tpu.memory_space<vmem>>, vector<1x32xf32>
    %159 = arith.addf %157, %158 : vector<1x32xf32>
    %cst_155 = arith.constant 0.000000e+00 : f32
    %160 = vector.broadcast %cst_155 : f32 to vector<1x32xf32>
    %161 = arith.cmpf oge, %159, %160 : vector<1x32xf32>
    %cst_156 = arith.constant 2.000000e-01 : f32
    %162 = vector.broadcast %cst_156 : f32 to vector<1x32xf32>
    %163 = arith.mulf %162, %159 : vector<1x32xf32>
    %164 = arith.select %161, %159, %163 : vector<1x32xi1>, vector<1x32xf32>
    %c0_157 = arith.constant 0 : index
    %c0_158 = arith.constant 0 : index
    %165 = vector.load %arg19[%c0_157, %c0_158] : memref<32x32xf32, #tpu.memory_space<vmem>>, vector<32x32xf32>
    %cst_159 = arith.constant dense<0.000000e+00> : vector<1x32xf32>
    %166 = tpu.matmul %164, %165, %cst_159 {dimension_numbers = #tpu.dot_dimension_numbers<[1], [0], [0], [1], [0, 0, 1, 1], [], []>} : vector<1x32xf32>, vector<32x32xf32>, vector<1x32xf32> -> vector<1x32xf32>
    %c0_160 = arith.constant 0 : index
    %c0_161 = arith.constant 0 : index
    %167 = vector.load %arg20[%c0_160, %c0_161] : memref<1x32xf32, #tpu.memory_space<vmem>>, vector<1x32xf32>
    %168 = arith.addf %166, %167 : vector<1x32xf32>
    %cst_162 = arith.constant 0.000000e+00 : f32
    %169 = vector.broadcast %cst_162 : f32 to vector<1x32xf32>
    %170 = arith.cmpf oge, %168, %169 : vector<1x32xf32>
    %cst_163 = arith.constant 2.000000e-01 : f32
    %171 = vector.broadcast %cst_163 : f32 to vector<1x32xf32>
    %172 = arith.mulf %171, %168 : vector<1x32xf32>
    %173 = arith.select %170, %168, %172 : vector<1x32xi1>, vector<1x32xf32>
    %c0_164 = arith.constant 0 : index
    %c0_165 = arith.constant 0 : index
    %174 = vector.load %arg21[%c0_164, %c0_165] : memref<32x16xf32, #tpu.memory_space<vmem>>, vector<32x16xf32>
    %cst_166 = arith.constant dense<0.000000e+00> : vector<1x16xf32>
    %175 = tpu.matmul %173, %174, %cst_166 {dimension_numbers = #tpu.dot_dimension_numbers<[1], [0], [0], [1], [0, 0, 1, 1], [], []>} : vector<1x32xf32>, vector<32x16xf32>, vector<1x16xf32> -> vector<1x16xf32>
    %c0_167 = arith.constant 0 : index
    %c0_168 = arith.constant 0 : index
    %176 = vector.load %arg22[%c0_167, %c0_168] : memref<1x16xf32, #tpu.memory_space<vmem>>, vector<1x16xf32>
    %177 = arith.addf %175, %176 : vector<1x16xf32>
    %c0_169 = arith.constant 0 : index
    %c0_170 = arith.constant 0 : index
    %c0_171 = arith.constant 0 : index
    %178 = vector.load %arg23[%c0_169, %c0_170, %c0_171] : memref<1x1x16xf32, #tpu.memory_space<vmem>>, vector<1x1x16xf32>
    %179 = vector.shape_cast %178 : vector<1x1x16xf32> to vector<1x16xf32>
    %180 = vector.shape_cast %177 : vector<1x16xf32> to vector<1x1x16xf32>
    tpu.vector_store %arg23[%c0_169, %c0_170, %c0_171], %180 {strides = array<i32>} : memref<1x1x16xf32, #tpu.memory_space<vmem>>, vector<1x1x16xf32>,
    return
  }
  func.func @transform_0(%arg0: i32) -> (i32, i32, i32) {
    %c0_i32 = arith.constant 0 : i32
    %c0_i32_0 = arith.constant 0 : i32
    %c0_i32_1 = arith.constant 0 : i32
    return %arg0, %c0_i32, %c0_i32_0 : i32, i32, i32
  }
  func.func @transform_1(%arg0: i32) -> (i32, i32, i32) {
    %c0_i32 = arith.constant 0 : i32
    %c0_i32_0 = arith.constant 0 : i32
    %c0_i32_1 = arith.constant 0 : i32
    %c0_i32_2 = arith.constant 0 : i32
    return %c0_i32, %c0_i32_0, %c0_i32_1 : i32, i32, i32
  }
  func.func @transform_2(%arg0: i32) -> (i32, i32, i32) {
    %c0_i32 = arith.constant 0 : i32
    %c0_i32_0 = arith.constant 0 : i32
    %c0_i32_1 = arith.constant 0 : i32
    %c0_i32_2 = arith.constant 0 : i32
    return %c0_i32, %c0_i32_0, %c0_i32_1 : i32, i32, i32
  }
  func.func @transform_3(%arg0: i32) -> (i32, i32) {
    %c0_i32 = arith.constant 0 : i32
    %c0_i32_0 = arith.constant 0 : i32
    %c0_i32_1 = arith.constant 0 : i32
    return %c0_i32, %c0_i32_0 : i32, i32
  }
  func.func @transform_4(%arg0: i32) -> (i32, i32, i32) {
    %c0_i32 = arith.constant 0 : i32
    %c0_i32_0 = arith.constant 0 : i32
    %c0_i32_1 = arith.constant 0 : i32
    %c0_i32_2 = arith.constant 0 : i32
    return %c0_i32, %c0_i32_0, %c0_i32_1 : i32, i32, i32
  }
  func.func @transform_5(%arg0: i32) -> (i32, i32, i32) {
    %c0_i32 = arith.constant 0 : i32
    %c0_i32_0 = arith.constant 0 : i32
    %c0_i32_1 = arith.constant 0 : i32
    %c0_i32_2 = arith.constant 0 : i32
    return %c0_i32, %c0_i32_0, %c0_i32_1 : i32, i32, i32
  }
  func.func @transform_6(%arg0: i32) -> (i32, i32) {
    %c0_i32 = arith.constant 0 : i32
    %c0_i32_0 = arith.constant 0 : i32
    %c0_i32_1 = arith.constant 0 : i32
    return %c0_i32, %c0_i32_0 : i32, i32
  }
  func.func @transform_7(%arg0: i32) -> (i32, i32, i32) {
    %c0_i32 = arith.constant 0 : i32
    %c0_i32_0 = arith.constant 0 : i32
    %c0_i32_1 = arith.constant 0 : i32
    %c0_i32_2 = arith.constant 0 : i32
    return %c0_i32, %c0_i32_0, %c0_i32_1 : i32, i32, i32
  }
  func.func @transform_8(%arg0: i32) -> (i32, i32, i32) {
    %c0_i32 = arith.constant 0 : i32
    %c0_i32_0 = arith.constant 0 : i32
    %c0_i32_1 = arith.constant 0 : i32
    %c0_i32_2 = arith.constant 0 : i32
    return %c0_i32, %c0_i32_0, %c0_i32_1 : i32, i32, i32
  }
  func.func @transform_9(%arg0: i32) -> (i32, i32) {
    %c0_i32 = arith.constant 0 : i32
    %c0_i32_0 = arith.constant 0 : i32
    %c0_i32_1 = arith.constant 0 : i32
    return %c0_i32, %c0_i32_0 : i32, i32
  }
  func.func @transform_10(%arg0: i32) -> (i32, i32, i32) {
    %c0_i32 = arith.constant 0 : i32
    %c0_i32_0 = arith.constant 0 : i32
    %c0_i32_1 = arith.constant 0 : i32
    %c0_i32_2 = arith.constant 0 : i32
    return %c0_i32, %c0_i32_0, %c0_i32_1 : i32, i32, i32
  }
  func.func @transform_11(%arg0: i32) -> (i32, i32, i32) {
    %c0_i32 = arith.constant 0 : i32
    %c0_i32_0 = arith.constant 0 : i32
    %c0_i32_1 = arith.constant 0 : i32
    %c0_i32_2 = arith.constant 0 : i32
    return %c0_i32, %c0_i32_0, %c0_i32_1 : i32, i32, i32
  }
  func.func @transform_12(%arg0: i32) -> (i32, i32) {
    %c0_i32 = arith.constant 0 : i32
    %c0_i32_0 = arith.constant 0 : i32
    %c0_i32_1 = arith.constant 0 : i32
    return %c0_i32, %c0_i32_0 : i32, i32
  }
  func.func @transform_13(%arg0: i32) -> (i32, i32, i32) {
    %c0_i32 = arith.constant 0 : i32
    %c0_i32_0 = arith.constant 0 : i32
    %c0_i32_1 = arith.constant 0 : i32
    %c0_i32_2 = arith.constant 0 : i32
    return %c0_i32, %c0_i32_0, %c0_i32_1 : i32, i32, i32
  }
  func.func @transform_14(%arg0: i32) -> (i32, i32, i32) {
    %c0_i32 = arith.constant 0 : i32
    %c0_i32_0 = arith.constant 0 : i32
    %c0_i32_1 = arith.constant 0 : i32
    %c0_i32_2 = arith.constant 0 : i32
    return %c0_i32, %c0_i32_0, %c0_i32_1 : i32, i32, i32
  }
  func.func @transform_15(%arg0: i32) -> (i32, i32) {
    %c0_i32 = arith.constant 0 : i32
    %c0_i32_0 = arith.constant 0 : i32
    %c0_i32_1 = arith.constant 0 : i32
    return %c0_i32, %c0_i32_0 : i32, i32
  }
  func.func @transform_16(%arg0: i32) -> (i32, i32, i32) {
    %c0_i32 = arith.constant 0 : i32
    %c0_i32_0 = arith.constant 0 : i32
    %c0_i32_1 = arith.constant 0 : i32
    %c0_i32_2 = arith.constant 0 : i32
    return %c0_i32, %c0_i32_0, %c0_i32_1 : i32, i32, i32
  }
  func.func @transform_17(%arg0: i32) -> (i32, i32) {
    %c0_i32 = arith.constant 0 : i32
    %c0_i32_0 = arith.constant 0 : i32
    %c0_i32_1 = arith.constant 0 : i32
    return %c0_i32, %c0_i32_0 : i32, i32
  }
  func.func @transform_18(%arg0: i32) -> (i32, i32) {
    %c0_i32 = arith.constant 0 : i32
    %c0_i32_0 = arith.constant 0 : i32
    %c0_i32_1 = arith.constant 0 : i32
    return %c0_i32, %c0_i32_0 : i32, i32
  }
  func.func @transform_19(%arg0: i32) -> (i32, i32) {
    %c0_i32 = arith.constant 0 : i32
    %c0_i32_0 = arith.constant 0 : i32
    %c0_i32_1 = arith.constant 0 : i32
    return %c0_i32, %c0_i32_0 : i32, i32
  }
  func.func @transform_20(%arg0: i32) -> (i32, i32) {
    %c0_i32 = arith.constant 0 : i32
    %c0_i32_0 = arith.constant 0 : i32
    %c0_i32_1 = arith.constant 0 : i32
    return %c0_i32, %c0_i32_0 : i32, i32
  }
  func.func @transform_21(%arg0: i32) -> (i32, i32) {
    %c0_i32 = arith.constant 0 : i32
    %c0_i32_0 = arith.constant 0 : i32
    %c0_i32_1 = arith.constant 0 : i32
    return %c0_i32, %c0_i32_0 : i32, i32
  }
  func.func @transform_22(%arg0: i32) -> (i32, i32, i32) {
    %c0_i32 = arith.constant 0 : i32
    %c0_i32_0 = arith.constant 0 : i32
    %c0_i32_1 = arith.constant 0 : i32
    return %arg0, %c0_i32, %c0_i32_0 : i32, i32, i32
  }
}

</mosaic_0001>

<bundles_post_ra>
// kernel: fwd.1
= control target key start
LH: loop header
LB: loop body
LE: loop exit
PB: predicated region body
PF: predicated region fallthrough
CT: control target
= control target key end

     0   :  { %s9405_s0 = inlined_call_operand.vmem [shape: f32[2,32,96], index: 0, kind: input, shape index: {}]   ;;  %s9406_s1 = inlined_call_operand.hbm [shape: f32[3,16,32], index: 1, kind: input, shape index: {}]   ;;  %s9407_s2 = inlined_call_operand.hbm [shape: f32[3,96,512], index: 2, kind: input, shape index: {}]   ;;  %s9408_s3 = inlined_call_operand.hbm [shape: f32[1,512], index: 3, kind: input, shape index: {}]   ;;  %s9409_s4 = inlined_call_operand.hbm [shape: f32[3,8,16], index: 4, kind: input, shape index: {}]   ;;  %s9410_s5 = inlined_call_operand.hbm [shape: f32[3,512,256], index: 5, kind: input, shape index: {}]   ;;  %s9411_s6 = inlined_call_operand.hbm [shape: f32[1,256], index: 6, kind: input, shape index: {}]   ;;  %s9412_s7 = inlined_call_operand.hbm [shape: f32[3,8,8], index: 7, kind: input, shape index: {}]   ;;  %s9413_s8 = inlined_call_operand.hbm [shape: f32[3,256,256], index: 8, kind: input, shape index: {}]   ;;  %s9414_s9 = inlined_call_operand.hbm [shape: f32[1,256], index: 9, kind: input, shape index: {}]   ;;  %s9415_s10 = inlined_call_operand.hbm [shape: f32[3,4,8], index: 10, kind: input, shape index: {}]   ;;  %s9416_s11 = inlined_call_operand.hbm [shape: f32[3,256,128], index: 11, kind: input, shape index: {}]   ;;  %s9417_s12 = inlined_call_operand.hbm [shape: f32[1,128], index: 12, kind: input, shape index: {}]   ;;  %s9418_s13 = inlined_call_operand.hbm [shape: f32[3,4,4], index: 13, kind: input, shape index: {}]   ;;  %s9419_s14 = inlined_call_operand.hbm [shape: f32[3,128,128], index: 14, kind: input, shape index: {}]   ;;  %s9420_s15 = inlined_call_operand.hbm [shape: f32[1,128], index: 15, kind: input, shape index: {}]   ;;  %s9421_s16 = inlined_call_operand.vmem [shape: f32[4,128,32], index: 16, kind: input, shape index: {}]   ;;  %s9422_s17 = inlined_call_operand.hbm [shape: f32[1,32], index: 17, kind: input, shape index: {}]   ;;  %s9423_s18 = inlined_call_operand.hbm [shape: f32[32,32], index: 18, kind: input, shape index: {}]   ;;  %s9424_s19 = inlined_call_operand.hbm [shape: f32[1,32], index: 19, kind: input, shape index: {}]   ;;  %s9425_s20 = inlined_call_operand.vmem [shape: f32[32,16], index: 20, kind: input, shape index: {}]   ;;  %s9426_s21 = inlined_call_operand.hbm [shape: f32[1,16], index: 21, kind: input, shape index: {}]   ;;  %s9427_s22 = inlined_call_operand.hbm [shape: f32[2,1,16], index: 22, kind: output, shape index: {}]  }
   0x1   :  { %9463 = sst [smem:[#allocation54_spill]] %s9405_s0 }
   0x2   :  { %9464 = sst [smem:[#allocation55_spill]] %s9406_s1 }
   0x3   :  { %9465 = sst [smem:[#allocation56_spill]] %s9407_s2 }
   0x4   :  { %9466 = sst [smem:[#allocation57_spill]] %s9408_s3 }
   0x5   :  { %9467 = sst [smem:[#allocation58_spill]] %s9409_s4 }
   0x6   :  { %9468 = sst [smem:[#allocation59_spill]] %s9410_s5 }
   0x7   :  { %9469 = sst [smem:[#allocation60_spill]] %s9411_s6 }
   0x8   :  { %9470 = sst [smem:[#allocation61_spill]] %s9413_s8 }
   0x9   :  { %9471 = sst [smem:[#allocation62_spill]] %s9415_s10 }
   0xa   :  { %9472 = sst [smem:[#allocation63_spill]] %s9417_s12 }
   0xb   :  { %9473 = sst [smem:[#allocation64_spill]] %s9421_s16 }
   0xc   :  { %9474 = sst [smem:[#allocation65_spill]] %s9425_s20 }
   0xd   :  { %9475 = sst [smem:[#allocation66_spill]] %s9426_s21 }
   0xe   :  { %9476 = sst [smem:[#allocation67_spill]] %s9427_s22 }
   0xf   :  { %27 = vsyncpa [#allocation3], 0 }
  0x10   :  { %28 = vsyncpa [#allocation6], 0 }
  0x11   :  { %29 = vsyncpa [#allocation9], 0 }
  0x12   :  { %30 = vsyncpa [#allocation12], 0 }
  0x13   :  { %31 = vsyncpa [#allocation15], 0 }
  0x14   :  { %32 = vsyncpa [#allocation18], 0 }
  0x15   :  { %33 = vsyncpa [#allocation21], 0 }
  0x16   :  { %34 = vsyncpa [#allocation24], 0 }
  0x17   :  { %35 = vsyncpa [#allocation27], 0 }
  0x18   :  { %36 = vsyncpa [#allocation30], 0 }
  0x19   :  { %37 = vsyncpa [#allocation4], 0 }
  0x1a   :  { %39 = vsyncpa [#allocation4 + $0x1], 0  ;;  %s8429_s3 = smov 0   ;;  %s8431_s28 = smov 0  }
  0x1b   :  { %s8433_s29 = smov 0   ;;  %s8435_s30 = smov 0  }
  0x1c LB: > { %9477 = sst [smem:[#allocation44_spill]] %s8269_s3  ;;  %s8450_s4 = sadd.s32 4294967295, %s8281_s30   ;;  %s8281_s30 = sphi %s8435_s30, %s9544_s30   ;;  %s8277_s29 = sphi %s8433_s29, %s9547_s29   ;;  %s8273_s28 = sphi %s8431_s28, %s9546_s28   ;;  %s8269_s3 = sphi %s8429_s3, %s9545_s3  }
  0x1d   : > { %9478 = sst [smem:[#allocation45_spill]] %s8273_s28  ;;  %s5623_s0 = sadd.s32 4294967294, %s8281_s30  }
  0x1e   : > { %9479 = sst [smem:[#allocation46_spill]] %s8277_s29  ;;  %s8454_s23 = sadd.s32 1, %s8281_s30  }
  0x1f   : > { %9480 = sst [smem:[#allocation47_spill]] %s8281_s30  ;;  %s519_s1 = sadd.s32 1, %s8277_s29 }
  0x20   : > { %9481 = sst [smem:[#allocation48_spill]] %s8450_s4  ;;  %s516_s5 = ssub.s32 %s8281_s30, %s8454_s23 }
  0x21   : > { %9482 = sst [smem:[#allocation49_spill]] %s8454_s23  ;;  %p529_p0 = scmp.ne.s32.totalorder %s8277_s29, %s8273_s28 }
  0x22   : > { %p517_p1 = scmp.eq.s32.totalorder %s516_s5, 0  ;;  %p530_p2 = scmp.eq.s32.totalorder %s8450_s4, 1 }
  0x23   : > { %p535_p3 = scmp.ne.s32.totalorder %s8273_s28, %s8269_s3  ;;  %p536_p4 = scmp.eq.s32.totalorder %s5623_s0, 1 }
  0x24   : > { %s8465_s24 = scalar_select %p517_p1, %s8277_s29, %s519_s1  }
  0x25   : > { %p8467_p5 = por %p530_p2, %p529_p0  ;;  %p8471_p6 = por %p536_p4, %p535_p3 }
  0x26   : > { %9483 = sst [smem:[#allocation50_spill]] %s8465_s24  ;;  %p5624_p7 = scmp.ge.s32.totalorder %s8281_s30, 1 }
  0x27   : > { %s9484_s6 = scalar_select %p8467_p5, 1, 0 }
  0x28   : > { %s9486_s25 = scalar_select %p8471_p6, 1, 0 }
  0x29   : > { %9485 = sst [smem:[#allocation51_spill]] %s9484_s6  ;;  %p543_p8 = scmp.lt.s32.totalorder %s8281_s30, 3 }
  0x2a   : > { %9487 = sst [smem:[#allocation52_spill]] %s9486_s25  ;;  %p9443_p9 = scmp.eq.s32.totalorder %s8450_s4, 0 }
  0x2b   : > { %p8478_p10 = pnand %p5624_p7, %p543_p8  ;;  %s8283_s2 = smov [#allocation5]  }
  0x2c   : > { %s568_s27 = sshll.u32 %s8283_s2, 4  ;;  %s8284_s1 = smov [#allocation8]   ;;  %s569_s27 = int_to_ptr.vmem [resolvable:$true] %s568_s27 }
  0x2d   : > { %s9488_s26 = scalar_select %p8478_p10, 1, 0 }
  0x2e   : > { %p7484_p11 = pneg %p8478_p10  ;;  %s592_s5 = sshll.u32 %s8284_s1, 4  ;;  %s593_s5 = int_to_ptr.vmem [resolvable:$true] %s592_s5 }
  0x2f   : > { %9489 = sst [smem:[#allocation53_spill]] %s9488_s26  ;;  %s9491_s23 = sld [smem:[#allocation56_spill]] }
  0x30   : > { %p8486_p12 = pnand %p9443_p9, %p7484_p11 }
  0x32   : > { %p8498_p0 = pneg %p8486_p12 }
  0x35   : > { %s7647_s25 = scalar_lea.hbm %s9491_s23, 18432 }
  0x36   : > { %p7648_p13 = scmp.ne.s32.totalorder %s9491_s23, %s7647_s25  ;;  %p7654_p3 = scmp.lt.u32.totalorder %s7647_s25, %s9491_s23 }
  0x38   : > { %p7650_p1 = pnand %p8498_p0, %p7648_p13 }
  0x3a   : > { %p7651_p2 = pneg %p7650_p1 }
  0x3c   : > { %p7656_p4 = pnand %p7654_p3, %p7651_p2 }
  0x3e   : > { %7659 = shalt.err (!%p7656_p4)
}
  0x3f   : > { %s7660_s29 = scalar_lea.vmem %s569_s27, 18432  ;;  %p7668_p9 = scmp.lt.s32.totalorder %s569_s27, %s569_s27 }
  0x40   : > { %p7661_p7 = scmp.ne.s32.totalorder %s569_s27, %s7660_s29  ;;  %p7669_p6 = scmp.lt.s32.totalorder %s7660_s29, %s7660_s29 }
  0x42   : > { %p7663_p8 = pnand %p7661_p7, %p8498_p0  ;;  %p7670_p5 = por %p7669_p6, %p7668_p9 }
  0x44   : > { %p7664_p11 = pneg %p7663_p8 }
  0x46   : > { %p7671_p10 = pnand %p7670_p5, %p7664_p11 }
  0x48   : > { %7674 = shalt.err (!%p7671_p10)
}
  0x49   : > { %s8285_s3 = smov 512   ;;  %s8286_s30 = smov 32  }
  0x4a   : > { %7490 = dma.hbm_to_vmem [thread:$0]  (!%p8486_p12), %s9491_s23, 18432, %s569_s27, [#allocation6], %s8285_s3, %s8285_s3, %s8286_s30  }
  0x4b   : > { %s8287_s6 = smov [#allocation11]   ;;  %s9493_s20 = sld [smem:[#allocation58_spill]] }
  0x4c   : > { %s619_s25 = sshll.u32 %s8287_s6, 4  ;;  %s620_s25 = int_to_ptr.vmem [resolvable:$true] %s619_s25 }
  0x51   : > { %s7675_s16 = scalar_lea.hbm %s9493_s20, 384 }
  0x52   : > { %p7676_p5 = scmp.ne.s32.totalorder %s9493_s20, %s7675_s16  ;;  %p7682_p10 = scmp.lt.u32.totalorder %s7675_s16, %s9493_s20 }
  0x54   : > { %p7678_p6 = pnand %p7676_p5, %p8498_p0 }
  0x56   : > { %p7679_p9 = pneg %p7678_p6 }
  0x58   : > { %p7684_p13 = pnand %p7682_p10, %p7679_p9 }
  0x5a   : > { %7687 = shalt.err (!%p7684_p13)
}
  0x5b   : > { %s7688_s27 = scalar_lea.vmem %s593_s5, 384  ;;  %p7696_p4 = scmp.lt.s32.totalorder %s593_s5, %s593_s5 }
  0x5c   : > { %p7689_p1 = scmp.ne.s32.totalorder %s593_s5, %s7688_s27  ;;  %p7697_p7 = scmp.lt.s32.totalorder %s7688_s27, %s7688_s27 }
  0x5e   : > { %p7691_p2 = pnand %p7689_p1, %p8498_p0  ;;  %p7698_p8 = por %p7697_p7, %p7696_p4 }
  0x60   : > { %p7692_p3 = pneg %p7691_p2 }
  0x62   : > { %p7699_p11 = pnand %p7698_p8, %p7692_p3 }
  0x64   : > { %7702 = shalt.err (!%p7699_p11)
}
  0x65   : > { %s9453_s28 = smov 128   ;;  %s9457_s4 = smov 8  }
  0x66   : > { %7496 = dma.hbm_to_vmem [thread:$0]  (!%p8486_p12), %s9493_s20, 384, %s593_s5, [#allocation9], %s9453_s28, %s9453_s28, %s9457_s4  }
  0x67   : > { %s9494_s30 = sld [smem:[#allocation60_spill]] }
  0x6d   : > { %s9495_s22 = smov %s9494_s30  ;;  %s7703_s24 = scalar_lea.hbm %s9494_s30, 32 }
  0x6e   : > { %p7704_p5 = scmp.ne.s32.totalorder %s9495_s22, %s7703_s24  ;;  %p7710_p10 = scmp.lt.u32.totalorder %s7703_s24, %s9495_s22 }
  0x70   : > { %p7706_p6 = pnand %p7704_p5, %p8498_p0 }
  0x72   : > { %p7707_p9 = pneg %p7706_p6 }
  0x74   : > { %p7712_p13 = pnand %p7710_p10, %p7707_p9 }
  0x76   : > { %7715 = shalt.err (!%p7712_p13)
}
  0x77   : > { %s7716_s16 = scalar_lea.vmem %s620_s25, 32  ;;  %p7724_p4 = scmp.lt.s32.totalorder %s620_s25, %s620_s25 }
  0x78   : > { %p7717_p1 = scmp.ne.s32.totalorder %s620_s25, %s7716_s16  ;;  %p7725_p7 = scmp.lt.s32.totalorder %s7716_s16, %s7716_s16 }
  0x7a   : > { %p7719_p2 = pnand %p7717_p1, %p8498_p0  ;;  %p7726_p8 = por %p7725_p7, %p7724_p4 }
  0x7c   : > { %p7720_p3 = pneg %p7719_p2 }
  0x7e   : > { %p7727_p11 = pnand %p7726_p8, %p7720_p3 }
  0x80   : > { %7730 = shalt.err (!%p7727_p11)
}
  0x81   : > { %7502 = dma.hbm_to_vmem [thread:$0]  (!%p8486_p12), %s9495_s22, 32, %s620_s25, [#allocation12]  }
  0x82   : > { %s8290_s26 = smov [#allocation14]   ;;  %s8291_s30 = smov [#allocation17]  }
  0x83   : > { %s642_s3 = sshll.u32 %s8290_s26, 4  ;;  %s666_s24 = sshll.u32 %s8291_s30, 4  ;;  %s643_s3 = int_to_ptr.vmem [resolvable:$true] %s642_s3  ;;  %s667_s24 = int_to_ptr.vmem [resolvable:$true] %s666_s24 }
  0x84   : > { %s9496_s8 = sld [smem:[#allocation61_spill]] }
  0x8a   : > { %s7731_s29 = scalar_lea.hbm %s9496_s8, 24576 }
  0x8b   : > { %p7732_p5 = scmp.ne.s32.totalorder %s9496_s8, %s7731_s29  ;;  %p7738_p10 = scmp.lt.u32.totalorder %s7731_s29, %s9496_s8 }
  0x8d   : > { %p7734_p6 = pnand %p7732_p5, %p8498_p0 }
  0x8f   : > { %p7735_p9 = pneg %p7734_p6 }
  0x91   : > { %p7740_p13 = pnand %p7738_p10, %p7735_p9 }
  0x93   : > { %7743 = shalt.err (!%p7740_p13)
}
  0x94   : > { %s7744_s25 = scalar_lea.vmem %s643_s3, 24576  ;;  %p7752_p4 = scmp.lt.s32.totalorder %s643_s3, %s643_s3 }
  0x95   : > { %p7745_p1 = scmp.ne.s32.totalorder %s643_s3, %s7744_s25  ;;  %p7753_p7 = scmp.lt.s32.totalorder %s7744_s25, %s7744_s25 }
  0x97   : > { %p7747_p2 = pnand %p7745_p1, %p8498_p0  ;;  %p7754_p8 = por %p7753_p7, %p7752_p4 }
  0x99   : > { %p7748_p3 = pneg %p7747_p2 }
  0x9b   : > { %p7755_p11 = pnand %p7754_p8, %p7748_p3 }
  0x9d   : > { %7758 = shalt.err (!%p7755_p11)
}
  0x9e   : > { %s9455_s21 = smov 256   ;;  %s9456_s26 = smov 16  }
  0x9f   : > { %7508 = dma.hbm_to_vmem [thread:$0]  (!%p8486_p12), %s9496_s8, 24576, %s643_s3, [#allocation15], %s9455_s21, %s9455_s21, %s9456_s26  }
  0xa0   : > { %s9497_s10 = sld [smem:[#allocation62_spill]] }
  0xa6   : > { %s7759_s29 = scalar_lea.hbm %s9497_s10, 192 }
  0xa7   : > { %p7760_p5 = scmp.ne.s32.totalorder %s9497_s10, %s7759_s29  ;;  %p7766_p10 = scmp.lt.u32.totalorder %s7759_s29, %s9497_s10 }
  0xa9   : > { %p7762_p6 = pnand %p7760_p5, %p8498_p0 }
  0xab   : > { %p7763_p9 = pneg %p7762_p6 }
  0xad   : > { %p7768_p13 = pnand %p7766_p10, %p7763_p9 }
  0xaf   : > { %7771 = shalt.err (!%p7768_p13)
}
  0xb0   : > { %s7772_s28 = scalar_lea.vmem %s667_s24, 192  ;;  %p7780_p4 = scmp.lt.s32.totalorder %s667_s24, %s667_s24 }
  0xb1   : > { %p7773_p1 = scmp.ne.s32.totalorder %s667_s24, %s7772_s28  ;;  %p7781_p7 = scmp.lt.s32.totalorder %s7772_s28, %s7772_s28 }
  0xb3   : > { %p7775_p2 = pnand %p7773_p1, %p8498_p0  ;;  %p7782_p8 = por %p7781_p7, %p7780_p4 }
  0xb5   : > { %p7776_p3 = pneg %p7775_p2 }
  0xb7   : > { %p7783_p11 = pnand %p7782_p8, %p7776_p3 }
  0xb9   : > { %7786 = shalt.err (!%p7783_p11)
}
  0xba   : > { %s9460_s3 = smov 64   ;;  %s9461_s30 = smov 4  }
  0xbb   : > { %7514 = dma.hbm_to_vmem [thread:$0]  (!%p8486_p12), %s9497_s10, 192, %s667_s24, [#allocation18], %s9460_s3, %s9460_s3, %s9461_s30  }
  0xbc   : > { %s8296_s29 = smov [#allocation20]   ;;  %s8297_s16 = smov [#allocation23]  }
  0xbd   : > { %s693_s27 = sshll.u32 %s8296_s29, 4  ;;  %s716_s5 = sshll.u32 %s8297_s16, 4  ;;  %s694_s27 = int_to_ptr.vmem [resolvable:$true] %s693_s27  ;;  %s717_s5 = int_to_ptr.vmem [resolvable:$true] %s716_s5 }
  0xbe   : > { %s9498_s12 = sld [smem:[#allocation63_spill]] }
  0xc4   : > { %s7787_s21 = scalar_lea.hbm %s9498_s12, 16 }
  0xc5   : > { %p7788_p5 = scmp.ne.s32.totalorder %s9498_s12, %s7787_s21  ;;  %p7794_p10 = scmp.lt.u32.totalorder %s7787_s21, %s9498_s12 }
  0xc7   : > { %p7790_p6 = pnand %p7788_p5, %p8498_p0 }
  0xc9   : > { %p7791_p9 = pneg %p7790_p6 }
  0xcb   : > { %p7796_p13 = pnand %p7794_p10, %p7791_p9 }
  0xcd   : > { %7799 = shalt.err (!%p7796_p13)
}
  0xce   : > { %s7800_s24 = scalar_lea.vmem %s694_s27, 16  ;;  %s7807_s6 = scalar_lea.vmem %s694_s27, 32 }
  0xcf   : > { %p7801_p1 = scmp.ne.s32.totalorder %s694_s27, %s7800_s24  ;;  %p7808_p4 = scmp.lt.s32.totalorder %s694_s27, %s694_s27 }
  0xd0   : > { %p7809_p7 = scmp.lt.s32.totalorder %s7807_s6, %s7800_s24 }
  0xd1   : > { %p7803_p2 = pnand %p7801_p1, %p8498_p0 }
  0xd2   : > { %p7810_p8 = por %p7809_p7, %p7808_p4 }
  0xd3   : > { %p7804_p3 = pneg %p7803_p2 }
  0xd5   : > { %p7811_p11 = pnand %p7810_p8, %p7804_p3 }
  0xd7   : > { %7814 = shalt.err (!%p7811_p11)
}
  0xd8   : > { %7520 = dma.hbm_to_vmem [thread:$0]  (!%p8486_p12), %s9498_s12, 16, %s694_s27, [#allocation21]  }
  0xd9   : > { %s7815_s21 = scalar_lea.hbm %s9419_s14, 6144 }
  0xda   : > { %p7816_p5 = scmp.ne.s32.totalorder %s9419_s14, %s7815_s21  ;;  %p7822_p10 = scmp.lt.u32.totalorder %s7815_s21, %s9419_s14 }
  0xdc   : > { %p7818_p6 = pnand %p7816_p5, %p8498_p0 }
  0xde   : > { %p7819_p9 = pneg %p7818_p6 }
  0xe0   : > { %p7824_p13 = pnand %p7822_p10, %p7819_p9 }
  0xe2   : > { %7827 = shalt.err (!%p7824_p13)
}
  0xe3   : > { %s7828_s28 = scalar_lea.vmem %s717_s5, 6144  ;;  %p7836_p4 = scmp.lt.s32.totalorder %s717_s5, %s717_s5 }
  0xe4   : > { %p7829_p1 = scmp.ne.s32.totalorder %s717_s5, %s7828_s28  ;;  %p7837_p7 = scmp.lt.s32.totalorder %s7828_s28, %s7828_s28 }
  0xe6   : > { %p7831_p2 = pnand %p7829_p1, %p8498_p0  ;;  %p7838_p8 = por %p7837_p7, %p7836_p4 }
  0xe8   : > { %p7832_p3 = pneg %p7831_p2 }
  0xea   : > { %p7839_p11 = pnand %p7838_p8, %p7832_p3 }
  0xec   : > { %7842 = shalt.err (!%p7839_p11)
}
  0xed   : > { %s9499_s27 = smov 8   ;;  %s9500_s24 = smov 128  }
  0xee   : > { %7526 = dma.hbm_to_vmem [thread:$0]  (!%p8486_p12), %s9419_s14, 6144, %s717_s5, [#allocation24], %s9500_s24, %s9500_s24, %s9499_s27  }
  0xef   : > { %s8298_s26 = smov [#allocation26]   ;;  %s8299_s20 = smov [#allocation29]  }
  0xf0   : > { %s744_s8 = sshll.u32 %s8298_s26, 4  ;;  %s768_s21 = sshll.u32 %s8299_s20, 4  ;;  %s745_s8 = int_to_ptr.vmem [resolvable:$true] %s744_s8  ;;  %s769_s21 = int_to_ptr.vmem [resolvable:$true] %s768_s21 }
  0xf1   : > { %s7843_s16 = scalar_lea.hbm %s9422_s17, 16 }
  0xf2   : > { %p7844_p5 = scmp.ne.s32.totalorder %s9422_s17, %s7843_s16  ;;  %p7850_p10 = scmp.lt.u32.totalorder %s7843_s16, %s9422_s17 }
  0xf4   : > { %p7846_p6 = pnand %p7844_p5, %p8498_p0 }
  0xf6   : > { %p7847_p9 = pneg %p7846_p6 }
  0xf8   : > { %p7852_p13 = pnand %p7850_p10, %p7847_p9 }
  0xfa   : > { %7855 = shalt.err (!%p7852_p13)
}
  0xfb   : > { %s7856_s5 = scalar_lea.vmem %s745_s8, 16  ;;  %s7863_s4 = scalar_lea.vmem %s745_s8, 32 }
  0xfc   : > { %p7857_p1 = scmp.ne.s32.totalorder %s745_s8, %s7856_s5  ;;  %p7864_p4 = scmp.lt.s32.totalorder %s745_s8, %s745_s8 }
  0xfd   : > { %p7865_p7 = scmp.lt.s32.totalorder %s7863_s4, %s7856_s5 }
  0xfe   : > { %p7859_p2 = pnand %p7857_p1, %p8498_p0 }
  0xff   : > { %p7866_p8 = por %p7865_p7, %p7864_p4 }
 0x100   : > { %p7860_p3 = pneg %p7859_p2 }
 0x102   : > { %p7867_p11 = pnand %p7866_p8, %p7860_p3 }
 0x104   : > { %7870 = shalt.err (!%p7867_p11)
}
 0x105   : > { %7532 = dma.hbm_to_vmem [thread:$0]  (!%p8486_p12), %s9422_s17, 16, %s745_s8, [#allocation27]  }
 0x106   : > { %s7871_s29 = scalar_lea.hbm %s9424_s19, 16 }
 0x107   : > { %p7872_p5 = scmp.ne.s32.totalorder %s9424_s19, %s7871_s29  ;;  %p7878_p10 = scmp.lt.u32.totalorder %s7871_s29, %s9424_s19 }
 0x109   : > { %p7874_p6 = pnand %p7872_p5, %p8498_p0 }
 0x10b   : > { %p7875_p9 = pneg %p7874_p6 }
 0x10d   : > { %p7880_p13 = pnand %p7878_p10, %p7875_p9 }
 0x10f   : > { %7883 = shalt.err (!%p7880_p13)
}
 0x110   : > { %s7884_s5 = scalar_lea.vmem %s769_s21, 16  ;;  %s7891_s8 = scalar_lea.vmem %s769_s21, 32 }
 0x111   : > { %p7885_p1 = scmp.ne.s32.totalorder %s769_s21, %s7884_s5  ;;  %p7892_p4 = scmp.lt.s32.totalorder %s769_s21, %s769_s21 }
 0x112   : > { %p7893_p7 = scmp.lt.s32.totalorder %s7891_s8, %s7884_s5 }
 0x113   : > { %p7887_p2 = pnand %p7885_p1, %p8498_p0 }
 0x114   : > { %p7894_p8 = por %p7893_p7, %p7892_p4 }
 0x115   : > { %p7888_p3 = pneg %p7887_p2 }
 0x117   : > { %p7895_p11 = pnand %p7894_p8, %p7888_p3 }
 0x119   : > { %7898 = shalt.err (!%p7895_p11)
}
 0x11a   : > { %7538 = dma.hbm_to_vmem [thread:$0]  (!%p8486_p12), %s9424_s19, 16, %s769_s21, [#allocation30]  }
 0x11b   : > { %s8300_s20 = smov [#allocation2]   ;;  %s8301_s1 = smov [#allocation7]  }
 0x11c   : > { %s555_s3 = sshll.u32 %s8300_s20, 4  ;;  %s582_s29 = sshll.u32 %s8301_s1, 4  ;;  %s556_s3 = int_to_ptr.vmem [resolvable:$true] %s555_s3  ;;  %s583_s29 = int_to_ptr.vmem [resolvable:$true] %s582_s29 }
 0x11d   : > { %s9501_s28 = sld [smem:[#allocation55_spill]] }
 0x123   : > { %s9502_s6 = smov %s9501_s28  ;;  %s7899_s30 = scalar_lea.hbm %s9501_s28, 768 }
 0x124   : > { %p7900_p5 = scmp.ne.s32.totalorder %s9502_s6, %s7899_s30  ;;  %p7906_p10 = scmp.lt.u32.totalorder %s7899_s30, %s9502_s6 }
 0x126   : > { %p7902_p6 = pnand %p7900_p5, %p8498_p0 }
 0x128   : > { %p7903_p9 = pneg %p7902_p6 }
 0x12a   : > { %p7908_p13 = pnand %p7906_p10, %p7903_p9 }
 0x12c   : > { %7911 = shalt.err (!%p7908_p13)
}
 0x12d   : > { %s7912_s21 = scalar_lea.vmem %s556_s3, 768  ;;  %p7920_p4 = scmp.lt.s32.totalorder %s556_s3, %s556_s3 }
 0x12e   : > { %p7913_p1 = scmp.ne.s32.totalorder %s556_s3, %s7912_s21  ;;  %p7921_p7 = scmp.lt.s32.totalorder %s7912_s21, %s7912_s21 }
 0x130   : > { %p7915_p2 = pnand %p7913_p1, %p8498_p0  ;;  %p7922_p8 = por %p7921_p7, %p7920_p4 }
 0x132   : > { %p7916_p3 = pneg %p7915_p2 }
 0x134   : > { %p7923_p11 = pnand %p7922_p8, %p7916_p3 }
 0x136   : > { %7926 = shalt.err (!%p7923_p11)
}
 0x137   : > { %7487 = dma.hbm_to_vmem [thread:$0]  (!%p8486_p12), %s9502_s6, 768, %s556_s3, [#allocation3], %s9500_s24, %s9500_s24, %s9499_s27  }
 0x138   : > { %s9503_s1 = sld [smem:[#allocation57_spill]] }
 0x13e   : > { %s7927_s16 = scalar_lea.hbm %s9503_s1, 64 }
 0x13f   : > { %p7928_p5 = scmp.ne.s32.totalorder %s9503_s1, %s7927_s16  ;;  %p7934_p10 = scmp.lt.u32.totalorder %s7927_s16, %s9503_s1 }
 0x141   : > { %p7930_p6 = pnand %p7928_p5, %p8498_p0 }
 0x143   : > { %p7931_p9 = pneg %p7930_p6 }
 0x145   : > { %p7936_p13 = pnand %p7934_p10, %p7931_p9 }
 0x147   : > { %7939 = shalt.err (!%p7936_p13)
}
 0x148   : > { %s7940_s4 = scalar_lea.vmem %s583_s29, 64  ;;  %p7948_p4 = scmp.lt.s32.totalorder %s583_s29, %s583_s29 }
 0x149   : > { %p7941_p1 = scmp.ne.s32.totalorder %s583_s29, %s7940_s4  ;;  %p7949_p7 = scmp.lt.s32.totalorder %s7940_s4, %s7940_s4 }
 0x14b   : > { %p7943_p2 = pnand %p7941_p1, %p8498_p0  ;;  %p7950_p8 = por %p7949_p7, %p7948_p4 }
 0x14d   : > { %p7944_p3 = pneg %p7943_p2 }
 0x14f   : > { %p7951_p11 = pnand %p7950_p8, %p7944_p3 }
 0x151   : > { %7954 = shalt.err (!%p7951_p11)
}
 0x152   : > { %7493 = dma.hbm_to_vmem [thread:$0]  (!%p8486_p12), %s9503_s1, 64, %s583_s29, [#allocation6]  }
 0x153   : > { %s8302_s10 = smov [#allocation10]   ;;  %s8303_s26 = smov [#allocation13]  }
 0x154   : > { %s605_s30 = sshll.u32 %s8302_s10, 4  ;;  %s629_s20 = sshll.u32 %s8303_s26, 4  ;;  %s606_s30 = int_to_ptr.vmem [resolvable:$true] %s605_s30  ;;  %s630_s20 = int_to_ptr.vmem [resolvable:$true] %s629_s20 }
 0x155   : > { %s9504_s28 = sld [smem:[#allocation59_spill]] }
 0x15b   : > { %s9505_s5 = smov %s9504_s28  ;;  %s7955_s8 = scalar_lea.hbm %s9504_s28, 49152 }
 0x15c   : > { %p7956_p5 = scmp.ne.s32.totalorder %s9505_s5, %s7955_s8  ;;  %p7962_p10 = scmp.lt.u32.totalorder %s7955_s8, %s9505_s5 }
 0x15e   : > { %p7958_p6 = pnand %p7956_p5, %p8498_p0 }
 0x160   : > { %p7959_p9 = pneg %p7958_p6 }
 0x162   : > { %p7964_p13 = pnand %p7962_p10, %p7959_p9 }
 0x164   : > { %7967 = shalt.err (!%p7964_p13)
}
 0x165   : > { %s7968_s29 = scalar_lea.vmem %s606_s30, 49152  ;;  %p7976_p4 = scmp.lt.s32.totalorder %s606_s30, %s606_s30 }
 0x166   : > { %p7969_p1 = scmp.ne.s32.totalorder %s606_s30, %s7968_s29  ;;  %p7977_p7 = scmp.lt.s32.totalorder %s7968_s29, %s7968_s29 }
 0x168   : > { %p7971_p2 = pnand %p7969_p1, %p8498_p0  ;;  %p7978_p8 = por %p7977_p7, %p7976_p4 }
 0x16a   : > { %p7972_p3 = pneg %p7971_p2 }
 0x16c   : > { %p7979_p11 = pnand %p7978_p8, %p7972_p3 }
 0x16e   : > { %7982 = shalt.err (!%p7979_p11)
}
 0x16f   : > { %s9506_s6 = smov 16   ;;  %s9507_s21 = smov 256  }
 0x170   : > { %7499 = dma.hbm_to_vmem [thread:$0]  (!%p8486_p12), %s9505_s5, 49152, %s606_s30, [#allocation9], %s9507_s21, %s9507_s21, %s9506_s6  }
 0x171   : > { %s7983_s25 = scalar_lea.hbm %s9412_s7, 384 }
 0x172   : > { %p7984_p5 = scmp.ne.s32.totalorder %s9412_s7, %s7983_s25  ;;  %p7990_p10 = scmp.lt.u32.totalorder %s7983_s25, %s9412_s7 }
 0x174   : > { %p7986_p6 = pnand %p7984_p5, %p8498_p0 }
 0x176   : > { %p7987_p9 = pneg %p7986_p6 }
 0x178   : > { %p7992_p13 = pnand %p7990_p10, %p7987_p9 }
 0x17a   : > { %7995 = shalt.err (!%p7992_p13)
}
 0x17b   : > { %s7996_s29 = scalar_lea.vmem %s630_s20, 384  ;;  %p8004_p4 = scmp.lt.s32.totalorder %s630_s20, %s630_s20 }
 0x17c   : > { %p7997_p1 = scmp.ne.s32.totalorder %s630_s20, %s7996_s29  ;;  %p8005_p7 = scmp.lt.s32.totalorder %s7996_s29, %s7996_s29 }
 0x17e   : > { %p7999_p2 = pnand %p7997_p1, %p8498_p0  ;;  %p8006_p8 = por %p8005_p7, %p8004_p4 }
 0x180   : > { %p8000_p3 = pneg %p7999_p2 }
 0x182   : > { %p8007_p11 = pnand %p8006_p8, %p8000_p3 }
 0x184   : > { %8010 = shalt.err (!%p8007_p11)
}
 0x185   : > { %7505 = dma.hbm_to_vmem [thread:$0]  (!%p8486_p12), %s9412_s7, 384, %s630_s20, [#allocation12], %s9500_s24, %s9500_s24, %s9499_s27  }
 0x186   : > { %s8304_s21 = smov [#allocation16]   ;;  %s8305_s10 = smov [#allocation19]  }
 0x187   : > { %s656_s12 = sshll.u32 %s8304_s21, 4  ;;  %s679_s26 = sshll.u32 %s8305_s10, 4  ;;  %s657_s12 = int_to_ptr.vmem [resolvable:$true] %s656_s12  ;;  %s680_s26 = int_to_ptr.vmem [resolvable:$true] %s679_s26 }
 0x188   : > { %s8011_s28 = scalar_lea.hbm %s9414_s9, 32 }
 0x189   : > { %p8012_p5 = scmp.ne.s32.totalorder %s9414_s9, %s8011_s28  ;;  %p8018_p10 = scmp.lt.u32.totalorder %s8011_s28, %s9414_s9 }
 0x18b   : > { %p8014_p6 = pnand %p8012_p5, %p8498_p0 }
 0x18d   : > { %p8015_p9 = pneg %p8014_p6 }
 0x18f   : > { %p8020_p13 = pnand %p8018_p10, %p8015_p9 }
 0x191   : > { %8023 = shalt.err (!%p8020_p13)
}
 0x192   : > { %s8024_s20 = scalar_lea.vmem %s657_s12, 32  ;;  %p8032_p4 = scmp.lt.s32.totalorder %s657_s12, %s657_s12 }
 0x193   : > { %p8025_p1 = scmp.ne.s32.totalorder %s657_s12, %s8024_s20  ;;  %p8033_p7 = scmp.lt.s32.totalorder %s8024_s20, %s8024_s20 }
 0x195   : > { %p8027_p2 = pnand %p8025_p1, %p8498_p0  ;;  %p8034_p8 = por %p8033_p7, %p8032_p4 }
 0x197   : > { %p8028_p3 = pneg %p8027_p2 }
 0x199   : > { %p8035_p11 = pnand %p8034_p8, %p8028_p3 }
 0x19b   : > { %8038 = shalt.err (!%p8035_p11)
}
 0x19c   : > { %7511 = dma.hbm_to_vmem [thread:$0]  (!%p8486_p12), %s9414_s9, 32, %s657_s12, [#allocation15]  }
 0x19d   : > { %s8039_s16 = scalar_lea.hbm %s9416_s11, 12288 }
 0x19e   : > { %p8040_p5 = scmp.ne.s32.totalorder %s9416_s11, %s8039_s16  ;;  %p8046_p10 = scmp.lt.u32.totalorder %s8039_s16, %s9416_s11 }
 0x1a0   : > { %p8042_p6 = pnand %p8040_p5, %p8498_p0 }
 0x1a2   : > { %p8043_p9 = pneg %p8042_p6 }
 0x1a4   : > { %p8048_p13 = pnand %p8046_p10, %p8043_p9 }
 0x1a6   : > { %8051 = shalt.err (!%p8048_p13)
}
 0x1a7   : > { %s8052_s3 = scalar_lea.vmem %s680_s26, 12288  ;;  %p8060_p4 = scmp.lt.s32.totalorder %s680_s26, %s680_s26 }
 0x1a8   : > { %p8053_p1 = scmp.ne.s32.totalorder %s680_s26, %s8052_s3  ;;  %p8061_p7 = scmp.lt.s32.totalorder %s8052_s3, %s8052_s3 }
 0x1aa   : > { %p8055_p2 = pnand %p8053_p1, %p8498_p0  ;;  %p8062_p8 = por %p8061_p7, %p8060_p4 }
 0x1ac   : > { %p8056_p3 = pneg %p8055_p2 }
 0x1ae   : > { %p8063_p11 = pnand %p8062_p8, %p8056_p3 }
 0x1b0   : > { %8066 = shalt.err (!%p8063_p11)
}
 0x1b1   : > { %7517 = dma.hbm_to_vmem [thread:$0]  (!%p8486_p12), %s9416_s11, 12288, %s680_s26, [#allocation18], %s9500_s24, %s9500_s24, %s9499_s27  }
 0x1b2   : > { %s8306_s20 = smov [#allocation22]   ;;  %s8307_s6 = smov [#allocation25]  }
 0x1b3   : > { %s703_s30 = sshll.u32 %s8306_s20, 4  ;;  %s730_s21 = sshll.u32 %s8307_s6, 4  ;;  %s704_s30 = int_to_ptr.vmem [resolvable:$true] %s703_s30  ;;  %s731_s21 = int_to_ptr.vmem [resolvable:$true] %s730_s21 }
 0x1b4   : > { %s8067_s25 = scalar_lea.hbm %s9418_s13, 192 }
 0x1b5   : > { %p8068_p5 = scmp.ne.s32.totalorder %s9418_s13, %s8067_s25  ;;  %p8074_p10 = scmp.lt.u32.totalorder %s8067_s25, %s9418_s13 }
 0x1b7   : > { %p8070_p6 = pnand %p8068_p5, %p8498_p0 }
 0x1b9   : > { %p8071_p9 = pneg %p8070_p6 }
 0x1bb   : > { %p8076_p13 = pnand %p8074_p10, %p8071_p9 }
 0x1bd   : > { %8079 = shalt.err (!%p8076_p13)
}
 0x1be   : > { %s8080_s26 = scalar_lea.vmem %s704_s30, 192  ;;  %p8088_p4 = scmp.lt.s32.totalorder %s704_s30, %s704_s30 }
 0x1bf   : > { %p8081_p1 = scmp.ne.s32.totalorder %s704_s30, %s8080_s26  ;;  %p8089_p7 = scmp.lt.s32.totalorder %s8080_s26, %s8080_s26 }
 0x1c1   : > { %p8083_p2 = pnand %p8081_p1, %p8498_p0  ;;  %p8090_p8 = por %p8089_p7, %p8088_p4 }
 0x1c3   : > { %p8084_p3 = pneg %p8083_p2 }
 0x1c5   : > { %p8091_p11 = pnand %p8090_p8, %p8084_p3 }
 0x1c7   : > { %8094 = shalt.err (!%p8091_p11)
}
 0x1c8   : > { %s9508_s12 = smov 4   ;;  %s9509_s29 = smov 64  }
 0x1c9   : > { %7523 = dma.hbm_to_vmem [thread:$0]  (!%p8486_p12), %s9418_s13, 192, %s704_s30, [#allocation21], %s9509_s29, %s9509_s29, %s9508_s12  }
 0x1ca   : > { %s8095_s25 = scalar_lea.hbm %s9420_s15, 16 }
 0x1cb   : > { %p8096_p5 = scmp.ne.s32.totalorder %s9420_s15, %s8095_s25  ;;  %p8102_p10 = scmp.lt.u32.totalorder %s8095_s25, %s9420_s15 }
 0x1cd   : > { %p8098_p6 = pnand %p8096_p5, %p8498_p0 }
 0x1cf   : > { %p8099_p9 = pneg %p8098_p6 }
 0x1d1   : > { %p8104_p13 = pnand %p8102_p10, %p8099_p9 }
 0x1d3   : > { %8107 = shalt.err (!%p8104_p13)
}
 0x1d4   : > { %s8108_s26 = scalar_lea.vmem %s731_s21, 16  ;;  %s8115_s30 = scalar_lea.vmem %s731_s21, 32 }
 0x1d5   : > { %p8109_p1 = scmp.ne.s32.totalorder %s731_s21, %s8108_s26  ;;  %p8116_p4 = scmp.lt.s32.totalorder %s731_s21, %s731_s21 }
 0x1d6   : > { %p8117_p7 = scmp.lt.s32.totalorder %s8115_s30, %s8108_s26 }
 0x1d7   : > { %p8111_p2 = pnand %p8109_p1, %p8498_p0 }
 0x1d8   : > { %p8118_p8 = por %p8117_p7, %p8116_p4 }
 0x1d9   : > { %p8112_p3 = pneg %p8111_p2 }
 0x1db   : > { %p8119_p11 = pnand %p8118_p8, %p8112_p3 }
 0x1dd   : > { %8122 = shalt.err (!%p8119_p11)
}
 0x1de   : > { %7529 = dma.hbm_to_vmem [thread:$0]  (!%p8486_p12), %s9420_s15, 16, %s731_s21, [#allocation24]  }
 0x1df   : > { %s8308_s20 = smov [#allocation28]   ;;  %s8309_s10 = smov [#allocation31]  }
 0x1e0   : > { %s754_s6 = sshll.u32 %s8308_s20, 4  ;;  %s782_s16 = sshll.u32 %s8309_s10, 4  ;;  %s755_s6 = int_to_ptr.vmem [resolvable:$true] %s754_s6  ;;  %s783_s16 = int_to_ptr.vmem [resolvable:$true] %s782_s16 }
 0x1e1   : > { %s8123_s8 = scalar_lea.hbm %s9423_s18, 512 }
 0x1e2   : > { %p8124_p5 = scmp.ne.s32.totalorder %s9423_s18, %s8123_s8  ;;  %p8130_p10 = scmp.lt.u32.totalorder %s8123_s8, %s9423_s18 }
 0x1e4   : > { %p8126_p6 = pnand %p8124_p5, %p8498_p0 }
 0x1e6   : > { %p8127_p9 = pneg %p8126_p6 }
 0x1e8   : > { %p8132_p13 = pnand %p8130_p10, %p8127_p9 }
 0x1ea   : > { %8135 = shalt.err (!%p8132_p13)
}
 0x1eb   : > { %s8136_s21 = scalar_lea.vmem %s755_s6, 512  ;;  %p8144_p4 = scmp.lt.s32.totalorder %s755_s6, %s755_s6 }
 0x1ec   : > { %p8137_p1 = scmp.ne.s32.totalorder %s755_s6, %s8136_s21  ;;  %p8145_p7 = scmp.lt.s32.totalorder %s8136_s21, %s8136_s21 }
 0x1ee   : > { %p8139_p2 = pnand %p8137_p1, %p8498_p0  ;;  %p8146_p8 = por %p8145_p7, %p8144_p4 }
 0x1f0   : > { %p8140_p3 = pneg %p8139_p2 }
 0x1f2   : > { %p8147_p11 = pnand %p8146_p8, %p8140_p3 }
 0x1f4   : > { %8150 = shalt.err (!%p8147_p11)
}
 0x1f5   : > { %7535 = dma.hbm_to_vmem [thread:$0]  (!%p8486_p12), %s9423_s18, 512, %s755_s6, [#allocation27], %s9500_s24, %s9500_s24, %s9499_s27  }
 0x1f6   : > { %s9510_s25 = sld [smem:[#allocation66_spill]] }
 0x1fc   : > { %s8151_s28 = scalar_lea.hbm %s9510_s25, 16 }
 0x1fd   : > { %p8152_p5 = scmp.ne.s32.totalorder %s9510_s25, %s8151_s28  ;;  %p8158_p10 = scmp.lt.u32.totalorder %s8151_s28, %s9510_s25 }
 0x1ff   : > { %p8154_p6 = pnand %p8152_p5, %p8498_p0 }
 0x201   : > { %p8155_p9 = pneg %p8154_p6 }
 0x203   : > { %p8160_p13 = pnand %p8158_p10, %p8155_p9 }
 0x205   : > { %8163 = shalt.err (!%p8160_p13)
}
 0x206   : > { %s8164_s30 = scalar_lea.vmem %s783_s16, 16  ;;  %s8171_s27 = scalar_lea.vmem %s783_s16, 32 }
 0x207   : > { %p8165_p1 = scmp.ne.s32.totalorder %s783_s16, %s8164_s30  ;;  %p8172_p4 = scmp.lt.s32.totalorder %s783_s16, %s783_s16 }
 0x208   : > { %p8173_p7 = scmp.lt.s32.totalorder %s8171_s27, %s8164_s30 }
 0x209   : > { %p8167_p2 = pnand %p8165_p1, %p8498_p0 }
 0x20a   : > { %p8174_p8 = por %p8173_p7, %p8172_p4 }
 0x20b   : > { %p8168_p3 = pneg %p8167_p2 }
 0x20d   : > { %p8175_p11 = pnand %p8174_p8, %p8168_p3 }
 0x20f   : > { %8178 = shalt.err (!%p8175_p11)
}
 0x210   : > { %7541 = dma.hbm_to_vmem [thread:$0]  (!%p8486_p12), %s9510_s25, 16, %s783_s16, [#allocation30]  }
 0x211   : > { %s9511_s21 = sld [smem:[#allocation53_spill]] }
 0x217   : > { %p9512_p5 = scmp.ne.s32.totalorder %s9511_s21, 0 }
 0x218   : > { %s9513_s12 = sld [smem:[#allocation48_spill]] (!%p9512_p5) }
 0x219   : > { %803 = sbr.rel (%p9512_p5) target bundleno = 4618 (0x120a), region = 108 }
 0x21e   : > { %p9514_p6 = scmp.eq.s32.totalorder (!%p9512_p5), %s9513_s12, 0 }
 0x220   : > { %8224 = dma.done.wait (%p9514_p6), [#allocation3], 768   ;;  %p9515_p0 = pmov %p9514_p6 }
 0x222   : > { %8226 = vsyncadd (%p9515_p0), [#allocation3], 4294966528  ;;  %p9516_p9 = pmov %p9515_p0 }
 0x223   : > { %p9517_p10 = pmov %p9515_p0 }
 0x224   : > { %8228 = dma.done.wait (%p9516_p9), [#allocation6], 18496  }
 0x225   : > { %8230 = vsyncadd (%p9517_p10), [#allocation6], 4294948800  ;;  %p9518_p13 = pmov %p9515_p0 }
 0x226   : > { %p9519_p12 = pmov %p9515_p0 }
 0x227   : > { %8232 = dma.done.wait (%p9518_p13), [#allocation9], 49536  }
 0x228   : > { %8234 = vsyncadd (%p9519_p12), [#allocation9], 4294917760  ;;  %p9520_p1 = pmov %p9515_p0 }
 0x229   : > { %p9521_p2 = pmov %p9515_p0 }
 0x22a   : > { %8236 = dma.done.wait (%p9520_p1), [#allocation12], 416  }
 0x22b   : > { %8238 = vsyncadd (%p9521_p2), [#allocation12], 4294966880  ;;  %p9522_p3 = pmov %p9515_p0 }
 0x22c   : > { %p9523_p4 = pmov %p9515_p0 }
 0x22d   : > { %8240 = dma.done.wait (%p9522_p3), [#allocation15], 24608  }
 0x22e   : > { %8242 = vsyncadd (%p9523_p4), [#allocation15], 4294942688  ;;  %p9524_p7 = pmov %p9515_p0 }
 0x22f   : > { %p9525_p8 = pmov %p9515_p0 }
 0x230   : > { %8244 = dma.done.wait (%p9524_p7), [#allocation18], 12480  }
 0x231   : > { %8246 = vsyncadd (%p9525_p8), [#allocation18], 4294954816  ;;  %p9526_p11 = pmov %p9515_p0 }
 0x232   : > { %p9527_p5 = pmov %p9515_p0 }
 0x233   : > { %8248 = dma.done.wait (%p9526_p11), [#allocation21], 208  }
 0x234   : > { %8250 = vsyncadd (%p9527_p5), [#allocation21], 4294967088  ;;  %p9528_p6 = pmov %p9515_p0 }
 0x236   : > { %8252 = dma.done.wait (%p9528_p6), [#allocation24], 6160  }
 0x237   : > { %8254 = vsyncadd (%p9515_p0), [#allocation24], 4294961136  ;;  %p9529_p9 = pmov %p9515_p0 }
 0x238   : > { %p9530_p10 = pmov %p9515_p0 }
 0x239   : > { %8256 = dma.done.wait (%p9529_p9), [#allocation27], 528  }
 0x23a   : > { %8258 = vsyncadd (%p9530_p10), [#allocation27], 4294966768  ;;  %p9531_p13 = pmov %p9515_p0 }
 0x23b   : > { %p9532_p12 = pmov %p9515_p0 }
 0x23c   : > { %8260 = dma.done.wait (%p9531_p13), [#allocation30], 32  }
 0x23d   : > { %8262 = vsyncadd (%p9532_p12), [#allocation30], 4294967264  ;;  %p936_p1 = scmp.lt.s32.totalorder %s9513_s12, 1  ;;  %s9533_s20 = sld [smem:[#allocation54_spill]]  ;;  %vm947_vm0 = vcmask 261120   ;;  %v1078_v5 = vld [vmem:[#allocation2 + $0x10] sm:$0xff] }
 0x23e   : > { %6036 = vmatprep.mubr.msk.f32.mxu1 %vm947_vm0, %v1078_v5  ;;  %v945_v7 = vld [vmem:[#allocation2] sm:$0xff]  ;;  %v1163_v8 = vld [vmem:[#allocation5 + $0x188] sm:$0xff]  ;;  %v1165_v10 = vld [vmem:[#allocation5 + $0x198] sm:$0xff]  ;;  %vm1210_vm1 = vcmask 785408   ;;  %vm1871_vm2 = vcmask 130048   ;;  %vm3146_vm5 = vcmask 64512  }
 0x23f   : > { %s937_s0 = scalar_select %p936_p1, %s9513_s12, 1  ;;  %v1167_v9 = vld [vmem:[#allocation5 + $0x1a8] sm:$0xff]  ;;  %v1169_v11 = vld [vmem:[#allocation5 + $0x1b8] sm:$0xff]  ;;  %v1162_v12 = vld [vmem:[#allocation5 + $0x180] sm:$0xff]  ;;  %6025 = vmatprep.mubr.msk.f32.mxu0 %vm947_vm0, %v945_v7  ;;  %vm8311_vm8 = vmmov 0   ;;  %vm4354_vm10 = vcmask 1043456  }
 0x240   : > { %v1166_v13 = vld [vmem:[#allocation5 + $0x1a0] sm:$0xff]  ;;  %v6348_v14 = vpack.c.bf16 %v1167_v9, %v1163_v8  ;;  %v6372_v15 = vpack.c.bf16 %v1169_v11, %v1165_v10  ;;  %v1164_v16 = vld [vmem:[#allocation5 + $0x190] sm:$0xff]  ;;  %v1171_v18 = vld [vmem:[#allocation5 + $0x1c8] sm:$0xff]  ;;  %vm4350_vm11 = vcmask 31744   ;;  %s9534_s4 = sld [smem:[#allocation64_spill]]  ;;  %s9537_s26 = sld [smem:[#allocation51_spill]] }
 0x241   : > { %s5758_s2 = sshll.u32 %s937_s0, 5  ;;  %v1168_v17 = vld [vmem:[#allocation5 + $0x1b0] sm:$0xff]  ;;  %v1175_v19 = vld [vmem:[#allocation5 + $0x1e8] sm:$0xff]  ;;  %v1173_v20 = vld [vmem:[#allocation5 + $0x1d8] sm:$0xff]  ;;  %v6350_v24 = vpack.c.bf16 %v1166_v13, %v1162_v12  ;;  %s5755_s27 = sshll.u32 %s9513_s12, 4  ;;  %vm5370_vm15 = vcmask 122880  }
 0x242   : > { %v1177_v21 = vld [vmem:[#allocation5 + $0x1f8] sm:$0xff]  ;;  %v1079_v22 = vld [vmem:[#allocation2 + $0x18] sm:$0xff]  ;;  %v6374_v25 = vpack.c.bf16 %v1168_v17, %v1164_v16  ;;  %v1170_v26 = vld [vmem:[#allocation5 + $0x1c0] sm:$0xff]  ;;  %v6352_v28 = vpack.c.bf16 %v1175_v19, %v1171_v18  ;;  %s9538_s16 = sld [smem:[#allocation67_spill]]  ;;  %s8313_s12 = smov [#allocation32]  }
 0x243   : > { %s940_s10 = scalar_lea.vmem %s9533_s20, %s5758_s2  ;;  %v946_v23 = vld [vmem:[#allocation2 + $0x8] sm:$0xff]  ;;  %v1174_v27 = vld [vmem:[#allocation5 + $0x1e0] sm:$0xff]  ;;  %v6376_v29 = vpack.c.bf16 %v1177_v21, %v1173_v20  ;;  %v1172_v30 = vld [vmem:[#allocation5 + $0x1d0] sm:$0xff]  ;;  %s9535_s2 = sld [smem:[#allocation65_spill]] }
 0x244   : > { %v941_v0 = vld [vmem:[%s940_s10] sm:$0xff]  ;;  %v942_v1 = vld [vmem:[%s940_s10 + $0x8] sm:$0xff]  ;;  %v943_v2 = vld [vmem:[%s940_s10 + $0x10] sm:$0xff]  ;;  %v6354_v36 = vpack.c.bf16 %v1174_v27, %v1170_v26  ;;  %v8310_v26 = vmov 0.0   ;;  %s9536_s20 = sld [smem:[#allocation45_spill]]  ;;  %s8183_s28 = sshll.u32 %s8313_s12, 4  ;;  %s8184_s28 = int_to_ptr.vmem [resolvable:$false] %s8183_s28 }
 0x245   : > { %v8915_v3 = vpack.c.bf16 %v942_v1, %v941_v0  ;;  %v944_v4 = vld [vmem:[%s940_s10 + $0x18] sm:$0xff]  ;;  %v1176_v31 = vld [vmem:[#allocation5 + $0x1f0] sm:$0xff]  ;;  %v1181_v34 = vld [vmem:[#allocation5 + $0x218] sm:$0xff]  ;;  %s8185_s8 = scalar_lea.vmem %s8184_s28, 32 }
 0x246   : > { %v8917_v6 = vpack.c.bf16 %v944_v4, %v943_v2  ;;  %v1179_v32 = vld [vmem:[#allocation5 + $0x208] sm:$0xff]  ;;  %v1185_v35 = vld [vmem:[#allocation5 + $0x238] sm:$0xff]  ;;  %v6378_v37 = vpack.c.bf16 %v1176_v31, %v1172_v30  ;;  %v1178_v38 = vld [vmem:[#allocation5 + $0x200] sm:$0xff]  ;;  %p9539_p3 = scmp.ne.s32.totalorder %s9537_s26, 0 }
 0x247   : > { %6341 = vmatprep.subr.bf16.mxu1 %v8915_v3  ;;  %6333 = vmatprep.subr.bf16.mxu0 %v8915_v3  ;;  %v1183_v33 = vld [vmem:[#allocation5 + $0x228] sm:$0xff]  ;;  %v1182_v39 = vld [vmem:[#allocation5 + $0x220] sm:$0xff]  ;;  %v6380_v41 = vpack.c.bf16 %v1185_v35, %v1181_v34  ;;  %v1180_v42 = vld [vmem:[#allocation5 + $0x210] sm:$0xff] }
 0x248   : > { %6343 = vmatpush3.bf16.msra.mxu1 %v8915_v3  ;;  %6335 = vmatpush3.bf16.msra.mxu0 %v8915_v3  ;;  %v6356_v40 = vpack.c.bf16 %v1183_v33, %v1179_v32  ;;  %v1184_v43 = vld [vmem:[#allocation5 + $0x230] sm:$0xff]  ;;  %v1187_v44 = vld [vmem:[#allocation5 + $0x248] sm:$0xff]  ;;  %v1189_v46 = vld [vmem:[#allocation5 + $0x258] sm:$0xff]  ;;  %v6358_v48 = vpack.c.bf16 %v1182_v39, %v1178_v38  ;;  %s9363_s29 = scalar_lea.hbm %s9538_s16, %s5755_s27 }
 0x249   : > { %6345 = vmatprep.subr.bf16.mxu1 %v8917_v6  ;;  %6337 = vmatprep.subr.bf16.mxu0 %v8917_v6  ;;  %v1191_v45 = vld [vmem:[#allocation5 + $0x268] sm:$0xff]  ;;  %v1193_v47 = vld [vmem:[#allocation5 + $0x278] sm:$0xff]  ;;  %v6382_v49 = vpack.c.bf16 %v1184_v43, %v1180_v42  ;;  %v1186_v50 = vld [vmem:[#allocation5 + $0x240] sm:$0xff] }
 0x24a   : > { %v1190_v51 = vld [vmem:[#allocation5 + $0x260] sm:$0xff]  ;;  %v6360_v52 = vpack.c.bf16 %v1191_v45, %v1187_v44  ;;  %v6384_v53 = vpack.c.bf16 %v1193_v47, %v1189_v46  ;;  %v1188_v54 = vld [vmem:[#allocation5 + $0x250] sm:$0xff]  ;;  %v1195_v56 = vld [vmem:[#allocation5 + $0x288] sm:$0xff]  ;;  %s934_s30 = sand.u32 1, %s9536_s20  }
 0x24b   : > { %v1192_v55 = vld [vmem:[#allocation5 + $0x270] sm:$0xff]  ;;  %v1199_v57 = vld [vmem:[#allocation5 + $0x2a8] sm:$0xff]  ;;  %v1197_v58 = vld [vmem:[#allocation5 + $0x298] sm:$0xff]  ;;  %v6362_v60 = vpack.c.bf16 %v1190_v51, %v1186_v50  ;;  %s935_s24 = scalar_lea.vmem [#allocation32], %s934_s30  ;;  %s5373_s20 = scalar_lea.sflag [#allocation4], %s934_s30 }
 0x24c   : > { %6347 = vmatpush3.bf16.msra.mxu1 %v8917_v6  ;;  %6339 = vmatpush3.bf16.msra.mxu0 %v8917_v6  ;;  %v1201_v59 = vld [vmem:[#allocation5 + $0x2b8] sm:$0xff]  ;;  %v6386_v61 = vpack.c.bf16 %v1192_v55, %v1188_v54  ;;  %v1194_v62 = vld [vmem:[#allocation5 + $0x280] sm:$0xff]  ;;  %v6364_v0 = vpack.c.bf16 %v1199_v57, %v1195_v56  ;;  %v1196_v2 = vld [vmem:[#allocation5 + $0x290] sm:$0xff]  ;;  %s5385_s6 = sshll.u32 %s935_s24, 4  ;;  %s9365_s6 = int_to_ptr.vmem [resolvable:$true] %s5385_s6 }
 0x24d   : > { %6349 = vmatprep.subr.bf16.mxu0 %v6348_v14  ;;  %6373 = vmatprep.subr.bf16.mxu1 %v6372_v15  ;;  %v1198_v63 = vld [vmem:[#allocation5 + $0x2a0] sm:$0xff]  ;;  %v6388_v1 = vpack.c.bf16 %v1201_v59, %v1197_v58  ;;  %v1200_v4 = vld [vmem:[#allocation5 + $0x2b0] sm:$0xff]  ;;  %v1203_v5 = vld [vmem:[#allocation5 + $0x2c8] sm:$0xff]  ;;  %s8179_s10 = scalar_lea.vmem %s9365_s6, 16  ;;  %p8186_p8 = scmp.lt.s32.totalorder %s9365_s6, %s8184_s28 }
 0x24e   : > { %v1207_v7 = vld [vmem:[#allocation5 + $0x2e8] sm:$0xff]  ;;  %v1205_v8 = vld [vmem:[#allocation5 + $0x2d8] sm:$0xff]  ;;  %v6366_v10 = vpack.c.bf16 %v1198_v63, %v1194_v62  ;;  %v6390_v11 = vpack.c.bf16 %v1200_v4, %v1196_v2  ;;  %v1202_v12 = vld [vmem:[#allocation5 + $0x2c0] sm:$0xff]  ;;  %p8180_p2 = scmp.ne.s32.totalorder %s9365_s6, %s8179_s10  ;;  %p8187_p11 = scmp.lt.s32.totalorder %s8185_s8, %s8179_s10 }
 0x24f   : > { %6037 = vmatmul.mubr.msk.f32.vlgmr.msra.gmra.mrb[0].mxu1 %vm947_vm0, %v1079_v22  ;;  %6026 = vmatmul.mubr.msk.f32.vlgmr.msra.gmra.mrb[0].mxu0 %vm947_vm0, %v946_v23  ;;  %v1209_v9 = vld [vmem:[#allocation5 + $0x2f8] sm:$0xff]  ;;  %v6368_v13 = vpack.c.bf16 %v1207_v7, %v1203_v5  ;;  %v1206_v15 = vld [vmem:[#allocation5 + $0x2e0] sm:$0xff]  ;;  %v1204_v16 = vld [vmem:[#allocation5 + $0x2d0] sm:$0xff] }
 0x250   : > { %6351 = vmatpush1.bf16.msra.mxu0 %v6350_v24  ;;  %6375 = vmatpush1.bf16.msra.mxu1 %v6374_v25  ;;  %v6392_v14 = vpack.c.bf16 %v1209_v9, %v1205_v8  ;;  %v1208_v17 = vld [vmem:[#allocation5 + $0x2f0] sm:$0xff]  ;;  %v6370_v18 = vpack.c.bf16 %v1206_v15, %v1202_v12  ;;  %v1030_v20 = vld [vmem:[#allocation5 + $0x8] sm:$0xff]  ;;  %v1032_v22 = vld [vmem:[#allocation5 + $0x18] sm:$0xff]  ;;  %p8181_p4 = pnand %p8180_p2, %p9539_p3  ;;  %p8188_p5 = por %p8187_p11, %p8186_p8 }
 0x251   : > { %6353 = vmatprep.subr.bf16.mxu0 %v6352_v28  ;;  %6377 = vmatprep.subr.bf16.mxu1 %v6376_v29  ;;  %v6394_v19 = vpack.c.bf16 %v1208_v17, %v1204_v16  ;;  %v1034_v21 = vld [vmem:[#allocation5 + $0x28] sm:$0xff]  ;;  %v1036_v24 = vld [vmem:[#allocation5 + $0x38] sm:$0xff]  ;;  %v1029_v27 = vld [vmem:[#allocation5] sm:$0xff] }
 0x252   : > { %v6396_v23 = vpack.c.bf16 %v1034_v21, %v1030_v20  ;;  %v6420_v25 = vpack.c.bf16 %v1036_v24, %v1032_v22  ;;  %1281 = vmatprep.mubr.f32.mxu0 %v8310_v26  ;;  %1358 = vmatprep.mubr.f32.mxu1 %v8310_v26  ;;  %v1033_v28 = vld [vmem:[#allocation5 + $0x20] sm:$0xff]  ;;  %v1031_v29 = vld [vmem:[#allocation5 + $0x10] sm:$0xff]  ;;  %v1038_v31 = vld [vmem:[#allocation5 + $0x48] sm:$0xff]  ;;  %p8182_p7 = pneg %p8181_p4 }
 0x253   : > { %v1035_v30 = vld [vmem:[#allocation5 + $0x30] sm:$0xff]  ;;  %v1042_v32 = vld [vmem:[#allocation5 + $0x68] sm:$0xff]  ;;  %v1040_v33 = vld [vmem:[#allocation5 + $0x58] sm:$0xff]  ;;  %v6398_v35 = vpack.c.bf16 %v1033_v28, %v1029_v27 }
 0x254   : > { %6355 = vmatpush1.bf16.msra.mxu0 %v6354_v36  ;;  %6379 = vmatpush1.bf16.msra.mxu1 %v6378_v37  ;;  %v1044_v34 = vld [vmem:[#allocation5 + $0x78] sm:$0xff]  ;;  %v6422_v36 = vpack.c.bf16 %v1035_v30, %v1031_v29  ;;  %v1037_v37 = vld [vmem:[#allocation5 + $0x40] sm:$0xff]  ;;  %v1046_v42 = vld [vmem:[#allocation5 + $0x88] sm:$0xff]  ;;  %v6400_v45 = vpack.c.bf16 %v1042_v32, %v1038_v31  ;;  %p8189_p6 = pnand %p8188_p5, %p8182_p7 }
 0x255   : > { %6357 = vmatprep.subr.bf16.mxu0 %v6356_v40  ;;  %6381 = vmatprep.subr.bf16.mxu1 %v6380_v41  ;;  %v1041_v38 = vld [vmem:[#allocation5 + $0x60] sm:$0xff]  ;;  %v1039_v40 = vld [vmem:[#allocation5 + $0x50] sm:$0xff]  ;;  %v6424_v46 = vpack.c.bf16 %v1044_v34, %v1040_v33  ;;  %v1050_v47 = vld [vmem:[#allocation5 + $0xa8] sm:$0xff] }
 0x256   : > { %v1043_v41 = vld [vmem:[#allocation5 + $0x70] sm:$0xff]  ;;  %v6402_v51 = vpack.c.bf16 %v1041_v38, %v1037_v37  ;;  %v1049_v54 = vld [vmem:[#allocation5 + $0xa0] sm:$0xff]  ;;  %v6404_v55 = vpack.c.bf16 %v1050_v47, %v1046_v42  ;;  %v1054_v59 = vld [vmem:[#allocation5 + $0xc8] sm:$0xff] }
 0x257   : > { %v1047_v57 = vld [vmem:[#allocation5 + $0x90] sm:$0xff]  ;;  %v1060_v62 = vld [vmem:[#allocation5 + $0xf8] sm:$0xff]  ;;  %v1057_v2 = vld [vmem:[#allocation5 + $0xe0] sm:$0xff] }
 0x258   : > { %6359 = vmatpush1.bf16.msra.mxu0 %v6358_v48  ;;  %6383 = vmatpush1.bf16.msra.mxu1 %v6382_v49  ;;  %v1048_v48 = vld [vmem:[#allocation5 + $0x98] sm:$0xff]  ;;  %v1051_v58 = vld [vmem:[#allocation5 + $0xb0] sm:$0xff]  ;;  %v1062_v9 = vld [vmem:[#allocation5 + $0x108] sm:$0xff] }
 0x259   : > { %6361 = vmatprep.subr.bf16.mxu0 %v6360_v52  ;;  %6385 = vmatprep.subr.bf16.mxu1 %v6384_v53  ;;  %v1052_v49 = vld [vmem:[#allocation5 + $0xb8] sm:$0xff]  ;;  %v6426_v52 = vpack.c.bf16 %v1043_v41, %v1039_v40  ;;  %v1045_v53 = vld [vmem:[#allocation5 + $0x80] sm:$0xff]  ;;  %v1055_v7 = vld [vmem:[#allocation5 + $0xd0] sm:$0xff] }
 0x25a   : > { %v6428_v56 = vpack.c.bf16 %v1052_v49, %v1048_v48  ;;  %v6406_v63 = vpack.c.bf16 %v1049_v54, %v1045_v53  ;;  %v1059_v8 = vld [vmem:[#allocation5 + $0xf0] sm:$0xff]  ;;  %v1068_v12 = vld [vmem:[#allocation5 + $0x138] sm:$0xff]  ;;  %v1061_v15 = vld [vmem:[#allocation5 + $0x100] sm:$0xff] }
 0x25b   : > { %v1065_v16 = vld [vmem:[#allocation5 + $0x120] sm:$0xff]  ;;  %v1067_v20 = vld [vmem:[#allocation5 + $0x130] sm:$0xff]  ;;  %v1070_v21 = vld [vmem:[#allocation5 + $0x148] sm:$0xff] }
 0x25c   : > { %6363 = vmatpush1.bf16.msra.mxu0 %v6362_v60  ;;  %6387 = vmatpush1.bf16.msra.mxu1 %v6386_v61  ;;  %v1058_v60 = vld [vmem:[#allocation5 + $0xe8] sm:$0xff]  ;;  %v1056_v61 = vld [vmem:[#allocation5 + $0xd8] sm:$0xff]  ;;  %v1069_v28 = vld [vmem:[#allocation5 + $0x140] sm:$0xff] }
 0x25d   : > { %6365 = vmatprep.subr.bf16.mxu0 %v6364_v0  ;;  %6389 = vmatprep.subr.bf16.mxu1 %v6388_v1  ;;  %v6430_v0 = vpack.c.bf16 %v1051_v58, %v1047_v57  ;;  %v1053_v1 = vld [vmem:[#allocation5 + $0xc0] sm:$0xff]  ;;  %v6408_v4 = vpack.c.bf16 %v1058_v60, %v1054_v59  ;;  %v6432_v5 = vpack.c.bf16 %v1060_v62, %v1056_v61  ;;  %v1074_v22 = vld [vmem:[#allocation5 + $0x168] sm:$0xff]  ;;  %v1076_v24 = vld [vmem:[#allocation5 + $0x178] sm:$0xff] }
 0x25e   : > { %v6416_v29 = vpack.c.bf16 %v1074_v22, %v1070_v21  ;;  %v1073_v31 = vld [vmem:[#allocation5 + $0x160] sm:$0xff]  ;;  %v1071_v32 = vld [vmem:[#allocation5 + $0x150] sm:$0xff]  ;;  %v1619_v34 = vld [vmem:[#allocation5 + $0x318] sm:$0xff] }
 0x25f   : > { %v1075_v33 = vld [vmem:[#allocation5 + $0x170] sm:$0xff]  ;;  %v1617_v41 = vld [vmem:[#allocation5 + $0x308] sm:$0xff]  ;;  %v1635_v49 = vld [vmem:[#allocation5 + $0x398] sm:$0xff] }
 0x260   : > { %6367 = vmatpush1.bf16.msra.mxu0 %v6366_v10  ;;  %6391 = vmatpush1.bf16.msra.mxu1 %v6390_v11  ;;  %v1066_v10 = vld [vmem:[#allocation5 + $0x128] sm:$0xff]  ;;  %v1064_v11 = vld [vmem:[#allocation5 + $0x118] sm:$0xff]  ;;  %v6442_v37 = vpack.c.bf16 %v1075_v33, %v1071_v32  ;;  %v1622_v40 = vld [vmem:[#allocation5 + $0x330] sm:$0xff] }
 0x261   : > { %6369 = vmatprep.subr.bf16.mxu0 %v6368_v13  ;;  %6393 = vmatprep.subr.bf16.mxu1 %v6392_v14  ;;  %v6410_v13 = vpack.c.bf16 %v1057_v2, %v1053_v1  ;;  %v6434_v14 = vpack.c.bf16 %v1059_v8, %v1055_v7  ;;  %v6412_v17 = vpack.c.bf16 %v1066_v10, %v1062_v9  ;;  %v1621_v42 = vld [vmem:[#allocation5 + $0x328] sm:$0xff]  ;;  %v1626_v47 = vld [vmem:[#allocation5 + $0x350] sm:$0xff]  ;;  %v1616_v54 = vld [vmem:[#allocation5 + $0x300] sm:$0xff] }
 0x262   : > { %v1630_v48 = vld [vmem:[#allocation5 + $0x370] sm:$0xff]  ;;  %v6452_v53 = vpack.c.bf16 %v1621_v42, %v1617_v41  ;;  %v1625_v57 = vld [vmem:[#allocation5 + $0x348] sm:$0xff]  ;;  %v1533_v61 = vld [vmem:[#allocation2 + $0x28] sm:$0xff] }
 0x263   : > { %v6482_v58 = vpack.c.bf16 %v1630_v48, %v1626_v47  ;;  %v1634_v59 = vld [vmem:[#allocation5 + $0x390] sm:$0xff]  ;;  %v1624_v2 = vld [vmem:[#allocation5 + $0x340] sm:$0xff]  ;;  %v1637_v7 = vld [vmem:[#allocation5 + $0x3a8] sm:$0xff] }
 0x264   : > { %6371 = vmatpush1.bf16.msra.mxu0 %v6370_v18  ;;  %6395 = vmatpush1.bf16.msra.mxu1 %v6394_v19  ;;  %v6436_v18 = vpack.c.bf16 %v1068_v12, %v1064_v11  ;;  %v1063_v19 = vld [vmem:[#allocation5 + $0x110] sm:$0xff]  ;;  %v1651_v11 = vld [vmem:[#allocation5 + $0x418] sm:$0xff] }
 0x265   : > { %6397 = vmatprep.subr.bf16.mxu0 %v6396_v23  ;;  %6421 = vmatprep.subr.bf16.mxu1 %v6420_v25  ;;  %v1072_v23 = vld [vmem:[#allocation5 + $0x158] sm:$0xff]  ;;  %v6414_v25 = vpack.c.bf16 %v1065_v16, %v1061_v15  ;;  %v6438_v27 = vpack.c.bf16 %v1067_v20, %v1063_v19  ;;  %v1638_v60 = vld [vmem:[#allocation5 + $0x3b0] sm:$0xff]  ;;  %v1636_v15 = vld [vmem:[#allocation5 + $0x3a0] sm:$0xff] }
 0x266   : > { %v6440_v30 = vpack.c.bf16 %v1076_v24, %v1072_v23  ;;  %v1642_v8 = vld [vmem:[#allocation5 + $0x3d0] sm:$0xff]  ;;  %v1655_v12 = vld [vmem:[#allocation5 + $0x438] sm:$0xff]  ;;  %v1641_v16 = vld [vmem:[#allocation5 + $0x3c8] sm:$0xff] }
 0x267   : > { %v1646_v9 = vld [vmem:[#allocation5 + $0x3f0] sm:$0xff]  ;;  %v6492_v19 = vpack.c.bf16 %v1655_v12, %v1651_v11  ;;  %v1659_v23 = vld [vmem:[#allocation5 + $0x458] sm:$0xff] }
 0x268   : > { %v1650_v20 = vld [vmem:[#allocation5 + $0x410] sm:$0xff]  ;;  %v1663_v24 = vld [vmem:[#allocation5 + $0x478] sm:$0xff] }
 0x269   : > { %v1654_v21 = vld [vmem:[#allocation5 + $0x430] sm:$0xff]  ;;  %v6496_v32 = vpack.c.bf16 %v1663_v24, %v1659_v23  ;;  %v2309_v12 = vld [vmem:[#allocation10 + $0x480] sm:$0xff] }
 0x26a   : > { %v1658_v33 = vld [vmem:[#allocation5 + $0x450] sm:$0xff]  ;;  %v2317_v24 = vld [vmem:[#allocation10 + $0x4c0] sm:$0xff] }
 0x322   : > { %v6038_v39 = vpop.f32.mrb[0].mxu1  ;;  %v8933_v43 = vpop.f32.mrb[0].mxu0 }
 0x323   : > { %v1152_v44 = vpop.f32.mrb[1].mxu1  ;;  %v8935_v50 = vpop.f32.mrb[1].mxu0 }
 0x324   : > { %5671 = vmatmul.mubr.msk.f32.vlgmr.msra.gmra.mrb[2].mxu0 %vm1210_vm1, %v1152_v44  ;;  %5673 = vmatmul.mubr.msk.f32.vlgmr.msra.gmra.mrb[2].mxu1 %vm1210_vm1, %v1152_v44 }
 0x325   : > { %6399 = vmatpush1.bf16.msra.mxu0 %v6398_v35  ;;  %6423 = vmatpush1.bf16.msra.mxu1 %v6422_v36  ;;  %v1623_v35 = vld [vmem:[#allocation5 + $0x338] sm:$0xff]  ;;  %v6418_v36 = vpack.c.bf16 %v1073_v31, %v1069_v28  ;;  %v1644_v28 = vld [vmem:[#allocation5 + $0x3e0] sm:$0xff]  ;;  %v6494_v31 = vpack.c.bf16 %v1654_v21, %v1650_v20 }
 0x326   : > { %1287 = vmatprep.mubr.f32.mxu0 %v8310_v26  ;;  %1364 = vmatprep.mubr.f32.mxu1 %v8310_v26  ;;  %v6476_v38 = vpack.c.bf16 %v1623_v35, %v1619_v34  ;;  %v1662_v34 = vld [vmem:[#allocation5 + $0x470] sm:$0xff]  ;;  %v2318_v20 = vld [vmem:[#allocation10 + $0x4c8] sm:$0xff] }
 0x327   : > { %6401 = vmatprep.subr.bf16.mxu0 %v6400_v45  ;;  %6425 = vmatprep.subr.bf16.mxu1 %v6424_v46  ;;  %v1627_v45 = vld [vmem:[#allocation5 + $0x358] sm:$0xff]  ;;  %v6498_v41 = vpack.c.bf16 %v1662_v34, %v1658_v33  ;;  %v2326_v33 = vld [vmem:[#allocation10 + $0x508] sm:$0xff] }
 0x328   : > { %5672 = vmatmul.mubr.msk.f32.gmra.mrb[4].mxu0 %vm1210_vm1, %v6038_v39  ;;  %5674 = vmatmul.mubr.msk.f32.gmra.mrb[4].mxu1 %vm1210_vm1, %v6038_v39  ;;  %v1618_v39 = vld [vmem:[#allocation5 + $0x310] sm:$0xff]  ;;  %v1631_v46 = vld [vmem:[#allocation5 + $0x378] sm:$0xff] }
 0x329   : > { %6403 = vmatpush1.bf16.msra.mxu0 %v6402_v51  ;;  %6427 = vmatpush1.bf16.msra.mxu1 %v6426_v52  ;;  %v6478_v44 = vpack.c.bf16 %v1622_v40, %v1618_v39  ;;  %v1639_v51 = vld [vmem:[#allocation5 + $0x3b8] sm:$0xff]  ;;  %v1532_v52 = vld [vmem:[#allocation2 + $0x20] sm:$0xff]  ;;  %v1657_v39 = vld [vmem:[#allocation5 + $0x448] sm:$0xff] }
 0x32a   : > { %6405 = vmatprep.subr.bf16.mxu0 %v6404_v55  ;;  %6429 = vmatprep.subr.bf16.mxu1 %v6428_v56  ;;  %v1620_v55 = vld [vmem:[#allocation5 + $0x320] sm:$0xff]  ;;  %v6480_v56 = vpack.c.bf16 %v1631_v46, %v1627_v45  ;;  %v1661_v40 = vld [vmem:[#allocation5 + $0x468] sm:$0xff]  ;;  %v2320_v21 = vld [vmem:[#allocation10 + $0x4d8] sm:$0xff] }
 0x32b   : > { %1441 = vmatprep.mubr.f32.mxu0 %v8310_v26  ;;  %1518 = vmatprep.mubr.f32.mxu1 %v8310_v26  ;;  %v6454_v62 = vpack.c.bf16 %v1620_v55, %v1616_v54  ;;  %v1656_v45 = vld [vmem:[#allocation5 + $0x440] sm:$0xff]  ;;  %v2295_v55 = vld [vmem:[#allocation10 + $0x410] sm:$0xff]  ;;  %v6540_v23 = vpack.c.bf16 %v2320_v21, %v2318_v20  ;;  %v2328_v34 = vld [vmem:[#allocation10 + $0x518] sm:$0xff] }
 0x32c   : > { %v1660_v46 = vld [vmem:[#allocation5 + $0x460] sm:$0xff] }
 0x32d   : > { %6407 = vmatpush1.bf16.msra.mxu0 %v6406_v63  ;;  %6431 = vmatpush1.bf16.msra.mxu1 %v6430_v0  ;;  %v1643_v63 = vld [vmem:[#allocation5 + $0x3d8] sm:$0xff]  ;;  %v6474_v47 = vpack.c.bf16 %v1660_v46, %v1656_v45  ;;  %v2331_v45 = vld [vmem:[#allocation10 + $0x530] sm:$0xff]  ;;  %v2334_v46 = vld [vmem:[#allocation10 + $0x548] sm:$0xff] }
 0x32e   : > { %6409 = vmatprep.subr.bf16.mxu0 %v6408_v4  ;;  %6433 = vmatprep.subr.bf16.mxu1 %v6432_v5  ;;  %v1647_v0 = vld [vmem:[#allocation5 + $0x3f8] sm:$0xff]  ;;  %v1628_v4 = vld [vmem:[#allocation5 + $0x360] sm:$0xff]  ;;  %v1633_v5 = vld [vmem:[#allocation5 + $0x388] sm:$0xff] }
 0x32f   : > { %v6458_v10 = vpack.c.bf16 %v1628_v4, %v1624_v2  ;;  %v2306_v2 = vld [vmem:[#allocation10 + $0x468] sm:$0xff]  ;;  %v2308_v4 = vld [vmem:[#allocation10 + $0x478] sm:$0xff] }
 0x331   : > { %6411 = vmatpush1.bf16.msra.mxu0 %v6410_v13  ;;  %6435 = vmatpush1.bf16.msra.mxu1 %v6434_v14  ;;  %v6460_v13 = vpack.c.bf16 %v1637_v7, %v1633_v5  ;;  %v1632_v14 = vld [vmem:[#allocation5 + $0x380] sm:$0xff]  ;;  %v6528_v7 = vpack.c.bf16 %v2308_v4, %v2306_v2 }
 0x332   : > { %6413 = vmatprep.subr.bf16.mxu0 %v6412_v17  ;;  %6437 = vmatprep.subr.bf16.mxu1 %v6436_v18  ;;  %v1645_v17 = vld [vmem:[#allocation5 + $0x3e8] sm:$0xff]  ;;  %v6490_v18 = vpack.c.bf16 %v1646_v9, %v1642_v8  ;;  %v6462_v22 = vpack.c.bf16 %v1636_v15, %v1632_v14  ;;  %v2312_v9 = vld [vmem:[#allocation10 + $0x498] sm:$0xff]  ;;  %v2345_v4 = vld [vmem:[#allocation10 + $0x5a0] sm:$0xff] }
 0x333   : > { %v2310_v8 = vld [vmem:[#allocation10 + $0x488] sm:$0xff]  ;;  %v2316_v15 = vld [vmem:[#allocation10 + $0x4b8] sm:$0xff] }
 0x334   : > { %v6532_v11 = vpack.c.bf16 %v2312_v9, %v2310_v8  ;;  %v2314_v14 = vld [vmem:[#allocation10 + $0x4a8] sm:$0xff] }
 0x335   : > { %6415 = vmatpush1.bf16.msra.mxu0 %v6414_v25  ;;  %6439 = vmatpush1.bf16.msra.mxu1 %v6438_v27  ;;  %v6464_v25 = vpack.c.bf16 %v1645_v17, %v1641_v16  ;;  %v1640_v27 = vld [vmem:[#allocation5 + $0x3c0] sm:$0xff]  ;;  %v6536_v17 = vpack.c.bf16 %v2316_v15, %v2314_v14 }
 0x336   : > { %6417 = vmatprep.subr.bf16.mxu0 %v6416_v29  ;;  %6441 = vmatprep.subr.bf16.mxu1 %v6440_v30  ;;  %v1649_v29 = vld [vmem:[#allocation5 + $0x408] sm:$0xff]  ;;  %v6466_v35 = vpack.c.bf16 %v1644_v28, %v1640_v27  ;;  %v2324_v28 = vld [vmem:[#allocation10 + $0x4f8] sm:$0xff] }
 0x337   : > { %v1653_v30 = vld [vmem:[#allocation5 + $0x428] sm:$0xff] }
 0x338   : > { %v2322_v27 = vld [vmem:[#allocation10 + $0x4e8] sm:$0xff] }
 0x339   : > { %6419 = vmatpush1.bf16.msra.mxu0 %v6418_v36  ;;  %6443 = vmatpush1.bf16.msra.mxu1 %v6442_v37  ;;  %v6468_v36 = vpack.c.bf16 %v1653_v30, %v1649_v29  ;;  %v1648_v37 = vld [vmem:[#allocation5 + $0x400] sm:$0xff]  ;;  %v6544_v30 = vpack.c.bf16 %v2324_v28, %v2322_v27 }
 0x33a   : > { %6445 = vmatprep.subr.bf16.mxu0 %v8915_v3  ;;  %6477 = vmatprep.subr.bf16.mxu1 %v6476_v38  ;;  %v1652_v38 = vld [vmem:[#allocation5 + $0x420] sm:$0xff] }
 0x33b   : > { %v6470_v42 = vpack.c.bf16 %v1652_v38, %v1648_v37  ;;  %v2325_v37 = vld [vmem:[#allocation10 + $0x500] sm:$0xff]  ;;  %v2327_v38 = vld [vmem:[#allocation10 + $0x510] sm:$0xff] }
 0x33c   : > { %5675 = vmatmul.mubr.msk.f32.vlgmr.msra.gmra.mrb[2].mxu0 %vm1210_vm1, %v8935_v50  ;;  %5677 = vmatmul.mubr.msk.f32.vlgmr.msra.gmra.mrb[2].mxu1 %vm1210_vm1, %v8935_v50  ;;  %v1629_v50 = vld [vmem:[#allocation5 + $0x368] sm:$0xff] }
 0x33d   : > { %6447 = vmatpush3.bf16.msra.mxu0 %v8915_v3  ;;  %1447 = vmatprep.mubr.f32.mxu0 %v8310_v26  ;;  %v6484_v3 = vpack.c.bf16 %v1639_v51, %v1635_v49  ;;  %v6456_v1 = vpack.c.bf16 %v1629_v50, %v1625_v57  ;;  %v2294_v51 = vld [vmem:[#allocation10 + $0x408] sm:$0xff]  ;;  %v2300_v57 = vld [vmem:[#allocation10 + $0x438] sm:$0xff] }
 0x33e   : > { %1524 = vmatprep.mubr.f32.mxu1 %v8310_v26  ;;  %6449 = vmatprep.subr.bf16.mxu0 %v8917_v6 }
 0x33f   : > { %6479 = vmatpush1.bf16.msra.mxu1 %v6478_v44  ;;  %v6472_v44 = vpack.c.bf16 %v1661_v40, %v1657_v39  ;;  %v2330_v39 = vld [vmem:[#allocation10 + $0x528] sm:$0xff]  ;;  %v2332_v40 = vld [vmem:[#allocation10 + $0x538] sm:$0xff] }
 0x340   : > { %5676 = vmatmul.mubr.msk.f32.gmra.mrb[4].mxu0 %vm1210_vm1, %v8933_v43  ;;  %5678 = vmatmul.mubr.msk.f32.gmra.mrb[4].mxu1 %vm1210_vm1, %v8933_v43  ;;  %v6486_v43 = vpack.c.bf16 %v1638_v60, %v1634_v59  ;;  %v2299_v59 = vld [vmem:[#allocation10 + $0x430] sm:$0xff]  ;;  %v2302_v60 = vld [vmem:[#allocation10 + $0x448] sm:$0xff] }
 0x341   : > { %6451 = vmatpush3.bf16.msra.mxu0 %v8917_v6  ;;  %6047 = vmatprep.mubr.msk.f32.mxu0 %vm947_vm0, %v1532_v52  ;;  %v6488_v6 = vpack.c.bf16 %v1647_v0, %v1643_v63  ;;  %v2296_v52 = vld [vmem:[#allocation10 + $0x418] sm:$0xff]  ;;  %v2301_v0 = vld [vmem:[#allocation10 + $0x440] sm:$0xff] }
 0x342   : > { %6453 = vmatprep.subr.bf16.mxu0 %v6452_v53  ;;  %6481 = vmatprep.subr.bf16.mxu1 %v6480_v56  ;;  %v2293_v53 = vld [vmem:[#allocation10 + $0x400] sm:$0xff]  ;;  %v6516_v54 = vpack.c.bf16 %v2296_v52, %v2294_v51  ;;  %v2298_v56 = vld [vmem:[#allocation10 + $0x428] sm:$0xff]  ;;  %v2335_v52 = vld [vmem:[#allocation10 + $0x550] sm:$0xff] }
 0x343   : > { %6483 = vmatpush1.bf16.msra.mxu1 %v6482_v58  ;;  %1811 = vmatprep.mubr.f32.mxu1 %v8310_v26  ;;  %v6518_v50 = vpack.c.bf16 %v2295_v55, %v2293_v53  ;;  %v6520_v58 = vpack.c.bf16 %v2300_v57, %v2298_v56  ;;  %v2333_v51 = vld [vmem:[#allocation10 + $0x540] sm:$0xff]  ;;  %v2338_v53 = vld [vmem:[#allocation10 + $0x568] sm:$0xff] }
 0x344   : > { %6048 = vmatmul.mubr.msk.f32.vlgmr.msra.gmra.mrb[6].mxu0 %vm947_vm0, %v1533_v61  ;;  %6485 = vmatprep.subr.bf16.mxu1 %v6484_v3  ;;  %v2297_v3 = vld [vmem:[#allocation10 + $0x420] sm:$0xff]  ;;  %v2304_v61 = vld [vmem:[#allocation10 + $0x458] sm:$0xff]  ;;  %v6558_v55 = vpack.c.bf16 %v2335_v52, %v2333_v51  ;;  %v2350_v51 = vld [vmem:[#allocation10 + $0x5c8] sm:$0xff] }
 0x345   : > { %6455 = vmatpush1.bf16.msra.mxu0 %v6454_v62  ;;  %1734 = vmatprep.mubr.f32.mxu0 %v8310_v26  ;;  %v6522_v62 = vpack.c.bf16 %v2299_v59, %v2297_v3  ;;  %v6524_v63 = vpack.c.bf16 %v2304_v61, %v2302_v60  ;;  %v2337_v57 = vld [vmem:[#allocation10 + $0x560] sm:$0xff]  ;;  %v2344_v3 = vld [vmem:[#allocation10 + $0x598] sm:$0xff] }
 0x346   : > { %6457 = vmatprep.subr.bf16.mxu0 %v6456_v1  ;;  %v2303_v1 = vld [vmem:[#allocation10 + $0x450] sm:$0xff]  ;;  %v2341_v61 = vld [vmem:[#allocation10 + $0x580] sm:$0xff]  ;;  %v2352_v52 = vld [vmem:[#allocation10 + $0x5d8] sm:$0xff] }
 0x347   : > { %6487 = vmatpush1.bf16.msra.mxu1 %v6486_v43  ;;  %v6526_v5 = vpack.c.bf16 %v2303_v1, %v2301_v0  ;;  %v2305_v43 = vld [vmem:[#allocation10 + $0x460] sm:$0xff]  ;;  %v2348_v0 = vld [vmem:[#allocation10 + $0x5b8] sm:$0xff] }
 0x348   : > { %6489 = vmatprep.subr.bf16.mxu1 %v6488_v6  ;;  %v2307_v6 = vld [vmem:[#allocation10 + $0x470] sm:$0xff] }
 0x349   : > { %6459 = vmatpush1.bf16.msra.mxu0 %v6458_v10  ;;  %v6530_v10 = vpack.c.bf16 %v2307_v6, %v2305_v43  ;;  %v1834_v43 = vlaneseq }
 0x34a   : > { %6461 = vmatprep.subr.bf16.mxu0 %v6460_v13  ;;  %v2311_v13 = vld [vmem:[#allocation10 + $0x490] sm:$0xff] }
 0x34b   : > { %6491 = vmatpush1.bf16.msra.mxu1 %v6490_v18  ;;  %v6534_v16 = vpack.c.bf16 %v2311_v13, %v2309_v12  ;;  %v2313_v18 = vld [vmem:[#allocation10 + $0x4a0] sm:$0xff]  ;;  %v1835_v6 = vshrl.u32 %v1834_v43, 7  ;;  %v2362_v43 = vld [vmem:[#allocation10 + $0x628] sm:$0xff] }
 0x34c   : > { %6493 = vmatprep.subr.bf16.mxu1 %v6492_v19  ;;  %v2315_v19 = vld [vmem:[#allocation10 + $0x4b0] sm:$0xff] }
 0x34d   : > { %6463 = vmatpush1.bf16.msra.mxu0 %v6462_v22  ;;  %v6538_v22 = vpack.c.bf16 %v2315_v19, %v2313_v18  ;;  %v8970_v8 = vsub.s32 0, %v1835_v6  ;;  %v1844_v9 = vsub.s32 2, %v1835_v6  ;;  %v1848_v12 = vsub.s32 3, %v1835_v6 }
 0x34e   : > { %6465 = vmatprep.subr.bf16.mxu0 %v6464_v25  ;;  %v2319_v25 = vld [vmem:[#allocation10 + $0x4d0] sm:$0xff] }
 0x34f   : > { %6495 = vmatpush1.bf16.msra.mxu1 %v6494_v31  ;;  %v6542_v29 = vpack.c.bf16 %v2319_v25, %v2317_v24  ;;  %v2321_v31 = vld [vmem:[#allocation10 + $0x4e0] sm:$0xff] }
 0x350   : > { %6497 = vmatprep.subr.bf16.mxu1 %v6496_v32  ;;  %v2323_v32 = vld [vmem:[#allocation10 + $0x4f0] sm:$0xff] }
 0x351   : > { %6467 = vmatpush1.bf16.msra.mxu0 %v6466_v35  ;;  %v6546_v35 = vpack.c.bf16 %v2323_v32, %v2321_v31 }
 0x352   : > { %6469 = vmatprep.subr.bf16.mxu0 %v6468_v36  ;;  %v6548_v36 = vpack.c.bf16 %v2328_v34, %v2326_v33 }
 0x353   : > { %6499 = vmatpush1.bf16.msra.mxu1 %v6498_v41  ;;  %v6550_v41 = vpack.c.bf16 %v2327_v38, %v2325_v37 }
 0x355   : > { %6471 = vmatpush1.bf16.msra.mxu0 %v6470_v42  ;;  %v6552_v42 = vpack.c.bf16 %v2332_v40, %v2330_v39 }
 0x356   : > { %6473 = vmatprep.subr.bf16.mxu0 %v6472_v44  ;;  %v2329_v44 = vld [vmem:[#allocation10 + $0x520] sm:$0xff] }
 0x359   : > { %6475 = vmatpush1.bf16.msra.mxu0 %v6474_v47  ;;  %v2336_v47 = vld [vmem:[#allocation10 + $0x558] sm:$0xff] }
 0x35a   : > { %6517 = vmatprep.subr.bf16.mxu0 %v6516_v54  ;;  %v2340_v54 = vld [vmem:[#allocation10 + $0x578] sm:$0xff] }
 0x35b   : > { %v6560_v56 = vpack.c.bf16 %v2340_v54, %v2338_v53  ;;  %v6572_v53 = vpack.c.bf16 %v2352_v52, %v2350_v51  ;;  %v2349_v54 = vld [vmem:[#allocation10 + $0x5c0] sm:$0xff]  ;;  %v2386_v51 = vld [vmem:[#allocation10 + $0x6e8] sm:$0xff]  ;;  %v2388_v52 = vld [vmem:[#allocation10 + $0x6f8] sm:$0xff] }
 0x417   : > { %v6049_v48 = vpop.f32.mrb[6].mxu0 }
 0x418   : > { %v1606_v49 = vpop.f32.mrb[7].mxu0 }
 0x419   : > { %5681 = vmatmul.mubr.msk.f32.vlgmr.msra.gmra.mrb[2].mxu0 %vm1210_vm1, %v1606_v49  ;;  %5683 = vmatmul.mubr.msk.f32.vlgmr.msra.gmra.mrb[2].mxu1 %vm1210_vm1, %v1606_v49  ;;  %v6556_v49 = vpack.c.bf16 %v2336_v47, %v2334_v46  ;;  %v1870_v47 = vld [vmem:[#allocation8] sm:$0xff] }
 0x41a   : > { %1740 = vmatprep.mubr.f32.mxu0 %v8310_v26  ;;  %1817 = vmatprep.mubr.f32.mxu1 %v8310_v26 }
 0x41b   : > { %6519 = vmatpush1.bf16.msra.mxu0 %v6518_v50  ;;  %v2339_v50 = vld [vmem:[#allocation10 + $0x570] sm:$0xff] }
 0x41c   : > { %6521 = vmatprep.subr.bf16.mxu0 %v6520_v58  ;;  %v2342_v58 = vld [vmem:[#allocation10 + $0x588] sm:$0xff]  ;;  %v6562_v59 = vpack.c.bf16 %v2339_v50, %v2337_v57  ;;  %v2356_v50 = vld [vmem:[#allocation10 + $0x5f8] sm:$0xff] }
 0x41d   : > { %5682 = vmatmul.mubr.msk.f32.gmra.mrb[4].mxu0 %vm1210_vm1, %v6049_v48  ;;  %5684 = vmatmul.mubr.msk.f32.gmra.mrb[4].mxu1 %vm1210_vm1, %v6049_v48  ;;  %v6554_v48 = vpack.c.bf16 %v2331_v45, %v2329_v44  ;;  %v6564_v60 = vpack.c.bf16 %v2344_v3, %v2342_v58  ;;  %v2354_v57 = vld [vmem:[#allocation10 + $0x5e8] sm:$0xff]  ;;  %v2353_v3 = vld [vmem:[#allocation10 + $0x5e0] sm:$0xff] }
 0x41e   : > { %1939 = vmatprep.mubr.f32.mxu1 %v8310_v26  ;;  %v6576_v58 = vpack.c.bf16 %v2356_v50, %v2354_v57  ;;  %v2390_v57 = vld [vmem:[#allocation10 + $0x708] sm:$0xff]  ;;  %v2392_v50 = vld [vmem:[#allocation10 + $0x718] sm:$0xff] }
 0x41f   : > { %6523 = vmatpush1.bf16.msra.mxu0 %v6522_v62  ;;  %v2343_v62 = vld [vmem:[#allocation10 + $0x590] sm:$0xff] }
 0x420   : > { %6525 = vmatprep.subr.bf16.mxu0 %v6524_v63  ;;  %v2346_v63 = vld [vmem:[#allocation10 + $0x5a8] sm:$0xff]  ;;  %v6566_v1 = vpack.c.bf16 %v2343_v62, %v2341_v61  ;;  %v2360_v62 = vld [vmem:[#allocation10 + $0x618] sm:$0xff] }
 0x421   : > { %v6568_v2 = vpack.c.bf16 %v2348_v0, %v2346_v63  ;;  %v2358_v61 = vld [vmem:[#allocation10 + $0x608] sm:$0xff] }
 0x422   : > { %v6580_v63 = vpack.c.bf16 %v2360_v62, %v2358_v61  ;;  %v2394_v61 = vld [vmem:[#allocation10 + $0x728] sm:$0xff]  ;;  %v2396_v62 = vld [vmem:[#allocation10 + $0x738] sm:$0xff] }
 0x423   : > { %6527 = vmatpush1.bf16.msra.mxu0 %v6526_v5  ;;  %v2347_v5 = vld [vmem:[#allocation10 + $0x5b0] sm:$0xff] }
 0x424   : > { %6529 = vmatprep.subr.bf16.mxu0 %v6528_v7  ;;  %v6570_v7 = vpack.c.bf16 %v2347_v5, %v2345_v4  ;;  %v2357_v5 = vld [vmem:[#allocation10 + $0x600] sm:$0xff] }
 0x427   : > { %6531 = vmatpush1.bf16.msra.mxu0 %v6530_v10  ;;  %v1832_v10 = vld [vmem:[#allocation7] sm:$0xf] }
 0x428   : > { %6533 = vmatprep.subr.bf16.mxu0 %v6532_v11  ;;  %v8972_v11 = vsub.s32 1, %v1835_v6  ;;  %v1837_v13 = vrot.slane %v1832_v10, %v8970_v8  ;;  %v1845_v14 = vrot.slane %v1832_v10, %v1844_v9  ;;  %v1849_v18 = vrot.slane %v1832_v10, %v1848_v12  ;;  %v2364_v6 = vld [vmem:[#allocation10 + $0x638] sm:$0xff] }
 0x42b   : > { %6535 = vmatpush1.bf16.msra.mxu0 %v6534_v16 }
 0x42c   : > { %6537 = vmatprep.subr.bf16.mxu0 %v6536_v17  ;;  %v1841_v17 = vrot.slane %v1832_v10, %v8972_v11 }
 0x42f   : > { %6539 = vmatpush1.bf16.msra.mxu0 %v6538_v22 }
 0x430   : > { %6541 = vmatprep.subr.bf16.mxu0 %v6540_v23 }
 0x433   : > { %6543 = vmatpush1.bf16.msra.mxu0 %v6542_v29 }
 0x434   : > { %6545 = vmatprep.subr.bf16.mxu0 %v6544_v30 }
 0x437   : > { %6547 = vmatpush1.bf16.msra.mxu0 %v6546_v35 }
 0x438   : > { %6549 = vmatprep.subr.bf16.mxu0 %v6548_v36 }
 0x43b   : > { %6551 = vmatpush1.bf16.msra.mxu0 %v6550_v41 }
 0x43c   : > { %6553 = vmatprep.subr.bf16.mxu0 %v6552_v42 }
 0x43f   : > { %6555 = vmatpush1.bf16.msra.mxu0 %v6554_v48  ;;  %v2146_v48 = vld [vmem:[#allocation8 + $0x8] sm:$0xff] }
 0x440   : > { %6557 = vmatprep.subr.bf16.mxu0 %v6556_v49  ;;  %v2706_v49 = vld [vmem:[#allocation8 + $0x10] sm:$0xff] }
 0x443   : > { %6559 = vmatpush1.bf16.msra.mxu0 %v6558_v55  ;;  %v2351_v55 = vld [vmem:[#allocation10 + $0x5d0] sm:$0xff] }
 0x444   : > { %6561 = vmatprep.subr.bf16.mxu0 %v6560_v56  ;;  %v6574_v56 = vpack.c.bf16 %v2351_v55, %v2349_v54  ;;  %v6608_v54 = vpack.c.bf16 %v2388_v52, %v2386_v51  ;;  %v2385_v55 = vld [vmem:[#allocation10 + $0x6e0] sm:$0xff] }
 0x447   : > { %6563 = vmatpush1.bf16.msra.mxu0 %v6562_v59  ;;  %v2355_v59 = vld [vmem:[#allocation10 + $0x5f0] sm:$0xff] }
 0x448   : > { %6565 = vmatprep.subr.bf16.mxu0 %v6564_v60  ;;  %v6578_v60 = vpack.c.bf16 %v2355_v59, %v2353_v3  ;;  %v6612_v3 = vpack.c.bf16 %v2392_v50, %v2390_v57  ;;  %v2389_v59 = vld [vmem:[#allocation10 + $0x700] sm:$0xff] }
 0x44b   : > { %6567 = vmatpush1.bf16.msra.mxu0 %v6566_v1 }
 0x44c   : > { %6569 = vmatprep.subr.bf16.mxu0 %v6568_v2 }
 0x44f   : > { %6571 = vmatpush1.bf16.msra.mxu0 %v6570_v7  ;;  %v2359_v7 = vld [vmem:[#allocation10 + $0x610] sm:$0xff] }
 0x450   : > { %6573 = vmatprep.subr.bf16.mxu0 %v6572_v53  ;;  %v6582_v10 = vpack.c.bf16 %v2359_v7, %v2357_v5  ;;  %v6616_v5 = vpack.c.bf16 %v2396_v62, %v2394_v61  ;;  %v2393_v7 = vld [vmem:[#allocation10 + $0x720] sm:$0xff] }
 0x453   : > { %6575 = vmatpush1.bf16.msra.mxu0 %v6574_v56  ;;  %v2387_v56 = vld [vmem:[#allocation10 + $0x6f0] sm:$0xff] }
 0x454   : > { %6577 = vmatprep.subr.bf16.mxu0 %v6576_v58  ;;  %v6610_v58 = vpack.c.bf16 %v2387_v56, %v2385_v55  ;;  %v2022_v55 = vld [vmem:[#allocation10 + $0x28] sm:$0xff]  ;;  %v2024_v56 = vld [vmem:[#allocation10 + $0x38] sm:$0xff] }
 0x455   : > { %v6648_v50 = vpack.c.bf16 %v2024_v56, %v2022_v55  ;;  %v2057_v55 = vld [vmem:[#allocation10 + $0x140] sm:$0xff]  ;;  %v2059_v56 = vld [vmem:[#allocation10 + $0x150] sm:$0xff] }
 0x457   : > { %6579 = vmatpush1.bf16.msra.mxu0 %v6578_v60  ;;  %v2391_v60 = vld [vmem:[#allocation10 + $0x710] sm:$0xff] }
 0x458   : > { %6581 = vmatprep.subr.bf16.mxu0 %v6580_v63  ;;  %v6614_v63 = vpack.c.bf16 %v2391_v60, %v2389_v59  ;;  %v2026_v59 = vld [vmem:[#allocation10 + $0x48] sm:$0xff]  ;;  %v2028_v60 = vld [vmem:[#allocation10 + $0x58] sm:$0xff] }
 0x459   : > { %v6652_v62 = vpack.c.bf16 %v2028_v60, %v2026_v59  ;;  %v2061_v59 = vld [vmem:[#allocation10 + $0x160] sm:$0xff]  ;;  %v2063_v60 = vld [vmem:[#allocation10 + $0x170] sm:$0xff] }
 0x4ec   : > { %v1736_v15 = vpop.f32.mrb[2].mxu0  ;;  %v1813_v16 = vpop.f32.mrb[2].mxu1 }
 0x4ed   : > { %v1738_v19 = vpop.f32.mrb[3].mxu0  ;;  %v1815_v20 = vpop.f32.mrb[3].mxu1  ;;  %v1854_v21 = vadd.f32 %v1837_v13, %v1736_v15  ;;  %v1856_v22 = vadd.f32 %v1845_v14, %v1813_v16  ;;  %v2363_v15 = vld [vmem:[#allocation10 + $0x630] sm:$0xff]  ;;  %v2366_v16 = vld [vmem:[#allocation10 + $0x648] sm:$0xff] }
 0x4ee   : > { %v1855_v23 = vadd.f32 %v1841_v17, %v1738_v19  ;;  %v1857_v24 = vadd.f32 %v1849_v18, %v1815_v20 }
 0x4ef   : > { %v1862_v34 = vmax.f32 %v1854_v21, 0.0  ;;  %v1864_v35 = vmax.f32 %v1856_v22, 0.0  ;;  %v2365_v21 = vld [vmem:[#allocation10 + $0x640] sm:$0xff]  ;;  %v2367_v22 = vld [vmem:[#allocation10 + $0x650] sm:$0xff] }
 0x4f0   : > { %v1742_v25 = vpop.f32.mrb[4].mxu0  ;;  %v1819_v27 = vpop.f32.mrb[4].mxu1  ;;  %v1863_v38 = vmax.f32 %v1855_v23, 0.0  ;;  %v1865_v39 = vmax.f32 %v1857_v24, 0.0  ;;  %v2370_v24 = vld [vmem:[#allocation10 + $0x668] sm:$0xff] }
 0x4f1   : > { %v1858_v28 = vadd.f32 %v1837_v13, %v1742_v25  ;;  %v1860_v29 = vadd.f32 %v1845_v14, %v1819_v27  ;;  %v1744_v30 = vpop.f32.mrb[5].mxu0  ;;  %v1821_v31 = vpop.f32.mrb[5].mxu1  ;;  %v6584_v13 = vpack.c.bf16 %v2364_v6, %v2362_v43  ;;  %v2361_v14 = vld [vmem:[#allocation10 + $0x620] sm:$0xff]  ;;  %v2372_v25 = vld [vmem:[#allocation10 + $0x678] sm:$0xff]  ;;  %v6590_v27 = vpack.c.bf16 %v2367_v22, %v2365_v21  ;;  %v2395_v43 = vld [vmem:[#allocation10 + $0x730] sm:$0xff] }
 0x4f2   : > { %v1859_v32 = vadd.f32 %v1841_v17, %v1744_v30  ;;  %v1861_v33 = vadd.f32 %v1849_v18, %v1821_v31  ;;  %v2368_v17 = vld [vmem:[#allocation10 + $0x658] sm:$0xff]  ;;  %v6586_v18 = vpack.c.bf16 %v2363_v15, %v2361_v14  ;;  %v2371_v30 = vld [vmem:[#allocation10 + $0x670] sm:$0xff]  ;;  %v2374_v31 = vld [vmem:[#allocation10 + $0x688] sm:$0xff] }
 0x4f3   : > { %v1866_v36 = vmax.f32 %v1858_v28, 0.0  ;;  %v1868_v37 = vmax.f32 %v1860_v29, 0.0  ;;  %v6588_v20 = vpack.c.bf16 %v2368_v17, %v2366_v16  ;;  %v6592_v28 = vpack.c.bf16 %v2372_v25, %v2370_v24  ;;  %v2369_v29 = vld [vmem:[#allocation10 + $0x660] sm:$0xff]  ;;  %v2398_v6 = vld [vmem:[#allocation10 + $0x748] sm:$0xff]  ;;  %v2399_v14 = vld [vmem:[#allocation10 + $0x750] sm:$0xff] }
 0x4f4   : > { %v1867_v40 = vmax.f32 %v1859_v32, 0.0  ;;  %v1869_v41 = vmax.f32 %v1861_v33, 0.0  ;;  %v2376_v32 = vld [vmem:[#allocation10 + $0x698] sm:$0xff]  ;;  %v6594_v33 = vpack.c.bf16 %v2371_v30, %v2369_v29  ;;  %v2402_v15 = vld [vmem:[#allocation10 + $0x768] sm:$0xff]  ;;  %v2403_v21 = vld [vmem:[#allocation10 + $0x770] sm:$0xff] }
 0x4f5   : > { %v6502_v42 = vpack.c.bf16 %v1866_v36, %v1862_v34  ;;  %v6506_v44 = vpack.c.bf16 %v1868_v37, %v1864_v35  ;;  %v6596_v34 = vpack.c.bf16 %v2376_v32, %v2374_v31  ;;  %v2373_v35 = vld [vmem:[#allocation10 + $0x680] sm:$0xff]  ;;  %v2375_v36 = vld [vmem:[#allocation10 + $0x690] sm:$0xff]  ;;  %v2378_v37 = vld [vmem:[#allocation10 + $0x6a8] sm:$0xff] }
 0x4f6   : > { %v6500_v45 = vpack.c.bf16 %v1867_v40, %v1863_v38  ;;  %v6504_v46 = vpack.c.bf16 %v1869_v41, %v1865_v39  ;;  %v2380_v38 = vld [vmem:[#allocation10 + $0x6b8] sm:$0xff]  ;;  %v6598_v39 = vpack.c.bf16 %v2375_v36, %v2373_v35  ;;  %v2377_v41 = vld [vmem:[#allocation10 + $0x6a0] sm:$0xff]  ;;  %v2406_v22 = vld [vmem:[#allocation10 + $0x788] sm:$0xff] }
 0x4f7   : > { %v6600_v40 = vpack.c.bf16 %v2380_v38, %v2378_v37  ;;  %v2404_v16 = vld [vmem:[#allocation10 + $0x778] sm:$0xff]  ;;  %v2410_v29 = vld [vmem:[#allocation10 + $0x7a8] sm:$0xff] }
 0x4f8   : > { %6501 = vmatprep.subr.bf16.mxu1 %v6500_v45  ;;  %v2412_v30 = vld [vmem:[#allocation10 + $0x7b8] sm:$0xff]  ;;  %v2414_v35 = vld [vmem:[#allocation10 + $0x7c8] sm:$0xff] }
 0x4f9   : > { %6503 = vmatpush1.bf16.msra.mxu1 %v6502_v42  ;;  %v6632_v32 = vpack.c.bf16 %v2412_v30, %v2410_v29  ;;  %v2416_v36 = vld [vmem:[#allocation10 + $0x7d8] sm:$0xff]  ;;  %v2041_v29 = vld [vmem:[#allocation10 + $0xc0] sm:$0xff]  ;;  %v2043_v30 = vld [vmem:[#allocation10 + $0xd0] sm:$0xff] }
 0x4fa   : > { %6505 = vmatprep.subr.bf16.mxu1 %v6504_v46  ;;  %v6636_v38 = vpack.c.bf16 %v2416_v36, %v2414_v35  ;;  %v2045_v35 = vld [vmem:[#allocation10 + $0xe0] sm:$0xff]  ;;  %v2047_v36 = vld [vmem:[#allocation10 + $0xf0] sm:$0xff] }
 0x4fc   : > { %5685 = vmatmul.mubr.msk.f32.vlgmr.msra.gmra.mrb[6].mxu1 %vm1871_vm2, %v1870_v47 }
 0x4fd   : > { %6507 = vmatpush1.bf16.msra.mxu1 %v6506_v44  ;;  %2010 = vmatprep.mubr.f32.mxu1 %v8310_v26 }
 0x4fe   : > { %6509 = vmatprep.subr.bf16.mxu1 %v6500_v45 }
 0x500   : > { %5686 = vmatmul.mubr.msk.f32.vlgmr.msra.gmra.mrb[8].mxu1 %vm1871_vm2, %v1870_v47 }
 0x501   : > { %6511 = vmatpush1.bf16.msra.mxu1 %v6502_v42  ;;  %2214 = vmatprep.mubr.f32.mxu1 %v8310_v26 }
 0x502   : > { %6513 = vmatprep.subr.bf16.mxu1 %v6504_v46 }
 0x504   : > { %5687 = vmatmul.mubr.msk.f32.vlgmr.msra.gmra.mrb[10].mxu1 %vm1871_vm2, %v2146_v48 }
 0x505   : > { %6515 = vmatpush1.bf16.msra.mxu1 %v6506_v44  ;;  %2285 = vmatprep.mubr.f32.mxu1 %v8310_v26 }
 0x506   : > { %6773 = vmatprep.subr.bf16.mxu1 %v6500_v45  ;;  %v2384_v45 = vld [vmem:[#allocation10 + $0x6d8] sm:$0xff] }
 0x508   : > { %5688 = vmatmul.mubr.msk.f32.vlgmr.msra.gmra.mrb[12].mxu1 %vm1871_vm2, %v2146_v48  ;;  %v2381_v48 = vld [vmem:[#allocation10 + $0x6c0] sm:$0xff] }
 0x509   : > { %6775 = vmatpush1.bf16.msra.mxu1 %v6502_v42  ;;  %2774 = vmatprep.mubr.f32.mxu1 %v8310_v26  ;;  %v2379_v42 = vld [vmem:[#allocation10 + $0x6b0] sm:$0xff] }
 0x50a   : > { %6777 = vmatprep.subr.bf16.mxu1 %v6504_v46  ;;  %v6602_v46 = vpack.c.bf16 %v2379_v42, %v2377_v41  ;;  %v2418_v41 = vld [vmem:[#allocation10 + $0x7e8] sm:$0xff]  ;;  %v2420_v42 = vld [vmem:[#allocation10 + $0x7f8] sm:$0xff] }
 0x50c   : > { %5689 = vmatmul.mubr.msk.f32.vlgmr.msra.gmra.mrb[14].mxu1 %vm1871_vm2, %v2706_v49 }
 0x50d   : > { %6779 = vmatpush1.bf16.msra.mxu1 %v6506_v44  ;;  %2845 = vmatprep.mubr.f32.mxu1 %v8310_v26  ;;  %v2382_v44 = vld [vmem:[#allocation10 + $0x6c8] sm:$0xff] }
 0x50e   : > { %v6604_v47 = vpack.c.bf16 %v2384_v45, %v2382_v44  ;;  %v6640_v45 = vpack.c.bf16 %v2420_v42, %v2418_v41  ;;  %v2049_v41 = vld [vmem:[#allocation10 + $0x100] sm:$0xff]  ;;  %v2051_v42 = vld [vmem:[#allocation10 + $0x110] sm:$0xff] }
 0x510   : > { %5690 = vmatmul.mubr.msk.f32.vlgmr.msra.gmra.mrb[16].mxu1 %vm1871_vm2, %v2706_v49  ;;  %v2383_v49 = vld [vmem:[#allocation10 + $0x6d0] sm:$0xff] }
 0x511   : > { %3214 = vmatprep.mubr.f32.mxu1 %v8310_v26  ;;  %v6606_v53 = vpack.c.bf16 %v2383_v49, %v2381_v48  ;;  %v2018_v48 = vld [vmem:[#allocation10 + $0x8] sm:$0xff]  ;;  %v2020_v49 = vld [vmem:[#allocation10 + $0x18] sm:$0xff] }
 0x512   : > { %v6644_v52 = vpack.c.bf16 %v2020_v49, %v2018_v48  ;;  %v2053_v48 = vld [vmem:[#allocation10 + $0x120] sm:$0xff]  ;;  %v2055_v49 = vld [vmem:[#allocation10 + $0x130] sm:$0xff] }
 0x5cf   : > { %v8988_v0 = vpop.f32.mrb[6].mxu1 }
 0x5d0   : > { %v8990_v1 = vpop.f32.mrb[7].mxu1 }
 0x5d3   : > { %v8992_v2 = vpop.f32.mrb[8].mxu1 }
 0x5d4   : > { %v8994_v4 = vpop.f32.mrb[9].mxu1 }
 0x5d7   : > { %v2216_v9 = vpop.f32.mrb[10].mxu1 }
 0x5d8   : > { %v2218_v12 = vpop.f32.mrb[11].mxu1 }
 0x5d9   : > { %2485 = vmatprep.mubr.f32.mxu0 %v2218_v12 }
 0x5da   : > { %2486 = vmatmul.mubr.f32.vlgmr.msra.gmra.mrb[8].mxu0 %v2216_v9  ;;  %v2400_v9 = vld [vmem:[#allocation10 + $0x758] sm:$0xff] }
 0x5db   : > { %6583 = vmatpush1.bf16.msra.mxu0 %v6582_v10  ;;  %v8996_v19 = vpop.f32.mrb[12].mxu1  ;;  %v6618_v10 = vpack.c.bf16 %v2395_v43, %v2393_v7  ;;  %v6620_v12 = vpack.c.bf16 %v2400_v9, %v2398_v6  ;;  %v2030_v7 = vld [vmem:[#allocation10 + $0x68] sm:$0xff]  ;;  %v2032_v43 = vld [vmem:[#allocation10 + $0x78] sm:$0xff] }
 0x5dc   : > { %6585 = vmatprep.subr.bf16.mxu0 %v6584_v13  ;;  %v2289_v23 = vpop.f32.mrb[13].mxu1  ;;  %v2397_v13 = vld [vmem:[#allocation10 + $0x740] sm:$0xff]  ;;  %v6656_v9 = vpack.c.bf16 %v2032_v43, %v2030_v7  ;;  %v2067_v43 = vld [vmem:[#allocation10 + $0x190] sm:$0xff] }
 0x5dd   : > { %2556 = vmatprep.mubr.f32.mxu0 %v2289_v23  ;;  %v6622_v17 = vpack.c.bf16 %v2399_v14, %v2397_v13  ;;  %v2408_v23 = vld [vmem:[#allocation10 + $0x798] sm:$0xff]  ;;  %v2034_v13 = vld [vmem:[#allocation10 + $0x88] sm:$0xff]  ;;  %v2065_v7 = vld [vmem:[#allocation10 + $0x180] sm:$0xff] }
 0x5de   : > { %v6628_v25 = vpack.c.bf16 %v2408_v23, %v2406_v22  ;;  %v2036_v14 = vld [vmem:[#allocation10 + $0x98] sm:$0xff]  ;;  %v2037_v22 = vld [vmem:[#allocation10 + $0xa0] sm:$0xff]  ;;  %v2039_v23 = vld [vmem:[#allocation10 + $0xb0] sm:$0xff] }
 0x5df   : > { %6587 = vmatpush1.bf16.msra.mxu0 %v6586_v18  ;;  %v6624_v18 = vpack.c.bf16 %v2404_v16, %v2402_v15  ;;  %v6660_v15 = vpack.c.bf16 %v2036_v14, %v2034_v13  ;;  %v2035_v16 = vld [vmem:[#allocation10 + $0x90] sm:$0xff]  ;;  %v2069_v13 = vld [vmem:[#allocation10 + $0x1a0] sm:$0xff] }
 0x5e0   : > { %6589 = vmatprep.subr.bf16.mxu0 %v6588_v20  ;;  %v2401_v20 = vld [vmem:[#allocation10 + $0x760] sm:$0xff]  ;;  %v2071_v14 = vld [vmem:[#allocation10 + $0x1b0] sm:$0xff] }
 0x5e1   : > { %v6626_v24 = vpack.c.bf16 %v2403_v21, %v2401_v20 }
 0x5e3   : > { %6591 = vmatpush1.bf16.msra.mxu0 %v6590_v27  ;;  %v2405_v27 = vld [vmem:[#allocation10 + $0x780] sm:$0xff] }
 0x5e4   : > { %6593 = vmatprep.subr.bf16.mxu0 %v6592_v28  ;;  %v2407_v28 = vld [vmem:[#allocation10 + $0x790] sm:$0xff] }
 0x5e5   : > { %v6630_v31 = vpack.c.bf16 %v2407_v28, %v2405_v27  ;;  %v6666_v27 = vpack.c.bf16 %v2039_v23, %v2037_v22 }
 0x5e7   : > { %6595 = vmatpush1.bf16.msra.mxu0 %v6594_v33  ;;  %v2409_v33 = vld [vmem:[#allocation10 + $0x7a0] sm:$0xff] }
 0x5e8   : > { %6597 = vmatprep.subr.bf16.mxu0 %v6596_v34  ;;  %v2411_v34 = vld [vmem:[#allocation10 + $0x7b0] sm:$0xff] }
 0x5e9   : > { %v6634_v37 = vpack.c.bf16 %v2411_v34, %v2409_v33  ;;  %v6670_v33 = vpack.c.bf16 %v2043_v30, %v2041_v29 }
 0x5eb   : > { %6599 = vmatpush1.bf16.msra.mxu0 %v6598_v39  ;;  %v2413_v39 = vld [vmem:[#allocation10 + $0x7c0] sm:$0xff] }
 0x5ec   : > { %6601 = vmatprep.subr.bf16.mxu0 %v6600_v40  ;;  %v2415_v40 = vld [vmem:[#allocation10 + $0x7d0] sm:$0xff] }
 0x5ed   : > { %v6638_v44 = vpack.c.bf16 %v2415_v40, %v2413_v39  ;;  %v6674_v39 = vpack.c.bf16 %v2047_v36, %v2045_v35  ;;  %v9000_v36 = vpop.f32.mrb[14].mxu1 }
 0x5ef   : > { %6603 = vmatpush1.bf16.msra.mxu0 %v6602_v46  ;;  %v2417_v46 = vld [vmem:[#allocation10 + $0x7e0] sm:$0xff] }
 0x5f0   : > { %6605 = vmatprep.subr.bf16.mxu0 %v6604_v47  ;;  %v2419_v47 = vld [vmem:[#allocation10 + $0x7f0] sm:$0xff] }
 0x5f1   : > { %v6642_v51 = vpack.c.bf16 %v2419_v47, %v2417_v46  ;;  %v6678_v46 = vpack.c.bf16 %v2051_v42, %v2049_v41  ;;  %v2090_v41 = vld [vmem:[#allocation10 + $0x248] sm:$0xff]  ;;  %v2092_v42 = vld [vmem:[#allocation10 + $0x258] sm:$0xff] }
 0x5f3   : > { %6607 = vmatpush1.bf16.msra.mxu0 %v6606_v53  ;;  %v2017_v53 = vld [vmem:[#allocation10] sm:$0xff] }
 0x5f4   : > { %6609 = vmatprep.subr.bf16.mxu0 %v6608_v54  ;;  %v2019_v54 = vld [vmem:[#allocation10 + $0x10] sm:$0xff] }
 0x5f5   : > { %v6646_v57 = vpack.c.bf16 %v2019_v54, %v2017_v53  ;;  %v6682_v53 = vpack.c.bf16 %v2055_v49, %v2053_v48  ;;  %v2094_v48 = vld [vmem:[#allocation10 + $0x268] sm:$0xff]  ;;  %v2096_v49 = vld [vmem:[#allocation10 + $0x278] sm:$0xff] }
 0x5f7   : > { %6611 = vmatpush1.bf16.msra.mxu0 %v6610_v58  ;;  %v2021_v58 = vld [vmem:[#allocation10 + $0x20] sm:$0xff] }
 0x5f8   : > { %6613 = vmatprep.subr.bf16.mxu0 %v6612_v3  ;;  %v2023_v3 = vld [vmem:[#allocation10 + $0x30] sm:$0xff] }
 0x5f9   : > { %v6650_v61 = vpack.c.bf16 %v2023_v3, %v2021_v58  ;;  %v6686_v58 = vpack.c.bf16 %v2059_v56, %v2057_v55  ;;  %v2098_v55 = vld [vmem:[#allocation10 + $0x288] sm:$0xff]  ;;  %v2100_v56 = vld [vmem:[#allocation10 + $0x298] sm:$0xff] }
 0x5fb   : > { %6615 = vmatpush1.bf16.msra.mxu0 %v6614_v63  ;;  %v2025_v63 = vld [vmem:[#allocation10 + $0x40] sm:$0xff] }
 0x5fc   : > { %6617 = vmatprep.subr.bf16.mxu0 %v6616_v5  ;;  %v2027_v5 = vld [vmem:[#allocation10 + $0x50] sm:$0xff] }
 0x5fd   : > { %v6654_v6 = vpack.c.bf16 %v2027_v5, %v2025_v63  ;;  %v6690_v63 = vpack.c.bf16 %v2063_v60, %v2061_v59 }
 0x5ff   : > { %6619 = vmatpush1.bf16.msra.mxu0 %v6618_v10  ;;  %v2029_v10 = vld [vmem:[#allocation10 + $0x60] sm:$0xff] }
 0x600   : > { %6621 = vmatprep.subr.bf16.mxu0 %v6620_v12  ;;  %v2031_v12 = vld [vmem:[#allocation10 + $0x70] sm:$0xff] }
 0x603   : > { %6623 = vmatpush1.bf16.msra.mxu0 %v6622_v17  ;;  %v2038_v17 = vld [vmem:[#allocation10 + $0xa8] sm:$0xff] }
 0x604   : > { %6625 = vmatprep.subr.bf16.mxu0 %v6624_v18  ;;  %v2040_v18 = vld [vmem:[#allocation10 + $0xb8] sm:$0xff] }
 0x605   : > { %v6664_v21 = vpack.c.bf16 %v2040_v18, %v2038_v17  ;;  %v2073_v17 = vld [vmem:[#allocation10 + $0x1c0] sm:$0xff]  ;;  %v2075_v18 = vld [vmem:[#allocation10 + $0x1d0] sm:$0xff] }
 0x606   : > { %v6702_v22 = vpack.c.bf16 %v2075_v18, %v2073_v17 }
 0x607   : > { %6627 = vmatpush1.bf16.msra.mxu0 %v6626_v24  ;;  %v2042_v24 = vld [vmem:[#allocation10 + $0xc8] sm:$0xff] }
 0x608   : > { %6629 = vmatprep.subr.bf16.mxu0 %v6628_v25  ;;  %v2044_v25 = vld [vmem:[#allocation10 + $0xd8] sm:$0xff] }
 0x609   : > { %v6668_v28 = vpack.c.bf16 %v2044_v25, %v2042_v24  ;;  %v2077_v24 = vld [vmem:[#allocation10 + $0x1e0] sm:$0xff]  ;;  %v2079_v25 = vld [vmem:[#allocation10 + $0x1f0] sm:$0xff] }
 0x60a   : > { %v6706_v29 = vpack.c.bf16 %v2079_v25, %v2077_v24 }
 0x60b   : > { %6631 = vmatpush1.bf16.msra.mxu0 %v6630_v31  ;;  %v2046_v31 = vld [vmem:[#allocation10 + $0xe8] sm:$0xff] }
 0x60c   : > { %6633 = vmatprep.subr.bf16.mxu0 %v6632_v32  ;;  %v2048_v32 = vld [vmem:[#allocation10 + $0xf8] sm:$0xff] }
 0x60d   : > { %v6672_v34 = vpack.c.bf16 %v2048_v32, %v2046_v31  ;;  %v2081_v31 = vld [vmem:[#allocation10 + $0x200] sm:$0xff]  ;;  %v2083_v32 = vld [vmem:[#allocation10 + $0x210] sm:$0xff] }
 0x60e   : > { %v6710_v35 = vpack.c.bf16 %v2083_v32, %v2081_v31 }
 0x60f   : > { %6635 = vmatpush1.bf16.msra.mxu0 %v6634_v37  ;;  %v2050_v37 = vld [vmem:[#allocation10 + $0x108] sm:$0xff] }
 0x610   : > { %6637 = vmatprep.subr.bf16.mxu0 %v6636_v38  ;;  %v2052_v38 = vld [vmem:[#allocation10 + $0x118] sm:$0xff] }
 0x611   : > { %v6676_v40 = vpack.c.bf16 %v2052_v38, %v2050_v37  ;;  %v2085_v38 = vld [vmem:[#allocation10 + $0x220] sm:$0xff] }
 0x613   : > { %6639 = vmatpush1.bf16.msra.mxu0 %v6638_v44  ;;  %v2054_v44 = vld [vmem:[#allocation10 + $0x128] sm:$0xff] }
 0x614   : > { %6641 = vmatprep.subr.bf16.mxu0 %v6640_v45  ;;  %v2056_v45 = vld [vmem:[#allocation10 + $0x138] sm:$0xff] }
 0x615   : > { %v6680_v47 = vpack.c.bf16 %v2056_v45, %v2054_v44  ;;  %v6716_v45 = vpack.c.bf16 %v2092_v42, %v2090_v41  ;;  %v2125_v41 = vld [vmem:[#allocation10 + $0x360] sm:$0xff]  ;;  %v2127_v42 = vld [vmem:[#allocation10 + $0x370] sm:$0xff] }
 0x617   : > { %6643 = vmatpush1.bf16.msra.mxu0 %v6642_v51  ;;  %v2058_v51 = vld [vmem:[#allocation10 + $0x148] sm:$0xff] }
 0x618   : > { %6645 = vmatprep.subr.bf16.mxu0 %v6644_v52  ;;  %v2060_v52 = vld [vmem:[#allocation10 + $0x158] sm:$0xff] }
 0x619   : > { %v6684_v54 = vpack.c.bf16 %v2060_v52, %v2058_v51  ;;  %v6720_v52 = vpack.c.bf16 %v2096_v49, %v2094_v48  ;;  %v2129_v48 = vld [vmem:[#allocation10 + $0x380] sm:$0xff]  ;;  %v2131_v49 = vld [vmem:[#allocation10 + $0x390] sm:$0xff] }
 0x61a   : > { %2557 = vmatmul.mubr.f32.vlgmr.msra.gmra.mrb[8].mxu0 %v8996_v19  ;;  %v6658_v19 = vpack.c.bf16 %v2031_v12, %v2029_v10  ;;  %v6694_v10 = vpack.c.bf16 %v2067_v43, %v2065_v7 }
 0x61b   : > { %6647 = vmatpush1.bf16.msra.mxu0 %v6646_v57  ;;  %2627 = vmatprep.mubr.f32.mxu0 %v8990_v1  ;;  %v2033_v1 = vld [vmem:[#allocation10 + $0x80] sm:$0xff]  ;;  %v2062_v57 = vld [vmem:[#allocation10 + $0x168] sm:$0xff] }
 0x61c   : > { %6649 = vmatprep.subr.bf16.mxu0 %v6648_v50  ;;  %v6662_v20 = vpack.c.bf16 %v2035_v16, %v2033_v1  ;;  %v2064_v50 = vld [vmem:[#allocation10 + $0x178] sm:$0xff]  ;;  %v6698_v1 = vpack.c.bf16 %v2071_v14, %v2069_v13 }
 0x61d   : > { %v6688_v3 = vpack.c.bf16 %v2064_v50, %v2062_v57  ;;  %v6724_v57 = vpack.c.bf16 %v2100_v56, %v2098_v55  ;;  %v2099_v50 = vld [vmem:[#allocation10 + $0x290] sm:$0xff]  ;;  %v2133_v55 = vld [vmem:[#allocation10 + $0x3a0] sm:$0xff] }
 0x61e   : > { %v2135_v56 = vld [vmem:[#allocation10 + $0x3b0] sm:$0xff] }
 0x61f   : > { %6651 = vmatpush1.bf16.msra.mxu0 %v6650_v61  ;;  %v2066_v61 = vld [vmem:[#allocation10 + $0x188] sm:$0xff] }
 0x620   : > { %6653 = vmatprep.subr.bf16.mxu0 %v6652_v62  ;;  %v2068_v62 = vld [vmem:[#allocation10 + $0x198] sm:$0xff] }
 0x621   : > { %v6692_v5 = vpack.c.bf16 %v2068_v62, %v2066_v61  ;;  %v2101_v61 = vld [vmem:[#allocation10 + $0x2a0] sm:$0xff]  ;;  %v2103_v62 = vld [vmem:[#allocation10 + $0x2b0] sm:$0xff] }
 0x622   : > { %v6730_v7 = vpack.c.bf16 %v2103_v62, %v2101_v61 }
 0x623   : > { %6655 = vmatpush1.bf16.msra.mxu0 %v6654_v6  ;;  %v2070_v6 = vld [vmem:[#allocation10 + $0x1a8] sm:$0xff] }
 0x624   : > { %6657 = vmatprep.subr.bf16.mxu0 %v6656_v9  ;;  %v2072_v9 = vld [vmem:[#allocation10 + $0x1b8] sm:$0xff] }
 0x625   : > { %v6696_v12 = vpack.c.bf16 %v2072_v9, %v2070_v6  ;;  %v2105_v6 = vld [vmem:[#allocation10 + $0x2c0] sm:$0xff]  ;;  %v2107_v9 = vld [vmem:[#allocation10 + $0x2d0] sm:$0xff] }
 0x626   : > { %v6734_v13 = vpack.c.bf16 %v2107_v9, %v2105_v6 }
 0x627   : > { %6659 = vmatpush1.bf16.msra.mxu0 %v6658_v19  ;;  %v2074_v19 = vld [vmem:[#allocation10 + $0x1c8] sm:$0xff] }
 0x628   : > { %6661 = vmatprep.subr.bf16.mxu0 %v6660_v15  ;;  %v2076_v15 = vld [vmem:[#allocation10 + $0x1d8] sm:$0xff] }
 0x629   : > { %v6700_v16 = vpack.c.bf16 %v2076_v15, %v2074_v19  ;;  %v2109_v19 = vld [vmem:[#allocation10 + $0x2e0] sm:$0xff]  ;;  %v2111_v15 = vld [vmem:[#allocation10 + $0x2f0] sm:$0xff] }
 0x62a   : > { %v6738_v17 = vpack.c.bf16 %v2111_v15, %v2109_v19  ;;  %v2860_v19 = vld [vmem:[#allocation10 + $0x838] sm:$0xff] }
 0x62b   : > { %6663 = vmatpush1.bf16.msra.mxu0 %v6662_v20  ;;  %v2078_v20 = vld [vmem:[#allocation10 + $0x1e8] sm:$0xff] }
 0x62c   : > { %6665 = vmatprep.subr.bf16.mxu0 %v6664_v21  ;;  %v2080_v21 = vld [vmem:[#allocation10 + $0x1f8] sm:$0xff] }
 0x62d   : > { %v6704_v23 = vpack.c.bf16 %v2080_v21, %v2078_v20  ;;  %v2113_v20 = vld [vmem:[#allocation10 + $0x300] sm:$0xff]  ;;  %v2115_v21 = vld [vmem:[#allocation10 + $0x310] sm:$0xff] }
 0x62e   : > { %v6742_v24 = vpack.c.bf16 %v2115_v21, %v2113_v20  ;;  %v2862_v20 = vld [vmem:[#allocation10 + $0x848] sm:$0xff]  ;;  %v2864_v21 = vld [vmem:[#allocation10 + $0x858] sm:$0xff] }
 0x62f   : > { %6667 = vmatpush1.bf16.msra.mxu0 %v6666_v27  ;;  %v2082_v27 = vld [vmem:[#allocation10 + $0x208] sm:$0xff] }
 0x630   : > { %6669 = vmatprep.subr.bf16.mxu0 %v6668_v28  ;;  %v2084_v28 = vld [vmem:[#allocation10 + $0x218] sm:$0xff] }
 0x631   : > { %v6708_v30 = vpack.c.bf16 %v2084_v28, %v2082_v27  ;;  %v2117_v27 = vld [vmem:[#allocation10 + $0x320] sm:$0xff]  ;;  %v2119_v28 = vld [vmem:[#allocation10 + $0x330] sm:$0xff] }
 0x632   : > { %v6746_v31 = vpack.c.bf16 %v2119_v28, %v2117_v27  ;;  %v2866_v27 = vld [vmem:[#allocation10 + $0x868] sm:$0xff]  ;;  %v2868_v28 = vld [vmem:[#allocation10 + $0x878] sm:$0xff] }
 0x633   : > { %6671 = vmatpush1.bf16.msra.mxu0 %v6670_v33  ;;  %v2086_v33 = vld [vmem:[#allocation10 + $0x228] sm:$0xff] }
 0x634   : > { %6673 = vmatprep.subr.bf16.mxu0 %v6672_v34  ;;  %v2088_v34 = vld [vmem:[#allocation10 + $0x238] sm:$0xff] }
 0x635   : > { %v6712_v37 = vpack.c.bf16 %v2088_v34, %v2086_v33  ;;  %v2121_v33 = vld [vmem:[#allocation10 + $0x340] sm:$0xff]  ;;  %v2123_v34 = vld [vmem:[#allocation10 + $0x350] sm:$0xff] }
 0x637   : > { %6675 = vmatpush1.bf16.msra.mxu0 %v6674_v39  ;;  %v2087_v39 = vld [vmem:[#allocation10 + $0x230] sm:$0xff] }
 0x638   : > { %6677 = vmatprep.subr.bf16.mxu0 %v6676_v40  ;;  %v9002_v40 = vpop.f32.mrb[15].mxu1  ;;  %v6714_v44 = vpack.c.bf16 %v2087_v39, %v2085_v38  ;;  %v6750_v38 = vpack.c.bf16 %v2123_v34, %v2121_v33  ;;  %v2870_v33 = vld [vmem:[#allocation10 + $0x888] sm:$0xff]  ;;  %v2872_v34 = vld [vmem:[#allocation10 + $0x898] sm:$0xff] }
 0x63b   : > { %6679 = vmatpush1.bf16.msra.mxu0 %v6678_v46  ;;  %v2089_v46 = vld [vmem:[#allocation10 + $0x240] sm:$0xff] }
 0x63c   : > { %6681 = vmatprep.subr.bf16.mxu0 %v6680_v47  ;;  %v2091_v47 = vld [vmem:[#allocation10 + $0x250] sm:$0xff] }
 0x63d   : > { %v6718_v51 = vpack.c.bf16 %v2091_v47, %v2089_v46  ;;  %v6754_v46 = vpack.c.bf16 %v2127_v42, %v2125_v41 }
 0x63f   : > { %6683 = vmatpush1.bf16.msra.mxu0 %v6682_v53  ;;  %v2093_v53 = vld [vmem:[#allocation10 + $0x260] sm:$0xff] }
 0x640   : > { %6685 = vmatprep.subr.bf16.mxu0 %v6684_v54  ;;  %v2095_v54 = vld [vmem:[#allocation10 + $0x270] sm:$0xff] }
 0x643   : > { %6687 = vmatpush1.bf16.msra.mxu0 %v6686_v58  ;;  %v2102_v58 = vld [vmem:[#allocation10 + $0x2a8] sm:$0xff] }
 0x644   : > { %6689 = vmatprep.subr.bf16.mxu0 %v6688_v3  ;;  %v2104_v3 = vld [vmem:[#allocation10 + $0x2b8] sm:$0xff] }
 0x645   : > { %v6728_v60 = vpack.c.bf16 %v2104_v3, %v2102_v58  ;;  %v2137_v58 = vld [vmem:[#allocation10 + $0x3c0] sm:$0xff]  ;;  %v2139_v3 = vld [vmem:[#allocation10 + $0x3d0] sm:$0xff] }
 0x646   : > { %v6766_v61 = vpack.c.bf16 %v2139_v3, %v2137_v58 }
 0x647   : > { %6691 = vmatpush1.bf16.msra.mxu0 %v6690_v63  ;;  %v2106_v63 = vld [vmem:[#allocation10 + $0x2c8] sm:$0xff] }
 0x648   : > { %6693 = vmatprep.subr.bf16.mxu0 %v6692_v5  ;;  %v2108_v5 = vld [vmem:[#allocation10 + $0x2d8] sm:$0xff] }
 0x649   : > { %v6732_v43 = vpack.c.bf16 %v2108_v5, %v2106_v63  ;;  %v2141_v63 = vld [vmem:[#allocation10 + $0x3e0] sm:$0xff]  ;;  %v2143_v5 = vld [vmem:[#allocation10 + $0x3f0] sm:$0xff] }
 0x64a   : > { %v6770_v6 = vpack.c.bf16 %v2143_v5, %v2141_v63 }
 0x64b   : > { %6695 = vmatpush1.bf16.msra.mxu0 %v6694_v10  ;;  %v2110_v10 = vld [vmem:[#allocation10 + $0x2e8] sm:$0xff] }
 0x64c   : > { %6697 = vmatprep.subr.bf16.mxu0 %v6696_v12  ;;  %v2112_v12 = vld [vmem:[#allocation10 + $0x2f8] sm:$0xff] }
 0x64d   : > { %v6736_v14 = vpack.c.bf16 %v2112_v12, %v2110_v10  ;;  %v2853_v10 = vld [vmem:[#allocation10 + $0x800] sm:$0xff]  ;;  %v2855_v12 = vld [vmem:[#allocation10 + $0x810] sm:$0xff] }
 0x64e   : > { %v6782_v15 = vpack.c.bf16 %v2855_v12, %v2853_v10 }
 0x64f   : > { %6699 = vmatpush1.bf16.msra.mxu0 %v6698_v1  ;;  %v2114_v1 = vld [vmem:[#allocation10 + $0x308] sm:$0xff] }
 0x650   : > { %6701 = vmatprep.subr.bf16.mxu0 %v6700_v16  ;;  %v2116_v16 = vld [vmem:[#allocation10 + $0x318] sm:$0xff] }
 0x651   : > { %v6740_v18 = vpack.c.bf16 %v2116_v16, %v2114_v1 }
 0x653   : > { %6703 = vmatpush1.bf16.msra.mxu0 %v6702_v22  ;;  %v2118_v22 = vld [vmem:[#allocation10 + $0x328] sm:$0xff] }
 0x654   : > { %6705 = vmatprep.subr.bf16.mxu0 %v6704_v23  ;;  %v2120_v23 = vld [vmem:[#allocation10 + $0x338] sm:$0xff] }
 0x655   : > { %v6744_v25 = vpack.c.bf16 %v2120_v23, %v2118_v22  ;;  %v6788_v23 = vpack.c.bf16 %v2864_v21, %v2862_v20  ;;  %v2897_v20 = vld [vmem:[#allocation10 + $0x960] sm:$0xff]  ;;  %v2899_v21 = vld [vmem:[#allocation10 + $0x970] sm:$0xff] }
 0x657   : > { %6707 = vmatpush1.bf16.msra.mxu0 %v6706_v29  ;;  %v2122_v29 = vld [vmem:[#allocation10 + $0x348] sm:$0xff] }
 0x658   : > { %6709 = vmatprep.subr.bf16.mxu0 %v6708_v30  ;;  %v2124_v30 = vld [vmem:[#allocation10 + $0x358] sm:$0xff] }
 0x659   : > { %v6748_v32 = vpack.c.bf16 %v2124_v30, %v2122_v29  ;;  %v6792_v30 = vpack.c.bf16 %v2868_v28, %v2866_v27  ;;  %v2901_v27 = vld [vmem:[#allocation10 + $0x980] sm:$0xff]  ;;  %v2903_v28 = vld [vmem:[#allocation10 + $0x990] sm:$0xff] }
 0x65a   : > { %2628 = vmatmul.mubr.f32.vlgmr.msra.gmra.mrb[8].mxu0 %v8988_v0  ;;  %v6722_v0 = vpack.c.bf16 %v2095_v54, %v2093_v53  ;;  %v6758_v53 = vpack.c.bf16 %v2131_v49, %v2129_v48 }
 0x65b   : > { %6711 = vmatpush1.bf16.msra.mxu0 %v6710_v35  ;;  %2698 = vmatprep.mubr.f32.mxu0 %v8994_v4  ;;  %v2097_v4 = vld [vmem:[#allocation10 + $0x280] sm:$0xff]  ;;  %v2126_v35 = vld [vmem:[#allocation10 + $0x368] sm:$0xff] }
 0x65c   : > { %6713 = vmatprep.subr.bf16.mxu0 %v6712_v37  ;;  %v6726_v59 = vpack.c.bf16 %v2099_v50, %v2097_v4  ;;  %v2128_v37 = vld [vmem:[#allocation10 + $0x378] sm:$0xff]  ;;  %v6762_v4 = vpack.c.bf16 %v2135_v56, %v2133_v55 }
 0x65d   : > { %v6752_v39 = vpack.c.bf16 %v2128_v37, %v2126_v35  ;;  %v6796_v35 = vpack.c.bf16 %v2872_v34, %v2870_v33  ;;  %v2869_v37 = vld [vmem:[#allocation10 + $0x880] sm:$0xff]  ;;  %v2907_v34 = vld [vmem:[#allocation10 + $0x9b0] sm:$0xff] }
 0x65e   : > { %v2905_v33 = vld [vmem:[#allocation10 + $0x9a0] sm:$0xff] }
 0x65f   : > { %6715 = vmatpush1.bf16.msra.mxu0 %v6714_v44  ;;  %v2130_v44 = vld [vmem:[#allocation10 + $0x388] sm:$0xff] }
 0x660   : > { %6717 = vmatprep.subr.bf16.mxu0 %v6716_v45  ;;  %v2132_v45 = vld [vmem:[#allocation10 + $0x398] sm:$0xff] }
 0x661   : > { %v6756_v47 = vpack.c.bf16 %v2132_v45, %v2130_v44  ;;  %v2873_v44 = vld [vmem:[#allocation10 + $0x8a0] sm:$0xff]  ;;  %v2875_v45 = vld [vmem:[#allocation10 + $0x8b0] sm:$0xff] }
 0x662   : > { %v6802_v48 = vpack.c.bf16 %v2875_v45, %v2873_v44 }
 0x663   : > { %6719 = vmatpush1.bf16.msra.mxu0 %v6718_v51  ;;  %v2134_v51 = vld [vmem:[#allocation10 + $0x3a8] sm:$0xff] }
 0x664   : > { %6721 = vmatprep.subr.bf16.mxu0 %v6720_v52  ;;  %v2136_v52 = vld [vmem:[#allocation10 + $0x3b8] sm:$0xff] }
 0x665   : > { %v6760_v54 = vpack.c.bf16 %v2136_v52, %v2134_v51  ;;  %v2877_v51 = vld [vmem:[#allocation10 + $0x8c0] sm:$0xff]  ;;  %v2879_v52 = vld [vmem:[#allocation10 + $0x8d0] sm:$0xff] }
 0x666   : > { %v6806_v55 = vpack.c.bf16 %v2879_v52, %v2877_v51 }
 0x667   : > { %6723 = vmatpush1.bf16.msra.mxu0 %v6722_v0  ;;  %v2138_v0 = vld [vmem:[#allocation10 + $0x3c8] sm:$0xff] }
 0x668   : > { %6725 = vmatprep.subr.bf16.mxu0 %v6724_v57  ;;  %v2140_v57 = vld [vmem:[#allocation10 + $0x3d8] sm:$0xff] }
 0x669   : > { %v6764_v50 = vpack.c.bf16 %v2140_v57, %v2138_v0  ;;  %v2881_v0 = vld [vmem:[#allocation10 + $0x8e0] sm:$0xff]  ;;  %v2883_v57 = vld [vmem:[#allocation10 + $0x8f0] sm:$0xff] }
 0x66a   : > { %v6810_v58 = vpack.c.bf16 %v2883_v57, %v2881_v0 }
 0x66b   : > { %6727 = vmatpush1.bf16.msra.mxu0 %v6726_v59  ;;  %v2142_v59 = vld [vmem:[#allocation10 + $0x3e8] sm:$0xff] }
 0x66c   : > { %6729 = vmatprep.subr.bf16.mxu0 %v6728_v60  ;;  %v2144_v60 = vld [vmem:[#allocation10 + $0x3f8] sm:$0xff] }
 0x66d   : > { %v6768_v62 = vpack.c.bf16 %v2144_v60, %v2142_v59  ;;  %v2885_v59 = vld [vmem:[#allocation10 + $0x900] sm:$0xff]  ;;  %v2887_v60 = vld [vmem:[#allocation10 + $0x910] sm:$0xff] }
 0x66e   : > { %v6814_v63 = vpack.c.bf16 %v2887_v60, %v2885_v59 }
 0x66f   : > { %6731 = vmatpush1.bf16.msra.mxu0 %v6730_v7  ;;  %v2854_v7 = vld [vmem:[#allocation10 + $0x808] sm:$0xff] }
 0x670   : > { %6733 = vmatprep.subr.bf16.mxu0 %v6732_v43  ;;  %v2856_v43 = vld [vmem:[#allocation10 + $0x818] sm:$0xff] }
 0x671   : > { %v6780_v9 = vpack.c.bf16 %v2856_v43, %v2854_v7  ;;  %v2889_v7 = vld [vmem:[#allocation10 + $0x920] sm:$0xff]  ;;  %v2891_v43 = vld [vmem:[#allocation10 + $0x930] sm:$0xff] }
 0x672   : > { %v6818_v10 = vpack.c.bf16 %v2891_v43, %v2889_v7 }
 0x673   : > { %6735 = vmatpush1.bf16.msra.mxu0 %v6734_v13  ;;  %v9006_v13 = vpop.f32.mrb[16].mxu1 }
 0x674   : > { %6737 = vmatprep.subr.bf16.mxu0 %v6736_v14  ;;  %v2858_v14 = vld [vmem:[#allocation10 + $0x828] sm:$0xff]  ;;  %v9008_v1 = vpop.f32.mrb[17].mxu1 }
 0x675   : > { %v6784_v16 = vpack.c.bf16 %v2860_v19, %v2858_v14  ;;  %v2893_v14 = vld [vmem:[#allocation10 + $0x940] sm:$0xff]  ;;  %v2895_v19 = vld [vmem:[#allocation10 + $0x950] sm:$0xff] }
 0x677   : > { %6739 = vmatpush1.bf16.msra.mxu0 %v6738_v17  ;;  %v2857_v17 = vld [vmem:[#allocation10 + $0x820] sm:$0xff] }
 0x678   : > { %6741 = vmatprep.subr.bf16.mxu0 %v6740_v18  ;;  %v2859_v18 = vld [vmem:[#allocation10 + $0x830] sm:$0xff] }
 0x679   : > { %v6786_v22 = vpack.c.bf16 %v2859_v18, %v2857_v17  ;;  %v6822_v17 = vpack.c.bf16 %v2895_v19, %v2893_v14  ;;  %v2933_v19 = vld [vmem:[#allocation10 + $0xa80] sm:$0xff] }
 0x67b   : > { %6743 = vmatpush1.bf16.msra.mxu0 %v6742_v24  ;;  %v2861_v24 = vld [vmem:[#allocation10 + $0x840] sm:$0xff] }
 0x67c   : > { %6745 = vmatprep.subr.bf16.mxu0 %v6744_v25  ;;  %v2863_v25 = vld [vmem:[#allocation10 + $0x850] sm:$0xff] }
 0x67d   : > { %v6790_v29 = vpack.c.bf16 %v2863_v25, %v2861_v24  ;;  %v6826_v24 = vpack.c.bf16 %v2899_v21, %v2897_v20  ;;  %v2937_v20 = vld [vmem:[#allocation10 + $0xaa0] sm:$0xff]  ;;  %v2939_v21 = vld [vmem:[#allocation10 + $0xab0] sm:$0xff] }
 0x67f   : > { %6747 = vmatpush1.bf16.msra.mxu0 %v6746_v31  ;;  %v2865_v31 = vld [vmem:[#allocation10 + $0x860] sm:$0xff] }
 0x680   : > { %6749 = vmatprep.subr.bf16.mxu0 %v6748_v32  ;;  %v2867_v32 = vld [vmem:[#allocation10 + $0x870] sm:$0xff] }
 0x683   : > { %6751 = vmatpush1.bf16.msra.mxu0 %v6750_v38  ;;  %v2874_v38 = vld [vmem:[#allocation10 + $0x8a8] sm:$0xff] }
 0x684   : > { %6753 = vmatprep.subr.bf16.mxu0 %v6752_v39  ;;  %v2876_v39 = vld [vmem:[#allocation10 + $0x8b8] sm:$0xff] }
 0x685   : > { %v6800_v42 = vpack.c.bf16 %v2876_v39, %v2874_v38  ;;  %v2909_v38 = vld [vmem:[#allocation10 + $0x9c0] sm:$0xff]  ;;  %v2911_v39 = vld [vmem:[#allocation10 + $0x9d0] sm:$0xff] }
 0x686   : > { %v6838_v44 = vpack.c.bf16 %v2911_v39, %v2909_v38  ;;  %v2949_v38 = vld [vmem:[#allocation10 + $0xb00] sm:$0xff]  ;;  %v2951_v39 = vld [vmem:[#allocation10 + $0xb10] sm:$0xff] }
 0x687   : > { %6755 = vmatpush1.bf16.msra.mxu0 %v6754_v46  ;;  %v2878_v46 = vld [vmem:[#allocation10 + $0x8c8] sm:$0xff] }
 0x688   : > { %6757 = vmatprep.subr.bf16.mxu0 %v6756_v47  ;;  %v2880_v47 = vld [vmem:[#allocation10 + $0x8d8] sm:$0xff] }
 0x689   : > { %v6804_v49 = vpack.c.bf16 %v2880_v47, %v2878_v46  ;;  %v2913_v46 = vld [vmem:[#allocation10 + $0x9e0] sm:$0xff]  ;;  %v2915_v47 = vld [vmem:[#allocation10 + $0x9f0] sm:$0xff] }
 0x68a   : > { %v6842_v51 = vpack.c.bf16 %v2915_v47, %v2913_v46  ;;  %v2953_v46 = vld [vmem:[#allocation10 + $0xb20] sm:$0xff]  ;;  %v2955_v47 = vld [vmem:[#allocation10 + $0xb30] sm:$0xff] }
 0x68b   : > { %6759 = vmatpush1.bf16.msra.mxu0 %v6758_v53  ;;  %v2882_v53 = vld [vmem:[#allocation10 + $0x8e8] sm:$0xff] }
 0x68c   : > { %6761 = vmatprep.subr.bf16.mxu0 %v6760_v54  ;;  %v2884_v54 = vld [vmem:[#allocation10 + $0x8f8] sm:$0xff] }
 0x68d   : > { %v6808_v56 = vpack.c.bf16 %v2884_v54, %v2882_v53  ;;  %v2917_v53 = vld [vmem:[#allocation10 + $0xa00] sm:$0xff]  ;;  %v2919_v54 = vld [vmem:[#allocation10 + $0xa10] sm:$0xff] }
 0x68e   : > { %v6846_v0 = vpack.c.bf16 %v2919_v54, %v2917_v53  ;;  %v2957_v53 = vld [vmem:[#allocation10 + $0xb40] sm:$0xff]  ;;  %v2959_v54 = vld [vmem:[#allocation10 + $0xb50] sm:$0xff] }
 0x68f   : > { %6763 = vmatpush1.bf16.msra.mxu0 %v6762_v4  ;;  %v2886_v4 = vld [vmem:[#allocation10 + $0x908] sm:$0xff] }
 0x690   : > { %6765 = vmatprep.subr.bf16.mxu0 %v6764_v50  ;;  %v2888_v50 = vld [vmem:[#allocation10 + $0x918] sm:$0xff] }
 0x691   : > { %v6812_v3 = vpack.c.bf16 %v2888_v50, %v2886_v4  ;;  %v2921_v4 = vld [vmem:[#allocation10 + $0xa20] sm:$0xff]  ;;  %v2923_v50 = vld [vmem:[#allocation10 + $0xa30] sm:$0xff] }
 0x692   : > { %v6850_v59 = vpack.c.bf16 %v2923_v50, %v2921_v4  ;;  %v2961_v4 = vld [vmem:[#allocation10 + $0xb60] sm:$0xff]  ;;  %v2963_v50 = vld [vmem:[#allocation10 + $0xb70] sm:$0xff] }
 0x693   : > { %6767 = vmatpush1.bf16.msra.mxu0 %v6766_v61  ;;  %v2890_v61 = vld [vmem:[#allocation10 + $0x928] sm:$0xff] }
 0x694   : > { %6769 = vmatprep.subr.bf16.mxu0 %v6768_v62  ;;  %v2892_v62 = vld [vmem:[#allocation10 + $0x938] sm:$0xff] }
 0x695   : > { %v6816_v5 = vpack.c.bf16 %v2892_v62, %v2890_v61  ;;  %v2925_v61 = vld [vmem:[#allocation10 + $0xa40] sm:$0xff]  ;;  %v2927_v62 = vld [vmem:[#allocation10 + $0xa50] sm:$0xff] }
 0x696   : > { %v6854_v7 = vpack.c.bf16 %v2927_v62, %v2925_v61  ;;  %v2965_v61 = vld [vmem:[#allocation10 + $0xb80] sm:$0xff]  ;;  %v2967_v62 = vld [vmem:[#allocation10 + $0xb90] sm:$0xff] }
 0x697   : > { %6771 = vmatpush1.bf16.msra.mxu0 %v6770_v6  ;;  %v2894_v6 = vld [vmem:[#allocation10 + $0x948] sm:$0xff] }
 0x698   : > { %6781 = vmatprep.subr.bf16.mxu0 %v6780_v9  ;;  %v2896_v9 = vld [vmem:[#allocation10 + $0x958] sm:$0xff] }
 0x699   : > { %v6820_v12 = vpack.c.bf16 %v2896_v9, %v2894_v6  ;;  %v2929_v6 = vld [vmem:[#allocation10 + $0xa60] sm:$0xff]  ;;  %v2931_v9 = vld [vmem:[#allocation10 + $0xa70] sm:$0xff] }
 0x69a   : > { %2699 = vmatmul.mubr.f32.vlgmr.msra.gmra.mrb[8].mxu0 %v8992_v2  ;;  %v6794_v2 = vpack.c.bf16 %v2867_v32, %v2865_v31  ;;  %v6830_v31 = vpack.c.bf16 %v2903_v28, %v2901_v27  ;;  %v2941_v27 = vld [vmem:[#allocation10 + $0xac0] sm:$0xff]  ;;  %v2943_v28 = vld [vmem:[#allocation10 + $0xad0] sm:$0xff] }
 0x69b   : > { %6783 = vmatpush1.bf16.msra.mxu0 %v6782_v15  ;;  %3045 = vmatprep.mubr.f32.mxu0 %v9002_v40  ;;  %v2871_v40 = vld [vmem:[#allocation10 + $0x890] sm:$0xff]  ;;  %v2898_v15 = vld [vmem:[#allocation10 + $0x968] sm:$0xff] }
 0x69c   : > { %6785 = vmatprep.subr.bf16.mxu0 %v6784_v16  ;;  %v6798_v41 = vpack.c.bf16 %v2871_v40, %v2869_v37  ;;  %v2900_v16 = vld [vmem:[#allocation10 + $0x978] sm:$0xff]  ;;  %v6834_v37 = vpack.c.bf16 %v2907_v34, %v2905_v33  ;;  %v2945_v33 = vld [vmem:[#allocation10 + $0xae0] sm:$0xff]  ;;  %v2947_v34 = vld [vmem:[#allocation10 + $0xaf0] sm:$0xff] }
 0x69d   : > { %v6824_v18 = vpack.c.bf16 %v2900_v16, %v2898_v15  ;;  %v2938_v15 = vld [vmem:[#allocation10 + $0xaa8] sm:$0xff]  ;;  %v2940_v16 = vld [vmem:[#allocation10 + $0xab8] sm:$0xff] }
 0x69f   : > { %6787 = vmatpush1.bf16.msra.mxu0 %v6786_v22  ;;  %v2902_v22 = vld [vmem:[#allocation10 + $0x988] sm:$0xff] }
 0x6a0   : > { %6789 = vmatprep.subr.bf16.mxu0 %v6788_v23  ;;  %v2904_v23 = vld [vmem:[#allocation10 + $0x998] sm:$0xff] }
 0x6a1   : > { %v6828_v25 = vpack.c.bf16 %v2904_v23, %v2902_v22  ;;  %v2942_v22 = vld [vmem:[#allocation10 + $0xac8] sm:$0xff]  ;;  %v2944_v23 = vld [vmem:[#allocation10 + $0xad8] sm:$0xff] }
 0x6a3   : > { %6791 = vmatpush1.bf16.msra.mxu0 %v6790_v29  ;;  %v2906_v29 = vld [vmem:[#allocation10 + $0x9a8] sm:$0xff] }
 0x6a4   : > { %6793 = vmatprep.subr.bf16.mxu0 %v6792_v30  ;;  %v2908_v30 = vld [vmem:[#allocation10 + $0x9b8] sm:$0xff] }
 0x6a5   : > { %v6832_v32 = vpack.c.bf16 %v2908_v30, %v2906_v29  ;;  %v2946_v29 = vld [vmem:[#allocation10 + $0xae8] sm:$0xff]  ;;  %v2948_v30 = vld [vmem:[#allocation10 + $0xaf8] sm:$0xff] }
 0x6a7   : > { %6795 = vmatpush1.bf16.msra.mxu0 %v6794_v2  ;;  %v2910_v2 = vld [vmem:[#allocation10 + $0x9c8] sm:$0xff] }
 0x6a8   : > { %6797 = vmatprep.subr.bf16.mxu0 %v6796_v35  ;;  %v2912_v35 = vld [vmem:[#allocation10 + $0x9d8] sm:$0xff] }
 0x6a9   : > { %v6836_v40 = vpack.c.bf16 %v2912_v35, %v2910_v2  ;;  %v2950_v2 = vld [vmem:[#allocation10 + $0xb08] sm:$0xff]  ;;  %v2952_v35 = vld [vmem:[#allocation10 + $0xb18] sm:$0xff] }
 0x6ab   : > { %6799 = vmatpush1.bf16.msra.mxu0 %v6798_v41  ;;  %v2914_v41 = vld [vmem:[#allocation10 + $0x9e8] sm:$0xff] }
 0x6ac   : > { %6801 = vmatprep.subr.bf16.mxu0 %v6800_v42  ;;  %v2916_v42 = vld [vmem:[#allocation10 + $0x9f8] sm:$0xff] }
 0x6ad   : > { %v6840_v45 = vpack.c.bf16 %v2916_v42, %v2914_v41  ;;  %v2954_v41 = vld [vmem:[#allocation10 + $0xb28] sm:$0xff]  ;;  %v2956_v42 = vld [vmem:[#allocation10 + $0xb38] sm:$0xff] }
 0x6af   : > { %6803 = vmatpush1.bf16.msra.mxu0 %v6802_v48  ;;  %v2918_v48 = vld [vmem:[#allocation10 + $0xa08] sm:$0xff] }
 0x6b0   : > { %6805 = vmatprep.subr.bf16.mxu0 %v6804_v49  ;;  %v2920_v49 = vld [vmem:[#allocation10 + $0xa18] sm:$0xff] }
 0x6b1   : > { %v6844_v52 = vpack.c.bf16 %v2920_v49, %v2918_v48  ;;  %v2958_v48 = vld [vmem:[#allocation10 + $0xb48] sm:$0xff]  ;;  %v2960_v49 = vld [vmem:[#allocation10 + $0xb58] sm:$0xff] }
 0x6b3   : > { %6807 = vmatpush1.bf16.msra.mxu0 %v6806_v55  ;;  %v2922_v55 = vld [vmem:[#allocation10 + $0xa28] sm:$0xff] }
 0x6b4   : > { %6809 = vmatprep.subr.bf16.mxu0 %v6808_v56  ;;  %v2924_v56 = vld [vmem:[#allocation10 + $0xa38] sm:$0xff] }
 0x6b5   : > { %v6848_v57 = vpack.c.bf16 %v2924_v56, %v2922_v55  ;;  %v2962_v55 = vld [vmem:[#allocation10 + $0xb68] sm:$0xff]  ;;  %v2964_v56 = vld [vmem:[#allocation10 + $0xb78] sm:$0xff] }
 0x6b7   : > { %6811 = vmatpush1.bf16.msra.mxu0 %v6810_v58  ;;  %v2926_v58 = vld [vmem:[#allocation10 + $0xa48] sm:$0xff] }
 0x6b8   : > { %6813 = vmatprep.subr.bf16.mxu0 %v6812_v3  ;;  %v2928_v3 = vld [vmem:[#allocation10 + $0xa58] sm:$0xff] }
 0x6b9   : > { %v6852_v60 = vpack.c.bf16 %v2928_v3, %v2926_v58  ;;  %v2966_v58 = vld [vmem:[#allocation10 + $0xb88] sm:$0xff]  ;;  %v2968_v3 = vld [vmem:[#allocation10 + $0xb98] sm:$0xff] }
 0x6bb   : > { %6815 = vmatpush1.bf16.msra.mxu0 %v6814_v63  ;;  %v2930_v63 = vld [vmem:[#allocation10 + $0xa68] sm:$0xff] }
 0x6bc   : > { %6817 = vmatprep.subr.bf16.mxu0 %v6816_v5  ;;  %v2932_v5 = vld [vmem:[#allocation10 + $0xa78] sm:$0xff] }
 0x6bd   : > { %v6856_v43 = vpack.c.bf16 %v2932_v5, %v2930_v63  ;;  %v2970_v63 = vld [vmem:[#allocation10 + $0xba8] sm:$0xff]  ;;  %v2972_v5 = vld [vmem:[#allocation10 + $0xbb8] sm:$0xff] }
 0x6bf   : > { %6819 = vmatpush1.bf16.msra.mxu0 %v6818_v10  ;;  %v2934_v10 = vld [vmem:[#allocation10 + $0xa88] sm:$0xff] }
 0x6c0   : > { %6821 = vmatprep.subr.bf16.mxu0 %v6820_v12  ;;  %v2936_v12 = vld [vmem:[#allocation10 + $0xa98] sm:$0xff] }
 0x6c1   : > { %v6860_v14 = vpack.c.bf16 %v2936_v12, %v2934_v10  ;;  %v2974_v10 = vld [vmem:[#allocation10 + $0xbc8] sm:$0xff]  ;;  %v2976_v12 = vld [vmem:[#allocation10 + $0xbd8] sm:$0xff] }
 0x6c3   : > { %6823 = vmatpush1.bf16.msra.mxu0 %v6822_v17 }
 0x6c4   : > { %6825 = vmatprep.subr.bf16.mxu0 %v6824_v18  ;;  %v6864_v18 = vpack.c.bf16 %v2940_v16, %v2938_v15  ;;  %v2978_v15 = vld [vmem:[#allocation10 + $0xbe8] sm:$0xff]  ;;  %v2980_v16 = vld [vmem:[#allocation10 + $0xbf8] sm:$0xff] }
 0x6c7   : > { %6827 = vmatpush1.bf16.msra.mxu0 %v6826_v24  ;;  %v6866_v24 = vpack.c.bf16 %v2939_v21, %v2937_v20  ;;  %v2977_v20 = vld [vmem:[#allocation10 + $0xbe0] sm:$0xff]  ;;  %v2979_v21 = vld [vmem:[#allocation10 + $0xbf0] sm:$0xff] }
 0x6c8   : > { %6829 = vmatprep.subr.bf16.mxu0 %v6828_v25  ;;  %v6868_v25 = vpack.c.bf16 %v2944_v23, %v2942_v22  ;;  %v6906_v22 = vpack.c.bf16 %v2979_v21, %v2977_v20  ;;  %v3125_v23 = vld [vmem:[#allocation11] sm:$0x3]  ;;  %v3392_v21 = vld [vmem:[#allocation14 + $0x2f0] sm:$0xff] }
 0x6c9   : > { %v3390_v20 = vld [vmem:[#allocation14 + $0x2e0] sm:$0xff] }
 0x6cb   : > { %6831 = vmatpush1.bf16.msra.mxu0 %v6830_v31  ;;  %v6870_v31 = vpack.c.bf16 %v2943_v28, %v2941_v27 }
 0x6cc   : > { %6833 = vmatprep.subr.bf16.mxu0 %v6832_v32  ;;  %v6872_v32 = vpack.c.bf16 %v2948_v30, %v2946_v29 }
 0x6cf   : > { %6835 = vmatpush1.bf16.msra.mxu0 %v6834_v37  ;;  %v6874_v37 = vpack.c.bf16 %v2947_v34, %v2945_v33  ;;  %v3363_v33 = vld [vmem:[#allocation14 + $0x208] sm:$0xff]  ;;  %v3365_v34 = vld [vmem:[#allocation14 + $0x218] sm:$0xff] }
 0x6d0   : > { %6837 = vmatprep.subr.bf16.mxu0 %v6836_v40  ;;  %v6876_v40 = vpack.c.bf16 %v2952_v35, %v2950_v2  ;;  %v3145_v35 = vld [vmem:[#allocation13] sm:$0xff] }
 0x6d3   : > { %6839 = vmatpush1.bf16.msra.mxu0 %v6838_v44  ;;  %v6878_v44 = vpack.c.bf16 %v2951_v39, %v2949_v38  ;;  %v3364_v38 = vld [vmem:[#allocation14 + $0x210] sm:$0xff]  ;;  %v3367_v39 = vld [vmem:[#allocation14 + $0x228] sm:$0xff] }
 0x6d4   : > { %6841 = vmatprep.subr.bf16.mxu0 %v6840_v45  ;;  %v6880_v45 = vpack.c.bf16 %v2956_v42, %v2954_v41  ;;  %v3369_v41 = vld [vmem:[#allocation14 + $0x238] sm:$0xff]  ;;  %v3286_v42 = vld [vmem:[#allocation13 + $0x8] sm:$0xff] }
 0x6d7   : > { %6843 = vmatpush1.bf16.msra.mxu0 %v6842_v51  ;;  %v6882_v51 = vpack.c.bf16 %v2955_v47, %v2953_v46  ;;  %v3366_v46 = vld [vmem:[#allocation14 + $0x220] sm:$0xff]  ;;  %v3368_v47 = vld [vmem:[#allocation14 + $0x230] sm:$0xff] }
 0x6d8   : > { %6845 = vmatprep.subr.bf16.mxu0 %v6844_v52  ;;  %v6884_v52 = vpack.c.bf16 %v2960_v49, %v2958_v48  ;;  %v3371_v48 = vld [vmem:[#allocation14 + $0x248] sm:$0xff]  ;;  %v3373_v49 = vld [vmem:[#allocation14 + $0x258] sm:$0xff] }
 0x6da   : > { %3046 = vmatmul.mubr.f32.vlgmr.msra.gmra.mrb[8].mxu0 %v9000_v36  ;;  %v6858_v36 = vpack.c.bf16 %v2931_v9, %v2929_v6  ;;  %v2969_v6 = vld [vmem:[#allocation10 + $0xba0] sm:$0xff]  ;;  %v2971_v9 = vld [vmem:[#allocation10 + $0xbb0] sm:$0xff] }
 0x6db   : > { %6847 = vmatpush1.bf16.msra.mxu0 %v6846_v0  ;;  %3116 = vmatprep.mubr.f32.mxu0 %v9008_v1  ;;  %v2935_v1 = vld [vmem:[#allocation10 + $0xa90] sm:$0xff]  ;;  %v6886_v0 = vpack.c.bf16 %v2959_v54, %v2957_v53  ;;  %v3370_v53 = vld [vmem:[#allocation14 + $0x240] sm:$0xff] }
 0x6dc   : > { %6849 = vmatprep.subr.bf16.mxu0 %v6848_v57  ;;  %v6862_v17 = vpack.c.bf16 %v2935_v1, %v2933_v19  ;;  %v6888_v57 = vpack.c.bf16 %v2964_v56, %v2962_v55  ;;  %v2973_v19 = vld [vmem:[#allocation10 + $0xbc0] sm:$0xff]  ;;  %v2975_v1 = vld [vmem:[#allocation10 + $0xbd0] sm:$0xff] }
 0x6dd   : > { %v3372_v54 = vld [vmem:[#allocation14 + $0x250] sm:$0xff]  ;;  %v3375_v55 = vld [vmem:[#allocation14 + $0x268] sm:$0xff]  ;;  %v3377_v56 = vld [vmem:[#allocation14 + $0x278] sm:$0xff] }
 0x6df   : > { %6851 = vmatpush1.bf16.msra.mxu0 %v6850_v59  ;;  %v6890_v59 = vpack.c.bf16 %v2963_v50, %v2961_v4  ;;  %v3374_v4 = vld [vmem:[#allocation14 + $0x260] sm:$0xff]  ;;  %v3376_v50 = vld [vmem:[#allocation14 + $0x270] sm:$0xff] }
 0x6e0   : > { %6853 = vmatprep.subr.bf16.mxu0 %v6852_v60  ;;  %v6892_v60 = vpack.c.bf16 %v2968_v3, %v2966_v58  ;;  %v3379_v58 = vld [vmem:[#allocation14 + $0x288] sm:$0xff]  ;;  %v3381_v3 = vld [vmem:[#allocation14 + $0x298] sm:$0xff] }
 0x6e3   : > { %6855 = vmatpush1.bf16.msra.mxu0 %v6854_v7  ;;  %v6894_v7 = vpack.c.bf16 %v2967_v62, %v2965_v61  ;;  %v3378_v61 = vld [vmem:[#allocation14 + $0x280] sm:$0xff]  ;;  %v3380_v62 = vld [vmem:[#allocation14 + $0x290] sm:$0xff] }
 0x6e4   : > { %6857 = vmatprep.subr.bf16.mxu0 %v6856_v43  ;;  %v6896_v43 = vpack.c.bf16 %v2972_v5, %v2970_v63  ;;  %v3383_v63 = vld [vmem:[#allocation14 + $0x2a8] sm:$0xff]  ;;  %v3385_v5 = vld [vmem:[#allocation14 + $0x2b8] sm:$0xff] }
 0x6e7   : > { %6859 = vmatpush1.bf16.msra.mxu0 %v6858_v36  ;;  %v6898_v36 = vpack.c.bf16 %v2971_v9, %v2969_v6  ;;  %v3382_v6 = vld [vmem:[#allocation14 + $0x2a0] sm:$0xff]  ;;  %v3384_v9 = vld [vmem:[#allocation14 + $0x2b0] sm:$0xff] }
 0x6e8   : > { %6861 = vmatprep.subr.bf16.mxu0 %v6860_v14  ;;  %v6900_v14 = vpack.c.bf16 %v2976_v12, %v2974_v10  ;;  %v3387_v10 = vld [vmem:[#allocation14 + $0x2c8] sm:$0xff]  ;;  %v3389_v12 = vld [vmem:[#allocation14 + $0x2d8] sm:$0xff] }
 0x6eb   : > { %6863 = vmatpush1.bf16.msra.mxu0 %v6862_v17  ;;  %v6902_v17 = vpack.c.bf16 %v2975_v1, %v2973_v19  ;;  %v3386_v19 = vld [vmem:[#allocation14 + $0x2c0] sm:$0xff]  ;;  %v3388_v1 = vld [vmem:[#allocation14 + $0x2d0] sm:$0xff] }
 0x6ec   : > { %6865 = vmatprep.subr.bf16.mxu0 %v6864_v18  ;;  %v6904_v18 = vpack.c.bf16 %v2980_v16, %v2978_v15  ;;  %v3391_v15 = vld [vmem:[#allocation14 + $0x2e8] sm:$0xff]  ;;  %v3393_v16 = vld [vmem:[#allocation14 + $0x2f8] sm:$0xff] }
 0x6ef   : > { %6867 = vmatpush1.bf16.msra.mxu0 %v6866_v24  ;;  %v3130_v24 = vrot.slane %v3125_v23, %v8970_v8 }
 0x6f0   : > { %6869 = vmatprep.subr.bf16.mxu0 %v6868_v25  ;;  %v3134_v25 = vrot.slane %v3125_v23, %v8972_v11  ;;  %v3397_v23 = vld [vmem:[#allocation14 + $0x318] sm:$0xff] }
 0x6f3   : > { %6871 = vmatpush1.bf16.msra.mxu0 %v6870_v31 }
 0x6f4   : > { %6873 = vmatprep.subr.bf16.mxu0 %v6872_v32 }
 0x6f7   : > { %6875 = vmatpush1.bf16.msra.mxu0 %v6874_v37  ;;  %v6908_v37 = vpack.c.bf16 %v3365_v34, %v3363_v33  ;;  %v3398_v33 = vld [vmem:[#allocation14 + $0x320] sm:$0xff]  ;;  %v3400_v34 = vld [vmem:[#allocation14 + $0x330] sm:$0xff] }
 0x6f8   : > { %6877 = vmatprep.subr.bf16.mxu0 %v6876_v40  ;;  %v3362_v40 = vld [vmem:[#allocation14 + $0x200] sm:$0xff] }
 0x6fb   : > { %6879 = vmatpush1.bf16.msra.mxu0 %v6878_v44  ;;  %v6910_v44 = vpack.c.bf16 %v3364_v38, %v3362_v40  ;;  %v6946_v40 = vpack.c.bf16 %v3400_v34, %v3398_v33  ;;  %v3231_v33 = vld [vmem:[#allocation14 + $0x50] sm:$0xff]  ;;  %v3234_v34 = vld [vmem:[#allocation14 + $0x68] sm:$0xff] }
 0x6fc   : > { %6881 = vmatprep.subr.bf16.mxu0 %v6880_v45  ;;  %v6912_v45 = vpack.c.bf16 %v3369_v41, %v3367_v39  ;;  %v3402_v39 = vld [vmem:[#allocation14 + $0x340] sm:$0xff]  ;;  %v3404_v41 = vld [vmem:[#allocation14 + $0x350] sm:$0xff] }
 0x6ff   : > { %6883 = vmatpush1.bf16.msra.mxu0 %v6882_v51  ;;  %v6914_v51 = vpack.c.bf16 %v3368_v47, %v3366_v46  ;;  %v3406_v47 = vld [vmem:[#allocation14 + $0x360] sm:$0xff] }
 0x700   : > { %6885 = vmatprep.subr.bf16.mxu0 %v6884_v52  ;;  %v6916_v52 = vpack.c.bf16 %v3373_v49, %v3371_v48  ;;  %v3408_v48 = vld [vmem:[#allocation14 + $0x370] sm:$0xff]  ;;  %v3411_v49 = vld [vmem:[#allocation14 + $0x388] sm:$0xff] }
 0x703   : > { %6887 = vmatpush1.bf16.msra.mxu0 %v6886_v0  ;;  %v6918_v0 = vpack.c.bf16 %v3372_v54, %v3370_v53  ;;  %v3410_v54 = vld [vmem:[#allocation14 + $0x380] sm:$0xff] }
 0x704   : > { %6889 = vmatprep.subr.bf16.mxu0 %v6888_v57  ;;  %v6920_v57 = vpack.c.bf16 %v3377_v56, %v3375_v55  ;;  %v3412_v55 = vld [vmem:[#allocation14 + $0x390] sm:$0xff]  ;;  %v3415_v56 = vld [vmem:[#allocation14 + $0x3a8] sm:$0xff] }
 0x707   : > { %6891 = vmatpush1.bf16.msra.mxu0 %v6890_v59  ;;  %v6922_v59 = vpack.c.bf16 %v3376_v50, %v3374_v4  ;;  %v3414_v50 = vld [vmem:[#allocation14 + $0x3a0] sm:$0xff] }
 0x708   : > { %6893 = vmatprep.subr.bf16.mxu0 %v6892_v60  ;;  %v6924_v60 = vpack.c.bf16 %v3381_v3, %v3379_v58  ;;  %v3416_v58 = vld [vmem:[#allocation14 + $0x3b0] sm:$0xff]  ;;  %v3419_v3 = vld [vmem:[#allocation14 + $0x3c8] sm:$0xff] }
 0x70b   : > { %6895 = vmatpush1.bf16.msra.mxu0 %v6894_v7  ;;  %v6926_v7 = vpack.c.bf16 %v3380_v62, %v3378_v61  ;;  %v3418_v62 = vld [vmem:[#allocation14 + $0x3c0] sm:$0xff] }
 0x70c   : > { %6897 = vmatprep.subr.bf16.mxu0 %v6896_v43  ;;  %v6928_v43 = vpack.c.bf16 %v3385_v5, %v3383_v63  ;;  %v3420_v63 = vld [vmem:[#allocation14 + $0x3d0] sm:$0xff] }
 0x70d   : > { %v6966_v5 = vpack.c.bf16 %v3420_v63, %v3418_v62  ;;  %v3251_v62 = vld [vmem:[#allocation14 + $0xf0] sm:$0xff]  ;;  %v3254_v63 = vld [vmem:[#allocation14 + $0x108] sm:$0xff] }
 0x70f   : > { %6899 = vmatpush1.bf16.msra.mxu0 %v6898_v36  ;;  %v6930_v36 = vpack.c.bf16 %v3384_v9, %v3382_v6  ;;  %v3422_v9 = vld [vmem:[#allocation14 + $0x3e0] sm:$0xff] }
 0x710   : > { %6901 = vmatprep.subr.bf16.mxu0 %v6900_v14  ;;  %v6932_v14 = vpack.c.bf16 %v3389_v12, %v3387_v10  ;;  %v3424_v10 = vld [vmem:[#allocation14 + $0x3f0] sm:$0xff] }
 0x711   : > { %v6970_v12 = vpack.c.bf16 %v3424_v10, %v3422_v9  ;;  %v3255_v9 = vld [vmem:[#allocation14 + $0x110] sm:$0xff]  ;;  %v3258_v10 = vld [vmem:[#allocation14 + $0x128] sm:$0xff] }
 0x713   : > { %6903 = vmatpush1.bf16.msra.mxu0 %v6902_v17  ;;  %v6934_v17 = vpack.c.bf16 %v3388_v1, %v3386_v19 }
 0x714   : > { %6905 = vmatprep.subr.bf16.mxu0 %v6904_v18  ;;  %v6936_v18 = vpack.c.bf16 %v3393_v16, %v3391_v15  ;;  %v3221_v16 = vld [vmem:[#allocation14] sm:$0xff] }
 0x717   : > { %6907 = vmatpush1.bf16.msra.mxu0 %v6906_v22  ;;  %v3395_v22 = vld [vmem:[#allocation14 + $0x308] sm:$0xff] }
 0x718   : > { %6130 = vmatprep.subr.mxu0 %v8310_v26 }
 0x71a   : > { %3117 = vmatmul.mubr.f32.vlgmr.msra.gmra.mrb[8].mxu0 %v9006_v13 }
 0x71b   : > { %6132 = vmatprep.mubr.msk.f32.mxu0 %vm8311_vm8, %v8310_v26 }
 0x7ed   : > { %v3118_v27 = vpop.f32.mrb[8].mxu0 }
 0x7ee   : > { %v3137_v28 = vadd.f32 %v3130_v24, %v3118_v27  ;;  %v3120_v29 = vpop.f32.mrb[9].mxu0  ;;  %v6938_v24 = vpack.c.bf16 %v3392_v21, %v3390_v20  ;;  %v3394_v27 = vld [vmem:[#allocation14 + $0x300] sm:$0xff]  ;;  %v3228_v20 = vld [vmem:[#allocation14 + $0x38] sm:$0xff] }
 0x7ef   : > { %v3138_v30 = vadd.f32 %v3134_v25, %v3120_v29  ;;  %v6940_v25 = vpack.c.bf16 %v3397_v23, %v3395_v22  ;;  %v3399_v29 = vld [vmem:[#allocation14 + $0x328] sm:$0xff] }
 0x7f0   : > { %v3141_v31 = vmul.f32 0.2, %v3137_v28  ;;  %vm3139_vm3 = vcmp.ge.f32.partialorder %v3137_v28, 0.0 }
 0x7f1   : > { %v3142_v32 = vmul.f32 0.2, %v3138_v30  ;;  %vm3140_vm4 = vcmp.ge.f32.partialorder %v3138_v30, 0.0 }
 0x7f2   : > { %v9021_v13 = vsel %vm3139_vm3, %v3137_v28, %v3141_v31  ;;  %v3396_v28 = vld [vmem:[#allocation14 + $0x310] sm:$0xff] }
 0x7f3   : > { %v9018_v2 = vsel %vm3140_vm4, %v3138_v30, %v3142_v32  ;;  %v3401_v30 = vld [vmem:[#allocation14 + $0x338] sm:$0xff]  ;;  %v6942_v31 = vpack.c.bf16 %v3396_v28, %v3394_v27  ;;  %v3227_v27 = vld [vmem:[#allocation14 + $0x30] sm:$0xff]  ;;  %v3230_v28 = vld [vmem:[#allocation14 + $0x48] sm:$0xff] }
 0x7f4   : > { %3150 = vmatprep.subr.mxu1 %v9018_v2  ;;  %v6944_v32 = vpack.c.bf16 %v3401_v30, %v3399_v29  ;;  %v3232_v29 = vld [vmem:[#allocation14 + $0x58] sm:$0xff] }
 0x7f5   : > { %3151 = vmatpush1.msra.mxu1 %v9021_v13 }
 0x7f6   : > { %5691 = vmatmul.mubr.msk.f32.vlgmr.msra.gmra.mrb[18].mxu1 %vm3146_vm5, %v3145_v35  ;;  %3290 = vmatprep.subr.mxu1 %v9018_v2  ;;  %v3403_v35 = vld [vmem:[#allocation14 + $0x348] sm:$0xff] }
 0x7f7   : > { %3291 = vmatpush1.msra.mxu1 %v9021_v13  ;;  %3354 = vmatprep.mubr.f32.mxu1 %v8310_v26 }
 0x7f8   : > { %6909 = vmatprep.subr.bf16.mxu1 %v6908_v37  ;;  %v3405_v37 = vld [vmem:[#allocation14 + $0x358] sm:$0xff] }
 0x7f9   : > { %v6948_v38 = vpack.c.bf16 %v3405_v37, %v3403_v35  ;;  %v3236_v35 = vld [vmem:[#allocation14 + $0x78] sm:$0xff] }
 0x7fa   : > { %5692 = vmatmul.mubr.msk.f32.vlgmr.msra.gmra.mrb[20].mxu1 %vm3146_vm5, %v3286_v42  ;;  %v3407_v42 = vld [vmem:[#allocation14 + $0x368] sm:$0xff] }
 0x7fb   : > { %6911 = vmatpush1.bf16.msra.mxu1 %v6910_v44  ;;  %v3409_v44 = vld [vmem:[#allocation14 + $0x378] sm:$0xff] }
 0x7fc   : > { %6913 = vmatprep.subr.bf16.mxu1 %v6912_v45  ;;  %v6950_v45 = vpack.c.bf16 %v3404_v41, %v3402_v39  ;;  %v6952_v46 = vpack.c.bf16 %v3409_v44, %v3407_v42  ;;  %v3235_v39 = vld [vmem:[#allocation14 + $0x70] sm:$0xff]  ;;  %v3238_v41 = vld [vmem:[#allocation14 + $0x88] sm:$0xff]  ;;  %v3240_v42 = vld [vmem:[#allocation14 + $0x98] sm:$0xff] }
 0x7ff   : > { %6915 = vmatpush1.bf16.msra.mxu1 %v6914_v51  ;;  %v3413_v51 = vld [vmem:[#allocation14 + $0x398] sm:$0xff] }
 0x800   : > { %6917 = vmatprep.subr.bf16.mxu1 %v6916_v52  ;;  %v6954_v52 = vpack.c.bf16 %v3408_v48, %v3406_v47  ;;  %v6956_v53 = vpack.c.bf16 %v3413_v51, %v3411_v49  ;;  %v3239_v47 = vld [vmem:[#allocation14 + $0x90] sm:$0xff]  ;;  %v3242_v48 = vld [vmem:[#allocation14 + $0xa8] sm:$0xff]  ;;  %v3244_v49 = vld [vmem:[#allocation14 + $0xb8] sm:$0xff] }
 0x803   : > { %6919 = vmatpush1.bf16.msra.mxu1 %v6918_v0  ;;  %v3417_v0 = vld [vmem:[#allocation14 + $0x3b8] sm:$0xff] }
 0x804   : > { %6921 = vmatprep.subr.bf16.mxu1 %v6920_v57  ;;  %v6958_v57 = vpack.c.bf16 %v3412_v55, %v3410_v54  ;;  %v6960_v4 = vpack.c.bf16 %v3417_v0, %v3415_v56  ;;  %v3243_v54 = vld [vmem:[#allocation14 + $0xb0] sm:$0xff]  ;;  %v3246_v55 = vld [vmem:[#allocation14 + $0xc8] sm:$0xff]  ;;  %v3248_v56 = vld [vmem:[#allocation14 + $0xd8] sm:$0xff] }
 0x807   : > { %6923 = vmatpush1.bf16.msra.mxu1 %v6922_v59  ;;  %v3421_v59 = vld [vmem:[#allocation14 + $0x3d8] sm:$0xff] }
 0x808   : > { %6925 = vmatprep.subr.bf16.mxu1 %v6924_v60  ;;  %v6962_v60 = vpack.c.bf16 %v3416_v58, %v3414_v50  ;;  %v6964_v61 = vpack.c.bf16 %v3421_v59, %v3419_v3  ;;  %v3247_v50 = vld [vmem:[#allocation14 + $0xd0] sm:$0xff]  ;;  %v3250_v58 = vld [vmem:[#allocation14 + $0xe8] sm:$0xff]  ;;  %v3252_v3 = vld [vmem:[#allocation14 + $0xf8] sm:$0xff] }
 0x80b   : > { %6927 = vmatpush1.bf16.msra.mxu1 %v6926_v7  ;;  %v3423_v7 = vld [vmem:[#allocation14 + $0x3e8] sm:$0xff] }
 0x80c   : > { %6929 = vmatprep.subr.bf16.mxu1 %v6928_v43  ;;  %v3425_v43 = vld [vmem:[#allocation14 + $0x3f8] sm:$0xff] }
 0x80d   : > { %v6968_v6 = vpack.c.bf16 %v3425_v43, %v3423_v7 }
 0x80f   : > { %6931 = vmatpush1.bf16.msra.mxu1 %v6930_v36  ;;  %v3222_v36 = vld [vmem:[#allocation14 + $0x8] sm:$0xff] }
 0x810   : > { %6933 = vmatprep.subr.bf16.mxu1 %v6932_v14  ;;  %v3224_v14 = vld [vmem:[#allocation14 + $0x18] sm:$0xff] }
 0x811   : > { %v6972_v19 = vpack.c.bf16 %v3224_v14, %v3222_v36 }
 0x813   : > { %6935 = vmatpush1.bf16.msra.mxu1 %v6934_v17  ;;  %v3223_v17 = vld [vmem:[#allocation14 + $0x10] sm:$0xff] }
 0x814   : > { %6937 = vmatprep.subr.bf16.mxu1 %v6936_v18  ;;  %v3226_v18 = vld [vmem:[#allocation14 + $0x28] sm:$0xff]  ;;  %v6974_v22 = vpack.c.bf16 %v3223_v17, %v3221_v16  ;;  %v3264_v17 = vld [vmem:[#allocation14 + $0x158] sm:$0xff] }
 0x815   : > { %v3262_v16 = vld [vmem:[#allocation14 + $0x148] sm:$0xff] }
 0x817   : > { %6939 = vmatpush1.bf16.msra.mxu1 %v6938_v24  ;;  %v6976_v24 = vpack.c.bf16 %v3228_v20, %v3226_v18  ;;  %v7012_v20 = vpack.c.bf16 %v3264_v17, %v3262_v16  ;;  %v3662_v16 = vld [vmem:[#allocation14 + $0x488] sm:$0xff]  ;;  %v3664_v17 = vld [vmem:[#allocation14 + $0x498] sm:$0xff] }
 0x818   : > { %6941 = vmatprep.subr.bf16.mxu1 %v6940_v25  ;;  %v3225_v25 = vld [vmem:[#allocation14 + $0x20] sm:$0xff] }
 0x819   : > { %v6978_v30 = vpack.c.bf16 %v3227_v27, %v3225_v25 }
 0x81b   : > { %6943 = vmatpush1.bf16.msra.mxu1 %v6942_v31  ;;  %v6980_v31 = vpack.c.bf16 %v3232_v29, %v3230_v28  ;;  %v3265_v28 = vld [vmem:[#allocation14 + $0x160] sm:$0xff]  ;;  %v3267_v29 = vld [vmem:[#allocation14 + $0x170] sm:$0xff] }
 0x81c   : > { %6945 = vmatprep.subr.bf16.mxu1 %v6944_v32  ;;  %v3229_v32 = vld [vmem:[#allocation14 + $0x40] sm:$0xff] }
 0x81d   : > { %v6982_v37 = vpack.c.bf16 %v3231_v33, %v3229_v32  ;;  %v7018_v32 = vpack.c.bf16 %v3267_v29, %v3265_v28  ;;  %v3665_v28 = vld [vmem:[#allocation14 + $0x4a0] sm:$0xff]  ;;  %v3667_v29 = vld [vmem:[#allocation14 + $0x4b0] sm:$0xff] }
 0x81f   : > { %6947 = vmatpush1.bf16.msra.mxu1 %v6946_v40  ;;  %v6984_v40 = vpack.c.bf16 %v3236_v35, %v3234_v34  ;;  %v3269_v34 = vld [vmem:[#allocation14 + $0x180] sm:$0xff]  ;;  %v3271_v35 = vld [vmem:[#allocation14 + $0x190] sm:$0xff] }
 0x820   : > { %6949 = vmatprep.subr.bf16.mxu1 %v6948_v38  ;;  %v3233_v38 = vld [vmem:[#allocation14 + $0x60] sm:$0xff] }
 0x821   : > { %v6986_v44 = vpack.c.bf16 %v3235_v39, %v3233_v38  ;;  %v7022_v38 = vpack.c.bf16 %v3271_v35, %v3269_v34  ;;  %v3669_v34 = vld [vmem:[#allocation14 + $0x4c0] sm:$0xff]  ;;  %v3671_v35 = vld [vmem:[#allocation14 + $0x4d0] sm:$0xff] }
 0x823   : > { %6951 = vmatpush1.bf16.msra.mxu1 %v6950_v45  ;;  %v6988_v45 = vpack.c.bf16 %v3240_v42, %v3238_v41  ;;  %v3273_v41 = vld [vmem:[#allocation14 + $0x1a0] sm:$0xff]  ;;  %v3275_v42 = vld [vmem:[#allocation14 + $0x1b0] sm:$0xff] }
 0x824   : > { %6953 = vmatprep.subr.bf16.mxu1 %v6952_v46  ;;  %v3237_v46 = vld [vmem:[#allocation14 + $0x80] sm:$0xff] }
 0x825   : > { %v6990_v51 = vpack.c.bf16 %v3239_v47, %v3237_v46  ;;  %v7026_v46 = vpack.c.bf16 %v3275_v42, %v3273_v41  ;;  %v3673_v41 = vld [vmem:[#allocation14 + $0x4e0] sm:$0xff]  ;;  %v3675_v42 = vld [vmem:[#allocation14 + $0x4f0] sm:$0xff] }
 0x827   : > { %6955 = vmatpush1.bf16.msra.mxu1 %v6954_v52  ;;  %v6992_v52 = vpack.c.bf16 %v3244_v49, %v3242_v48  ;;  %v3277_v48 = vld [vmem:[#allocation14 + $0x1c0] sm:$0xff]  ;;  %v3279_v49 = vld [vmem:[#allocation14 + $0x1d0] sm:$0xff] }
 0x828   : > { %6957 = vmatprep.subr.bf16.mxu1 %v6956_v53  ;;  %v3241_v53 = vld [vmem:[#allocation14 + $0xa0] sm:$0xff] }
 0x829   : > { %v6994_v0 = vpack.c.bf16 %v3243_v54, %v3241_v53  ;;  %v7030_v53 = vpack.c.bf16 %v3279_v49, %v3277_v48  ;;  %v3677_v48 = vld [vmem:[#allocation14 + $0x500] sm:$0xff]  ;;  %v3679_v49 = vld [vmem:[#allocation14 + $0x510] sm:$0xff] }
 0x82b   : > { %6959 = vmatpush1.bf16.msra.mxu1 %v6958_v57  ;;  %v6996_v57 = vpack.c.bf16 %v3248_v56, %v3246_v55  ;;  %v3281_v55 = vld [vmem:[#allocation14 + $0x1e0] sm:$0xff]  ;;  %v3283_v56 = vld [vmem:[#allocation14 + $0x1f0] sm:$0xff] }
 0x82c   : > { %6961 = vmatprep.subr.bf16.mxu1 %v6960_v4  ;;  %v3245_v4 = vld [vmem:[#allocation14 + $0xc0] sm:$0xff] }
 0x82d   : > { %v6998_v59 = vpack.c.bf16 %v3247_v50, %v3245_v4  ;;  %v3648_v4 = vld [vmem:[#allocation14 + $0x418] sm:$0xff] }
 0x82f   : > { %6963 = vmatpush1.bf16.msra.mxu1 %v6962_v60  ;;  %v7000_v60 = vpack.c.bf16 %v3252_v3, %v3250_v58  ;;  %v3645_v58 = vld [vmem:[#allocation14 + $0x400] sm:$0xff]  ;;  %v3647_v3 = vld [vmem:[#allocation14 + $0x410] sm:$0xff] }
 0x830   : > { %6965 = vmatprep.subr.bf16.mxu1 %v6964_v61  ;;  %v3249_v61 = vld [vmem:[#allocation14 + $0xe0] sm:$0xff] }
 0x831   : > { %v7002_v7 = vpack.c.bf16 %v3251_v62, %v3249_v61  ;;  %v3569_v61 = vld [vmem:[#allocation13 + $0x10] sm:$0xff]  ;;  %v7038_v62 = vpack.c.bf16 %v3647_v3, %v3645_v58  ;;  %v3685_v58 = vld [vmem:[#allocation14 + $0x540] sm:$0xff]  ;;  %v3687_v3 = vld [vmem:[#allocation14 + $0x550] sm:$0xff] }
 0x833   : > { %6967 = vmatpush1.bf16.msra.mxu1 %v6966_v5  ;;  %v3256_v5 = vld [vmem:[#allocation14 + $0x118] sm:$0xff] }
 0x834   : > { %6969 = vmatprep.subr.bf16.mxu1 %v6968_v6  ;;  %v7004_v43 = vpack.c.bf16 %v3256_v5, %v3254_v63  ;;  %v3253_v6 = vld [vmem:[#allocation14 + $0x100] sm:$0xff] }
 0x835   : > { %v7006_v36 = vpack.c.bf16 %v3255_v9, %v3253_v6  ;;  %v3649_v5 = vld [vmem:[#allocation14 + $0x420] sm:$0xff]  ;;  %v3656_v6 = vld [vmem:[#allocation14 + $0x458] sm:$0xff] }
 0x837   : > { %6971 = vmatpush1.bf16.msra.mxu1 %v6970_v12  ;;  %v3260_v12 = vld [vmem:[#allocation14 + $0x138] sm:$0xff] }
 0x838   : > { %6973 = vmatprep.subr.bf16.mxu1 %v6972_v19  ;;  %v7008_v14 = vpack.c.bf16 %v3260_v12, %v3258_v10  ;;  %v3257_v19 = vld [vmem:[#allocation14 + $0x120] sm:$0xff]  ;;  %v3658_v12 = vld [vmem:[#allocation14 + $0x468] sm:$0xff] }
 0x839   : > { %v3653_v10 = vld [vmem:[#allocation14 + $0x440] sm:$0xff] }
 0x8c9   : > { %v9029_v1 = vpop.f32.mrb[18].mxu1 }
 0x8ca   : > { %v3218_v15 = vpop.f32.mrb[19].mxu1 }
 0x8cd   : > { %v3356_v21 = vpop.f32.mrb[20].mxu1 }
 0x8ce   : > { %v3358_v23 = vpop.f32.mrb[21].mxu1 }
 0x8cf   : > { %3490 = vmatprep.mubr.f32.mxu1 %v3358_v23  ;;  %v3266_v23 = vld [vmem:[#allocation14 + $0x168] sm:$0xff] }
 0x8d0   : > { %3491 = vmatmul.mubr.f32.vlgmr.msra.gmra.mrb[22].mxu1 %v3356_v21  ;;  %v3261_v21 = vld [vmem:[#allocation14 + $0x140] sm:$0xff] }
 0x8d1   : > { %6975 = vmatpush1.bf16.msra.mxu1 %v6974_v22  ;;  %3561 = vmatprep.mubr.f32.mxu1 %v3218_v15  ;;  %v3259_v15 = vld [vmem:[#allocation14 + $0x130] sm:$0xff] }
 0x8d2   : > { %6977 = vmatprep.subr.bf16.mxu1 %v6976_v24  ;;  %v7010_v18 = vpack.c.bf16 %v3259_v15, %v3257_v19  ;;  %v3263_v22 = vld [vmem:[#allocation14 + $0x150] sm:$0xff]  ;;  %v3268_v24 = vld [vmem:[#allocation14 + $0x178] sm:$0xff]  ;;  %v3657_v19 = vld [vmem:[#allocation14 + $0x460] sm:$0xff] }
 0x8d3   : > { %v7014_v25 = vpack.c.bf16 %v3263_v22, %v3261_v21  ;;  %v7016_v27 = vpack.c.bf16 %v3268_v24, %v3266_v23  ;;  %v3659_v15 = vld [vmem:[#allocation14 + $0x470] sm:$0xff]  ;;  %v3661_v21 = vld [vmem:[#allocation14 + $0x480] sm:$0xff]  ;;  %v3666_v23 = vld [vmem:[#allocation14 + $0x4a8] sm:$0xff] }
 0x8d4   : > { %v3663_v22 = vld [vmem:[#allocation14 + $0x490] sm:$0xff]  ;;  %v3668_v24 = vld [vmem:[#allocation14 + $0x4b8] sm:$0xff] }
 0x8d5   : > { %6979 = vmatpush1.bf16.msra.mxu1 %v6978_v30  ;;  %v3270_v30 = vld [vmem:[#allocation14 + $0x188] sm:$0xff] }
 0x8d6   : > { %6981 = vmatprep.subr.bf16.mxu1 %v6980_v31  ;;  %v3272_v31 = vld [vmem:[#allocation14 + $0x198] sm:$0xff] }
 0x8d7   : > { %v7020_v33 = vpack.c.bf16 %v3272_v31, %v3270_v30  ;;  %v3670_v30 = vld [vmem:[#allocation14 + $0x4c8] sm:$0xff]  ;;  %v3672_v31 = vld [vmem:[#allocation14 + $0x4d8] sm:$0xff] }
 0x8d9   : > { %6983 = vmatpush1.bf16.msra.mxu1 %v6982_v37  ;;  %v3274_v37 = vld [vmem:[#allocation14 + $0x1a8] sm:$0xff] }
 0x8da   : > { %6985 = vmatprep.subr.bf16.mxu1 %v6984_v40  ;;  %v3276_v40 = vld [vmem:[#allocation14 + $0x1b8] sm:$0xff] }
 0x8db   : > { %v7024_v39 = vpack.c.bf16 %v3276_v40, %v3274_v37  ;;  %v3674_v37 = vld [vmem:[#allocation14 + $0x4e8] sm:$0xff]  ;;  %v3676_v40 = vld [vmem:[#allocation14 + $0x4f8] sm:$0xff] }
 0x8dd   : > { %6987 = vmatpush1.bf16.msra.mxu1 %v6986_v44  ;;  %v3278_v44 = vld [vmem:[#allocation14 + $0x1c8] sm:$0xff] }
 0x8de   : > { %6989 = vmatprep.subr.bf16.mxu1 %v6988_v45  ;;  %v3280_v45 = vld [vmem:[#allocation14 + $0x1d8] sm:$0xff] }
 0x8df   : > { %v7028_v47 = vpack.c.bf16 %v3280_v45, %v3278_v44  ;;  %v3678_v44 = vld [vmem:[#allocation14 + $0x508] sm:$0xff]  ;;  %v3680_v45 = vld [vmem:[#allocation14 + $0x518] sm:$0xff] }
 0x8e1   : > { %6991 = vmatpush1.bf16.msra.mxu1 %v6990_v51  ;;  %v3282_v51 = vld [vmem:[#allocation14 + $0x1e8] sm:$0xff] }
 0x8e2   : > { %6993 = vmatprep.subr.bf16.mxu1 %v6992_v52  ;;  %v3284_v52 = vld [vmem:[#allocation14 + $0x1f8] sm:$0xff] }
 0x8e3   : > { %v7032_v54 = vpack.c.bf16 %v3284_v52, %v3282_v51  ;;  %v3682_v51 = vld [vmem:[#allocation14 + $0x528] sm:$0xff]  ;;  %v3684_v52 = vld [vmem:[#allocation14 + $0x538] sm:$0xff] }
 0x8e5   : > { %6995 = vmatpush1.bf16.msra.mxu1 %v6994_v0  ;;  %v7034_v0 = vpack.c.bf16 %v3283_v56, %v3281_v55  ;;  %v3681_v55 = vld [vmem:[#allocation14 + $0x520] sm:$0xff]  ;;  %v3683_v56 = vld [vmem:[#allocation14 + $0x530] sm:$0xff] }
 0x8e6   : > { %6997 = vmatprep.subr.bf16.mxu1 %v6996_v57  ;;  %v3646_v57 = vld [vmem:[#allocation14 + $0x408] sm:$0xff] }
 0x8e7   : > { %v7036_v50 = vpack.c.bf16 %v3648_v4, %v3646_v57  ;;  %v3688_v57 = vld [vmem:[#allocation14 + $0x558] sm:$0xff]  ;;  %v7074_v4 = vpack.c.bf16 %v3683_v56, %v3681_v55  ;;  %v3989_v56 = vld [vmem:[#allocation19 + $0x118] sm:$0xff] }
 0x8e8   : > { %v3988_v55 = vld [vmem:[#allocation19 + $0x110] sm:$0xff] }
 0x8e9   : > { %6999 = vmatpush1.bf16.msra.mxu1 %v6998_v59  ;;  %v3650_v59 = vld [vmem:[#allocation14 + $0x428] sm:$0xff] }
 0x8ea   : > { %7001 = vmatprep.subr.bf16.mxu1 %v7000_v60  ;;  %v3652_v60 = vld [vmem:[#allocation14 + $0x438] sm:$0xff] }
 0x8eb   : > { %v7040_v63 = vpack.c.bf16 %v3652_v60, %v3650_v59  ;;  %v3690_v59 = vld [vmem:[#allocation14 + $0x568] sm:$0xff]  ;;  %v3692_v60 = vld [vmem:[#allocation14 + $0x578] sm:$0xff] }
 0x8ed   : > { %7003 = vmatpush1.bf16.msra.mxu1 %v7002_v7  ;;  %v3651_v7 = vld [vmem:[#allocation14 + $0x430] sm:$0xff] }
 0x8ee   : > { %7005 = vmatprep.subr.bf16.mxu1 %v7004_v43  ;;  %v3654_v43 = vld [vmem:[#allocation14 + $0x448] sm:$0xff] }
 0x8ef   : > { %v7044_v9 = vpack.c.bf16 %v3656_v6, %v3654_v43  ;;  %v3696_v43 = vld [vmem:[#allocation14 + $0x598] sm:$0xff] }
 0x8f1   : > { %7007 = vmatpush1.bf16.msra.mxu1 %v7006_v36 }
 0x8f2   : > { %7009 = vmatprep.subr.bf16.mxu1 %v7008_v14 }
 0x8f5   : > { %7011 = vmatpush1.bf16.msra.mxu1 %v7010_v18  ;;  %v7050_v18 = vpack.c.bf16 %v3659_v15, %v3657_v19  ;;  %v3699_v19 = vld [vmem:[#allocation14 + $0x5b0] sm:$0xff]  ;;  %v3702_v15 = vld [vmem:[#allocation14 + $0x5c8] sm:$0xff] }
 0x8f6   : > { %7013 = vmatprep.subr.bf16.mxu1 %v7012_v20  ;;  %v7052_v20 = vpack.c.bf16 %v3664_v17, %v3662_v16  ;;  %v3704_v16 = vld [vmem:[#allocation14 + $0x5d8] sm:$0xff] }
 0x8f9   : > { %7015 = vmatpush1.bf16.msra.mxu1 %v7014_v25  ;;  %v7054_v25 = vpack.c.bf16 %v3663_v22, %v3661_v21  ;;  %v3703_v21 = vld [vmem:[#allocation14 + $0x5d0] sm:$0xff]  ;;  %v3706_v22 = vld [vmem:[#allocation14 + $0x5e8] sm:$0xff] }
 0x8fa   : > { %7017 = vmatprep.subr.bf16.mxu1 %v7016_v27  ;;  %v7056_v27 = vpack.c.bf16 %v3668_v24, %v3666_v23  ;;  %v3708_v23 = vld [vmem:[#allocation14 + $0x5f8] sm:$0xff] }
 0x8fd   : > { %7019 = vmatpush1.bf16.msra.mxu1 %v7018_v32  ;;  %v7058_v32 = vpack.c.bf16 %v3667_v29, %v3665_v28  ;;  %v3707_v28 = vld [vmem:[#allocation14 + $0x5f0] sm:$0xff] }
 0x8fe   : > { %7021 = vmatprep.subr.bf16.mxu1 %v7020_v33  ;;  %v7060_v33 = vpack.c.bf16 %v3672_v31, %v3670_v30 }
 0x901   : > { %7023 = vmatpush1.bf16.msra.mxu1 %v7022_v38  ;;  %v7062_v38 = vpack.c.bf16 %v3671_v35, %v3669_v34 }
 0x902   : > { %7025 = vmatprep.subr.bf16.mxu1 %v7024_v39  ;;  %v7064_v39 = vpack.c.bf16 %v3676_v40, %v3674_v37 }
 0x905   : > { %7027 = vmatpush1.bf16.msra.mxu1 %v7026_v46  ;;  %v7066_v46 = vpack.c.bf16 %v3675_v42, %v3673_v41  ;;  %v4002_v42 = vld [vmem:[#allocation19 + $0x180] sm:$0xff] }
 0x906   : > { %7029 = vmatprep.subr.bf16.mxu1 %v7028_v47  ;;  %v7068_v47 = vpack.c.bf16 %v3680_v45, %v3678_v44  ;;  %v4003_v44 = vld [vmem:[#allocation19 + $0x188] sm:$0xff] }
 0x909   : > { %7031 = vmatpush1.bf16.msra.mxu1 %v7030_v53  ;;  %v7070_v53 = vpack.c.bf16 %v3679_v49, %v3677_v48  ;;  %v3986_v48 = vld [vmem:[#allocation19 + $0x100] sm:$0xff]  ;;  %v4004_v49 = vld [vmem:[#allocation19 + $0x190] sm:$0xff] }
 0x90a   : > { %7033 = vmatprep.subr.bf16.mxu1 %v7032_v54  ;;  %v7072_v54 = vpack.c.bf16 %v3684_v52, %v3682_v51  ;;  %v4005_v51 = vld [vmem:[#allocation19 + $0x198] sm:$0xff] }
 0x90b   : > { %v3910_v52 = vld [vmem:[#allocation17 + $0x4] sm:$0xf] }
 0x90d   : > { %7035 = vmatpush1.bf16.msra.mxu1 %v7034_v0  ;;  %v3686_v0 = vld [vmem:[#allocation14 + $0x548] sm:$0xff] }
 0x90e   : > { %3573 = vmatprep.subr.mxu1 %v9018_v2  ;;  %v7042_v2 = vpack.c.bf16 %v3651_v7, %v3649_v5  ;;  %v3691_v5 = vld [vmem:[#allocation14 + $0x570] sm:$0xff]  ;;  %v3694_v7 = vld [vmem:[#allocation14 + $0x588] sm:$0xff] }
 0x910   : > { %3562 = vmatmul.mubr.f32.vlgmr.msra.gmra.mrb[22].mxu1 %v9029_v1  ;;  %v3655_v1 = vld [vmem:[#allocation14 + $0x450] sm:$0xff] }
 0x911   : > { %3574 = vmatpush1.msra.mxu1 %v9021_v13  ;;  %3637 = vmatprep.mubr.f32.mxu1 %v8310_v26  ;;  %v3660_v13 = vld [vmem:[#allocation14 + $0x478] sm:$0xff]  ;;  %v7046_v36 = vpack.c.bf16 %v3655_v1, %v3653_v10  ;;  %v3695_v10 = vld [vmem:[#allocation14 + $0x590] sm:$0xff]  ;;  %v3698_v1 = vld [vmem:[#allocation14 + $0x5a8] sm:$0xff] }
 0x912   : > { %7037 = vmatprep.subr.bf16.mxu1 %v7036_v50  ;;  %v7048_v14 = vpack.c.bf16 %v3660_v13, %v3658_v12  ;;  %v7076_v50 = vpack.c.bf16 %v3688_v57, %v3686_v0  ;;  %v3700_v12 = vld [vmem:[#allocation14 + $0x5b8] sm:$0xff]  ;;  %v4006_v0 = vld [vmem:[#allocation19 + $0x1a0] sm:$0xff] }
 0x913   : > { %v4007_v57 = vld [vmem:[#allocation19 + $0x1a8] sm:$0xff] }
 0x914   : > { %5693 = vmatmul.mubr.msk.f32.vlgmr.msra.gmra.mrb[24].mxu1 %vm3146_vm5, %v3569_v61  ;;  %v7078_v61 = vpack.c.bf16 %v3687_v3, %v3685_v58  ;;  %v3990_v58 = vld [vmem:[#allocation19 + $0x120] sm:$0xff]  ;;  %v3991_v3 = vld [vmem:[#allocation19 + $0x128] sm:$0xff] }
 0x915   : > { %7039 = vmatpush1.bf16.msra.mxu1 %v7038_v62  ;;  %v7080_v62 = vpack.c.bf16 %v3692_v60, %v3690_v59  ;;  %v4008_v59 = vld [vmem:[#allocation19 + $0x1b0] sm:$0xff]  ;;  %v4009_v60 = vld [vmem:[#allocation19 + $0x1b8] sm:$0xff] }
 0x916   : > { %7041 = vmatprep.subr.bf16.mxu1 %v7040_v63  ;;  %v3689_v63 = vld [vmem:[#allocation14 + $0x560] sm:$0xff] }
 0x917   : > { %v7082_v6 = vpack.c.bf16 %v3691_v5, %v3689_v63  ;;  %v3992_v63 = vld [vmem:[#allocation19 + $0x130] sm:$0xff]  ;;  %v3993_v5 = vld [vmem:[#allocation19 + $0x138] sm:$0xff] }
 0x919   : > { %7043 = vmatpush1.bf16.msra.mxu1 %v7042_v2  ;;  %v7084_v2 = vpack.c.bf16 %v3696_v43, %v3694_v7  ;;  %v4010_v7 = vld [vmem:[#allocation19 + $0x1c0] sm:$0xff]  ;;  %v4011_v43 = vld [vmem:[#allocation19 + $0x1c8] sm:$0xff] }
 0x91a   : > { %7045 = vmatprep.subr.bf16.mxu1 %v7044_v9  ;;  %v3693_v9 = vld [vmem:[#allocation14 + $0x580] sm:$0xff] }
 0x91b   : > { %v7086_v13 = vpack.c.bf16 %v3695_v10, %v3693_v9  ;;  %v3994_v9 = vld [vmem:[#allocation19 + $0x140] sm:$0xff]  ;;  %v3995_v10 = vld [vmem:[#allocation19 + $0x148] sm:$0xff] }
 0x91d   : > { %7047 = vmatpush1.bf16.msra.mxu1 %v7046_v36  ;;  %v7088_v36 = vpack.c.bf16 %v3700_v12, %v3698_v1  ;;  %v4012_v1 = vld [vmem:[#allocation19 + $0x1d0] sm:$0xff]  ;;  %v4013_v12 = vld [vmem:[#allocation19 + $0x1d8] sm:$0xff] }
 0x91e   : > { %7049 = vmatprep.subr.bf16.mxu1 %v7048_v14  ;;  %v3697_v14 = vld [vmem:[#allocation14 + $0x5a0] sm:$0xff] }
 0x91f   : > { %v7090_v17 = vpack.c.bf16 %v3699_v19, %v3697_v14  ;;  %v3996_v14 = vld [vmem:[#allocation19 + $0x150] sm:$0xff]  ;;  %v3997_v19 = vld [vmem:[#allocation19 + $0x158] sm:$0xff] }
 0x921   : > { %7051 = vmatpush1.bf16.msra.mxu1 %v7050_v18  ;;  %v7092_v18 = vpack.c.bf16 %v3704_v16, %v3702_v15  ;;  %v4014_v15 = vld [vmem:[#allocation19 + $0x1e0] sm:$0xff]  ;;  %v4015_v16 = vld [vmem:[#allocation19 + $0x1e8] sm:$0xff] }
 0x922   : > { %7053 = vmatprep.subr.bf16.mxu1 %v7052_v20  ;;  %v3701_v20 = vld [vmem:[#allocation14 + $0x5c0] sm:$0xff] }
 0x923   : > { %v7094_v24 = vpack.c.bf16 %v3703_v21, %v3701_v20  ;;  %v3998_v20 = vld [vmem:[#allocation19 + $0x160] sm:$0xff]  ;;  %v3999_v21 = vld [vmem:[#allocation19 + $0x168] sm:$0xff] }
 0x925   : > { %7055 = vmatpush1.bf16.msra.mxu1 %v7054_v25  ;;  %v7096_v25 = vpack.c.bf16 %v3708_v23, %v3706_v22  ;;  %v7126_v22 = vpack.c.bf16 %v3999_v21, %v3998_v20  ;;  %v4016_v23 = vld [vmem:[#allocation19 + $0x1f0] sm:$0xff]  ;;  %v4159_v20 = vld [vmem:[#allocation17 + $0x8] sm:$0xf]  ;;  %v4251_v21 = vld [vmem:[#allocation19 + $0x280] sm:$0xff] }
 0x926   : > { %7057 = vmatprep.subr.bf16.mxu1 %v7056_v27  ;;  %v3705_v27 = vld [vmem:[#allocation14 + $0x5e0] sm:$0xff] }
 0x927   : > { %v7098_v29 = vpack.c.bf16 %v3707_v28, %v3705_v27  ;;  %v4000_v27 = vld [vmem:[#allocation19 + $0x170] sm:$0xff]  ;;  %v4001_v28 = vld [vmem:[#allocation19 + $0x178] sm:$0xff] }
 0x929   : > { %7059 = vmatpush1.bf16.msra.mxu1 %v7058_v32  ;;  %v3782_v32 = vld [vmem:[#allocation16] sm:$0x3] }
 0x92a   : > { %7061 = vmatprep.subr.bf16.mxu1 %v7060_v33  ;;  %v3787_v33 = vrot.slane %v3782_v32, %v8970_v8  ;;  %v3791_v34 = vrot.slane %v3782_v32, %v8972_v11  ;;  %v7100_v8 = vpack.c.bf16 %v4003_v44, %v4002_v42  ;;  %v3987_v11 = vld [vmem:[#allocation19 + $0x108] sm:$0xff] }
 0x92d   : > { %7063 = vmatpush1.bf16.msra.mxu1 %v7062_v38 }
 0x92e   : > { %7065 = vmatprep.subr.bf16.mxu1 %v7064_v39 }
 0x931   : > { %7067 = vmatpush1.bf16.msra.mxu1 %v7066_v46  ;;  %v3802_v46 = vld [vmem:[#allocation17] sm:$0xf] }
 0x932   : > { %7069 = vmatprep.subr.bf16.mxu1 %v7068_v47 }
 0x935   : > { %7071 = vmatpush1.bf16.msra.mxu1 %v7070_v53  ;;  %v7102_v53 = vpack.c.bf16 %v3987_v11, %v3986_v48  ;;  %v3897_v48 = vld [vmem:[#allocation19 + $0xa0] sm:$0xff]  ;;  %v3898_v11 = vld [vmem:[#allocation19 + $0xa8] sm:$0xff] }
 0x936   : > { %7073 = vmatprep.subr.bf16.mxu1 %v7072_v54  ;;  %v7104_v54 = vpack.c.bf16 %v4005_v51, %v4004_v49  ;;  %v7140_v51 = vpack.c.bf16 %v3898_v11, %v3897_v48 }
 0x939   : > { %7075 = vmatpush1.bf16.msra.mxu1 %v7074_v4  ;;  %v7106_v4 = vpack.c.bf16 %v3989_v56, %v3988_v55  ;;  %v3900_v55 = vld [vmem:[#allocation19 + $0xb8] sm:$0xff] }
 0x93a   : > { %7077 = vmatprep.subr.bf16.mxu1 %v7076_v50  ;;  %v7108_v50 = vpack.c.bf16 %v4007_v57, %v4006_v0  ;;  %v3883_v57 = vld [vmem:[#allocation19 + $0x30] sm:$0xff] }
 0x93d   : > { %7079 = vmatpush1.bf16.msra.mxu1 %v7078_v61  ;;  %v7110_v61 = vpack.c.bf16 %v3991_v3, %v3990_v58  ;;  %v3902_v58 = vld [vmem:[#allocation19 + $0xc8] sm:$0xff] }
 0x93e   : > { %7081 = vmatprep.subr.bf16.mxu1 %v7080_v62  ;;  %v7112_v62 = vpack.c.bf16 %v4009_v60, %v4008_v59  ;;  %v3885_v60 = vld [vmem:[#allocation19 + $0x40] sm:$0xff] }
 0x941   : > { %7083 = vmatpush1.bf16.msra.mxu1 %v7082_v6  ;;  %v7114_v6 = vpack.c.bf16 %v3993_v5, %v3992_v63  ;;  %v3904_v63 = vld [vmem:[#allocation19 + $0xd8] sm:$0xff] }
 0x942   : > { %7085 = vmatprep.subr.bf16.mxu1 %v7084_v2  ;;  %v7116_v2 = vpack.c.bf16 %v4011_v43, %v4010_v7  ;;  %v3887_v43 = vld [vmem:[#allocation19 + $0x50] sm:$0xff] }
 0x945   : > { %7087 = vmatpush1.bf16.msra.mxu1 %v7086_v13  ;;  %v7118_v13 = vpack.c.bf16 %v3995_v10, %v3994_v9  ;;  %v3906_v9 = vld [vmem:[#allocation19 + $0xe8] sm:$0xff] }
 0x946   : > { %7089 = vmatprep.subr.bf16.mxu1 %v7088_v36  ;;  %v7120_v36 = vpack.c.bf16 %v4013_v12, %v4012_v1  ;;  %v3889_v12 = vld [vmem:[#allocation19 + $0x60] sm:$0xff] }
 0x949   : > { %7091 = vmatpush1.bf16.msra.mxu1 %v7090_v17  ;;  %v7122_v17 = vpack.c.bf16 %v3997_v19, %v3996_v14  ;;  %v3908_v14 = vld [vmem:[#allocation19 + $0xf8] sm:$0xff] }
 0x94a   : > { %7093 = vmatprep.subr.bf16.mxu1 %v7092_v18  ;;  %v7124_v18 = vpack.c.bf16 %v4015_v16, %v4014_v15  ;;  %v3891_v16 = vld [vmem:[#allocation19 + $0x70] sm:$0xff] }
 0x94d   : > { %7095 = vmatpush1.bf16.msra.mxu1 %v7094_v24  ;;  %v4017_v24 = vld [vmem:[#allocation19 + $0x1f8] sm:$0xff] }
 0x94e   : > { %7097 = vmatprep.subr.bf16.mxu1 %v7096_v25  ;;  %v7128_v25 = vpack.c.bf16 %v4017_v24, %v4016_v23  ;;  %v4235_v23 = vld [vmem:[#allocation19 + $0x200] sm:$0xff] }
 0x951   : > { %7099 = vmatpush1.bf16.msra.mxu1 %v7098_v29  ;;  %v7130_v29 = vpack.c.bf16 %v4001_v28, %v4000_v27  ;;  %v4253_v27 = vld [vmem:[#allocation19 + $0x290] sm:$0xff]  ;;  %v4254_v28 = vld [vmem:[#allocation19 + $0x298] sm:$0xff] }
 0x9e7   : > { %v3639_v30 = vpop.f32.mrb[24].mxu1 }
 0x9e8   : > { %v3641_v31 = vpop.f32.mrb[25].mxu1 }
 0x9e9   : > { %3773 = vmatprep.mubr.f32.mxu1 %v3641_v31  ;;  %v3894_v31 = vld [vmem:[#allocation19 + $0x88] sm:$0xff] }
 0x9ea   : > { %3774 = vmatmul.mubr.f32.vlgmr.msra.gmra.mrb[22].mxu1 %v3639_v30  ;;  %v3893_v30 = vld [vmem:[#allocation19 + $0x80] sm:$0xff] }
 0x9eb   : > { %3870 = vmatprep.mubr.f32.mxu1 %v8310_v26  ;;  %v7132_v32 = vpack.c.bf16 %v3894_v31, %v3893_v30  ;;  %v7168_v30 = vpack.c.bf16 %v4254_v28, %v4253_v27  ;;  %v4237_v31 = vld [vmem:[#allocation19 + $0x210] sm:$0xff]  ;;  %v4677_v27 = vld [vmem:[#allocation22 + $0x8] sm:$0xf]  ;;  %v4445_v28 = vld [vmem:[#allocation22 + $0x4] sm:$0xf] }
 0xabd   : > { %v3775_v35 = vpop.f32.mrb[22].mxu1 }
 0xabe   : > { %v3794_v37 = vadd.f32 %v3787_v33, %v3775_v35  ;;  %v3777_v40 = vpop.f32.mrb[23].mxu1  ;;  %v3877_v35 = vld [vmem:[#allocation19] sm:$0xff] }
 0xabf   : > { %v3795_v38 = vadd.f32 %v3791_v34, %v3777_v40  ;;  %v3895_v40 = vld [vmem:[#allocation19 + $0x90] sm:$0xff] }
 0xac0   : > { %v3798_v39 = vmul.f32 0.2, %v3794_v37  ;;  %vm3796_vm6 = vcmp.ge.f32.partialorder %v3794_v37, 0.0 }
 0xac1   : > { %v3799_v41 = vmul.f32 0.2, %v3795_v38  ;;  %vm3797_vm7 = vcmp.ge.f32.partialorder %v3795_v38, 0.0 }
 0xac2   : > { %v9042_v47 = vsel %vm3796_vm6, %v3794_v37, %v3798_v39  ;;  %v3878_v37 = vld [vmem:[#allocation19 + $0x8] sm:$0xff] }
 0xac3   : > { %v9039_v45 = vsel %vm3797_vm7, %v3795_v38, %v3799_v41  ;;  %v3896_v38 = vld [vmem:[#allocation19 + $0x98] sm:$0xff]  ;;  %v7134_v41 = vpack.c.bf16 %v3878_v37, %v3877_v35  ;;  %v4239_v35 = vld [vmem:[#allocation19 + $0x220] sm:$0xff]  ;;  %v4240_v37 = vld [vmem:[#allocation19 + $0x228] sm:$0xff] }
 0xac4   : > { %3806 = vmatprep.subr.mxu1 %v9039_v45  ;;  %v7136_v44 = vpack.c.bf16 %v3896_v38, %v3895_v40  ;;  %v4257_v40 = vld [vmem:[#allocation19 + $0x2b0] sm:$0xff]  ;;  %v4258_v38 = vld [vmem:[#allocation19 + $0x2b8] sm:$0xff] }
 0xac5   : > { %3807 = vmatpush1.msra.mxu1 %v9042_v47 }
 0xac6   : > { %5694 = vmatmul.mubr.msk.f32.vlgmr.msra.gmra.mrb[26].mxu1 %vm3146_vm5, %v3802_v46  ;;  %3914 = vmatprep.subr.mxu1 %v9039_v45  ;;  %v3879_v46 = vld [vmem:[#allocation19 + $0x10] sm:$0xff] }
 0xac7   : > { %3915 = vmatpush1.msra.mxu1 %v9042_v47  ;;  %3978 = vmatprep.mubr.f32.mxu1 %v8310_v26 }
 0xac8   : > { %7101 = vmatprep.subr.bf16.mxu1 %v7100_v8  ;;  %v3880_v8 = vld [vmem:[#allocation19 + $0x18] sm:$0xff] }
 0xac9   : > { %v7138_v49 = vpack.c.bf16 %v3880_v8, %v3879_v46  ;;  %v4259_v46 = vld [vmem:[#allocation19 + $0x2c0] sm:$0xff]  ;;  %v4260_v8 = vld [vmem:[#allocation19 + $0x2c8] sm:$0xff] }
 0xaca   : > { %5695 = vmatmul.mubr.msk.f32.vlgmr.msra.gmra.mrb[28].mxu1 %vm3146_vm5, %v3910_v52  ;;  %v3881_v52 = vld [vmem:[#allocation19 + $0x20] sm:$0xff]  ;;  %v7180_v11 = vpack.c.bf16 %v4260_v8, %v4259_v46  ;;  %v4532_v8 = vld [vmem:[#allocation23 + $0xe0] sm:$0xff] }
 0xacb   : > { %7103 = vmatpush3.bf16.msra.mxu1 %v7102_v53  ;;  %v3882_v53 = vld [vmem:[#allocation19 + $0x28] sm:$0xff] }
 0xacc   : > { %7105 = vmatprep.subr.bf16.mxu1 %v7104_v54  ;;  %v3899_v54 = vld [vmem:[#allocation19 + $0xb0] sm:$0xff]  ;;  %v7142_v56 = vpack.c.bf16 %v3882_v53, %v3881_v52  ;;  %v4262_v53 = vld [vmem:[#allocation19 + $0x2d8] sm:$0xff] }
 0xacd   : > { %v7144_v0 = vpack.c.bf16 %v3900_v55, %v3899_v54  ;;  %v4261_v52 = vld [vmem:[#allocation19 + $0x2d0] sm:$0xff] }
 0xace   : > { %v7184_v55 = vpack.c.bf16 %v4262_v53, %v4261_v52  ;;  %v4752_v53 = vld [vmem:[#allocation23 + $0x100] sm:$0xff] }
 0xacf   : > { %7107 = vmatpush3.bf16.msra.mxu1 %v7106_v4  ;;  %v3884_v4 = vld [vmem:[#allocation19 + $0x38] sm:$0xff] }
 0xad0   : > { %7109 = vmatprep.subr.bf16.mxu1 %v7108_v50  ;;  %v3901_v50 = vld [vmem:[#allocation19 + $0xc0] sm:$0xff]  ;;  %v7146_v3 = vpack.c.bf16 %v3884_v4, %v3883_v57  ;;  %v4264_v4 = vld [vmem:[#allocation19 + $0x2e8] sm:$0xff] }
 0xad1   : > { %v7148_v59 = vpack.c.bf16 %v3902_v58, %v3901_v50  ;;  %v4263_v57 = vld [vmem:[#allocation19 + $0x2e0] sm:$0xff] }
 0xad2   : > { %v7188_v58 = vpack.c.bf16 %v4264_v4, %v4263_v57  ;;  %v4756_v4 = vld [vmem:[#allocation23 + $0x120] sm:$0xff] }
 0xad3   : > { %7111 = vmatpush3.bf16.msra.mxu1 %v7110_v61  ;;  %v3886_v61 = vld [vmem:[#allocation19 + $0x48] sm:$0xff] }
 0xad4   : > { %7113 = vmatprep.subr.bf16.mxu1 %v7112_v62  ;;  %v3903_v62 = vld [vmem:[#allocation19 + $0xd0] sm:$0xff]  ;;  %v7150_v5 = vpack.c.bf16 %v3886_v61, %v3885_v60 }
 0xad5   : > { %v7152_v7 = vpack.c.bf16 %v3904_v63, %v3903_v62  ;;  %v4265_v61 = vld [vmem:[#allocation19 + $0x2f0] sm:$0xff]  ;;  %v4266_v62 = vld [vmem:[#allocation19 + $0x2f8] sm:$0xff] }
 0xad6   : > { %v7192_v63 = vpack.c.bf16 %v4266_v62, %v4265_v61  ;;  %v4760_v61 = vld [vmem:[#allocation23 + $0x140] sm:$0xff]  ;;  %v4761_v62 = vld [vmem:[#allocation23 + $0x148] sm:$0xff] }
 0xad7   : > { %7115 = vmatpush3.bf16.msra.mxu1 %v7114_v6  ;;  %v3888_v6 = vld [vmem:[#allocation19 + $0x58] sm:$0xff] }
 0xad8   : > { %7117 = vmatprep.subr.bf16.mxu1 %v7116_v2  ;;  %v3905_v2 = vld [vmem:[#allocation19 + $0xe0] sm:$0xff]  ;;  %v7154_v10 = vpack.c.bf16 %v3888_v6, %v3887_v43 }
 0xad9   : > { %v7156_v1 = vpack.c.bf16 %v3906_v9, %v3905_v2 }
 0xadb   : > { %7119 = vmatpush3.bf16.msra.mxu1 %v7118_v13  ;;  %v3890_v13 = vld [vmem:[#allocation19 + $0x68] sm:$0xff] }
 0xadc   : > { %7121 = vmatprep.subr.bf16.mxu1 %v7120_v36  ;;  %v3907_v36 = vld [vmem:[#allocation19 + $0xf0] sm:$0xff]  ;;  %v7158_v19 = vpack.c.bf16 %v3890_v13, %v3889_v12 }
 0xadd   : > { %v7160_v15 = vpack.c.bf16 %v3908_v14, %v3907_v36 }
 0xadf   : > { %7123 = vmatpush3.bf16.msra.mxu1 %v7122_v17  ;;  %v3892_v17 = vld [vmem:[#allocation19 + $0x78] sm:$0xff] }
 0xae0   : > { %7125 = vmatprep.subr.bf16.mxu1 %v7124_v18  ;;  %v7162_v18 = vpack.c.bf16 %v3892_v17, %v3891_v16  ;;  %v5697_v17 = vld [vmem:[#allocation20] ss:$0 sm:$0xff] }
 0xae3   : > { %7127 = vmatpush3.bf16.msra.mxu1 %v7126_v22  ;;  %v4252_v22 = vld [vmem:[#allocation19 + $0x288] sm:$0xff] }
 0xae4   : > { %7129 = vmatprep.subr.bf16.mxu1 %v7128_v25  ;;  %v7164_v24 = vpack.c.bf16 %v4252_v22, %v4251_v21  ;;  %v4236_v25 = vld [vmem:[#allocation19 + $0x208] sm:$0xff]  ;;  %v4349_v22 = vld [vmem:[#allocation22] sm:$0xf] }
 0xae7   : > { %7131 = vmatpush3.bf16.msra.mxu1 %v7130_v29  ;;  %v7166_v29 = vpack.c.bf16 %v4236_v25, %v4235_v23  ;;  %v4521_v25 = vld [vmem:[#allocation23 + $0x88] sm:$0xff] }
 0xae8   : > { %7133 = vmatprep.subr.bf16.mxu1 %v7132_v32  ;;  %v4255_v32 = vld [vmem:[#allocation19 + $0x2a0] sm:$0xff] }
 0xb99   : > { %v9050_v33 = vpop.f32.mrb[26].mxu1 }
 0xb9a   : > { %v3874_v34 = vpop.f32.mrb[27].mxu1 }
 0xb9d   : > { %v3980_v39 = vpop.f32.mrb[28].mxu1 }
 0xb9e   : > { %v3982_v42 = vpop.f32.mrb[29].mxu1 }
 0xb9f   : > { %4082 = vmatprep.mubr.f32.mxu1 %v3982_v42  ;;  %v4241_v42 = vld [vmem:[#allocation19 + $0x230] sm:$0xff] }
 0xba0   : > { %4083 = vmatmul.mubr.f32.vlgmr.msra.gmra.mrb[30].mxu1 %v3980_v39  ;;  %v7174_v39 = vpack.c.bf16 %v4240_v37, %v4239_v35  ;;  %v4526_v35 = vld [vmem:[#allocation23 + $0xb0] sm:$0xff]  ;;  %v4527_v37 = vld [vmem:[#allocation23 + $0xb8] sm:$0xff] }
 0xba1   : > { %7135 = vmatpush3.bf16.msra.mxu1 %v7134_v41  ;;  %4152 = vmatprep.mubr.f32.mxu1 %v3874_v34  ;;  %v7176_v41 = vpack.c.bf16 %v4258_v38, %v4257_v40  ;;  %v7206_v40 = vpack.c.bf16 %v4527_v37, %v4526_v35  ;;  %v4528_v38 = vld [vmem:[#allocation23 + $0xc0] sm:$0xff] }
 0xba2   : > { %7137 = vmatprep.subr.bf16.mxu1 %v7136_v44  ;;  %v4242_v44 = vld [vmem:[#allocation19 + $0x238] sm:$0xff]  ;;  %v4440_v37 = vld [vmem:[#allocation23 + $0x60] sm:$0xff] }
 0xba3   : > { %v7178_v48 = vpack.c.bf16 %v4242_v44, %v4241_v42  ;;  %v4530_v42 = vld [vmem:[#allocation23 + $0xd0] sm:$0xff]  ;;  %v4531_v44 = vld [vmem:[#allocation23 + $0xd8] sm:$0xff] }
 0xba4   : > { %v7212_v46 = vpack.c.bf16 %v4531_v44, %v4530_v42  ;;  %v4850_v44 = vld [vmem:[%s9534_s4] sm:$0xff] }
 0xba5   : > { %7139 = vmatpush3.bf16.msra.mxu1 %v7138_v49  ;;  %v4243_v49 = vld [vmem:[#allocation19 + $0x240] sm:$0xff] }
 0xba6   : > { %7141 = vmatprep.subr.bf16.mxu1 %v7140_v51  ;;  %v4244_v51 = vld [vmem:[#allocation19 + $0x248] sm:$0xff] }
 0xba7   : > { %v7182_v54 = vpack.c.bf16 %v4244_v51, %v4243_v49  ;;  %v4534_v49 = vld [vmem:[#allocation23 + $0xf0] sm:$0xff]  ;;  %v4535_v51 = vld [vmem:[#allocation23 + $0xf8] sm:$0xff] }
 0xba8   : > { %v7218_v52 = vpack.c.bf16 %v4535_v51, %v4534_v49  ;;  %v4852_v49 = vld [vmem:[%s9534_s4 + $0x10] sm:$0xff]  ;;  %v4853_v51 = vld [vmem:[%s9534_s4 + $0x18] sm:$0xff] }
 0xba9   : > { %7143 = vmatpush3.bf16.msra.mxu1 %v7142_v56  ;;  %v4245_v56 = vld [vmem:[#allocation19 + $0x250] sm:$0xff] }
 0xbaa   : > { %7145 = vmatprep.subr.bf16.mxu1 %v7144_v0  ;;  %v4246_v0 = vld [vmem:[#allocation19 + $0x258] sm:$0xff] }
 0xbab   : > { %v7186_v50 = vpack.c.bf16 %v4246_v0, %v4245_v56  ;;  %v4754_v56 = vld [vmem:[#allocation23 + $0x110] sm:$0xff]  ;;  %v4755_v0 = vld [vmem:[#allocation23 + $0x118] sm:$0xff] }
 0xbac   : > { %v7248_v57 = vpack.c.bf16 %v4755_v0, %v4754_v56  ;;  %v4854_v0 = vld [vmem:[%s9534_s4 + $0x20] sm:$0xff] }
 0xbad   : > { %7147 = vmatpush3.bf16.msra.mxu1 %v7146_v3  ;;  %v4247_v3 = vld [vmem:[#allocation19 + $0x260] sm:$0xff] }
 0xbae   : > { %7149 = vmatprep.subr.bf16.mxu1 %v7148_v59  ;;  %v4248_v59 = vld [vmem:[#allocation19 + $0x268] sm:$0xff] }
 0xbaf   : > { %v7190_v60 = vpack.c.bf16 %v4248_v59, %v4247_v3  ;;  %v4758_v3 = vld [vmem:[#allocation23 + $0x130] sm:$0xff]  ;;  %v4759_v59 = vld [vmem:[#allocation23 + $0x138] sm:$0xff] }
 0xbb1   : > { %7151 = vmatpush3.bf16.msra.mxu1 %v7150_v5  ;;  %v4249_v5 = vld [vmem:[#allocation19 + $0x270] sm:$0xff] }
 0xbb2   : > { %7153 = vmatprep.subr.bf16.mxu1 %v7152_v7  ;;  %v4250_v7 = vld [vmem:[#allocation19 + $0x278] sm:$0xff] }
 0xbb3   : > { %v7194_v43 = vpack.c.bf16 %v4250_v7, %v4249_v5  ;;  %v4762_v5 = vld [vmem:[#allocation23 + $0x150] sm:$0xff]  ;;  %v4763_v7 = vld [vmem:[#allocation23 + $0x158] sm:$0xff] }
 0xbb5   : > { %7155 = vmatpush3.bf16.msra.mxu1 %v7154_v10 }
 0xbb6   : > { %7157 = vmatprep.subr.bf16.mxu1 %v7156_v1 }
 0xbb9   : > { %7159 = vmatpush3.bf16.msra.mxu1 %v7158_v19 }
 0xbba   : > { %7161 = vmatprep.subr.bf16.mxu1 %v7160_v15 }
 0xbbd   : > { %7163 = vmatpush3.bf16.msra.mxu1 %v7162_v18 }
 0xbbe   : > { %4163 = vmatprep.subr.mxu1 %v9039_v45  ;;  %v4238_v45 = vld [vmem:[#allocation19 + $0x218] sm:$0xff] }
 0xbc0   : > { %4153 = vmatmul.mubr.f32.vlgmr.msra.gmra.mrb[32].mxu1 %v9050_v33  ;;  %v4256_v33 = vld [vmem:[#allocation19 + $0x2a8] sm:$0xff] }
 0xbc1   : > { %4164 = vmatpush1.msra.mxu1 %v9042_v47  ;;  %4227 = vmatprep.mubr.f32.mxu1 %v8310_v26  ;;  %v7170_v47 = vpack.c.bf16 %v4238_v45, %v4237_v31  ;;  %v7172_v34 = vpack.c.bf16 %v4256_v33, %v4255_v32  ;;  %v4522_v31 = vld [vmem:[#allocation23 + $0x90] sm:$0xff]  ;;  %v4523_v45 = vld [vmem:[#allocation23 + $0x98] sm:$0xff]  ;;  %v4524_v33 = vld [vmem:[#allocation23 + $0xa0] sm:$0xff] }
 0xbc2   : > { %7165 = vmatprep.subr.bf16.mxu1 %v7164_v24  ;;  %v4520_v24 = vld [vmem:[#allocation23 + $0x80] sm:$0xff]  ;;  %v7200_v32 = vpack.c.bf16 %v4523_v45, %v4522_v31 }
 0xbc3   : > { %v4436_v45 = vld [vmem:[#allocation23 + $0x40] sm:$0xff] }
 0xbc4   : > { %5696 = vmatmul.mubr.msk.f32.vlgmr.msra.gmra.mrb[34].mxu1 %vm3146_vm5, %v4159_v20 }
 0xbc5   : > { %7167 = vmatpush3.bf16.msra.mxu1 %v7166_v29  ;;  %v7197_v29 = vpack.c.bf16 %v4521_v25, %v4520_v24  ;;  %v4432_v24 = vld [vmem:[#allocation23 + $0x20] sm:$0xff]  ;;  %v4433_v25 = vld [vmem:[#allocation23 + $0x28] sm:$0xff] }
 0xbc6   : > { %7169 = vmatprep.subr.bf16.mxu1 %v7168_v30  ;;  %v8312_v30 = vmov 0.0|0.0  }
 0xbc9   : > { %7171 = vmatpush3.bf16.msra.mxu1 %v7170_v47  ;;  %v4525_v47 = vld [vmem:[#allocation23 + $0xa8] sm:$0xff] }
 0xbca   : > { %7173 = vmatprep.subr.bf16.mxu1 %v7172_v34  ;;  %v7203_v34 = vpack.c.bf16 %v4525_v47, %v4524_v33  ;;  %v4438_v47 = vld [vmem:[#allocation23 + $0x50] sm:$0xff] }
 0xbcd   : > { %7175 = vmatpush3.bf16.msra.mxu1 %v7174_v39  ;;  %v4529_v39 = vld [vmem:[#allocation23 + $0xc8] sm:$0xff] }
 0xbce   : > { %7177 = vmatprep.subr.bf16.mxu1 %v7176_v41  ;;  %v7209_v41 = vpack.c.bf16 %v4529_v39, %v4528_v38  ;;  %v4442_v39 = vld [vmem:[#allocation23 + $0x70] sm:$0xff] }
 0xbd1   : > { %7179 = vmatpush3.bf16.msra.mxu1 %v7178_v48  ;;  %v4533_v48 = vld [vmem:[#allocation23 + $0xe8] sm:$0xff] }
 0xbd2   : > { %7181 = vmatprep.subr.bf16.mxu1 %v7180_v11  ;;  %v7215_v11 = vpack.c.bf16 %v4533_v48, %v4532_v8  ;;  %v5705_v8 = vld [vmem:[%s9534_s4 + $0x80] sm:$0xff] }
 0xbd5   : > { %7183 = vmatpush3.bf16.msra.mxu1 %v7182_v54  ;;  %v4753_v54 = vld [vmem:[#allocation23 + $0x108] sm:$0xff] }
 0xbd6   : > { %7185 = vmatprep.subr.bf16.mxu1 %v7184_v55  ;;  %v7245_v55 = vpack.c.bf16 %v4753_v54, %v4752_v53  ;;  %v5707_v53 = vld [vmem:[%s9534_s4 + $0x90] sm:$0xff]  ;;  %v5708_v54 = vld [vmem:[%s9534_s4 + $0x98] sm:$0xff] }
 0xbd7   : > { %v7272_v56 = vpack.c.bf16 %v5708_v54, %v5707_v53  ;;  %v5724_v53 = vld [vmem:[%s9534_s4 + $0x118] sm:$0xff] }
 0xbd9   : > { %7187 = vmatpush3.bf16.msra.mxu1 %v7186_v50  ;;  %v4757_v50 = vld [vmem:[#allocation23 + $0x128] sm:$0xff] }
 0xbda   : > { %7189 = vmatprep.subr.bf16.mxu1 %v7188_v58  ;;  %v7251_v58 = vpack.c.bf16 %v4757_v50, %v4756_v4  ;;  %v5709_v4 = vld [vmem:[%s9534_s4 + $0xa0] sm:$0xff]  ;;  %v5710_v50 = vld [vmem:[%s9534_s4 + $0xa8] sm:$0xff] }
 0xbdd   : > { %7191 = vmatpush3.bf16.msra.mxu1 %v7190_v60  ;;  %v7254_v60 = vpack.c.bf16 %v4759_v59, %v4758_v3  ;;  %v7275_v3 = vpack.c.bf16 %v5710_v50, %v5709_v4  ;;  %v4856_v59 = vld [vmem:[%s9534_s4 + $0x30] sm:$0xff]  ;;  %v5726_v4 = vld [vmem:[%s9534_s4 + $0x128] sm:$0xff] }
 0xbde   : > { %7193 = vmatprep.subr.bf16.mxu1 %v7192_v63  ;;  %v7257_v63 = vpack.c.bf16 %v4761_v62, %v4760_v61  ;;  %v5711_v61 = vld [vmem:[%s9534_s4 + $0xb0] sm:$0xff]  ;;  %v5712_v62 = vld [vmem:[%s9534_s4 + $0xb8] sm:$0xff] }
 0xbe1   : > { %7195 = vmatpush3.bf16.msra.mxu1 %v7194_v43  ;;  %v7260_v43 = vpack.c.bf16 %v4763_v7, %v4762_v5  ;;  %v7278_v5 = vpack.c.bf16 %v5712_v62, %v5711_v61  ;;  %v4858_v7 = vld [vmem:[%s9534_s4 + $0x40] sm:$0xff]  ;;  %v5728_v61 = vld [vmem:[%s9534_s4 + $0x138] sm:$0xff] }
 0xbe2   : > { %6050 = vmatprep.subr.mxu1 %v8310_v26 }
 0xc73   : > { %v5809_v6 = vpop.f32.mrb[30].mxu1 }
 0xc74   : > { %v5810_v2 = vpop.f32.mrb[31].mxu1 }
 0xc75   : > { %v5811_v9 = vadd.f32 %v5810_v2, %v5809_v6  ;;  %v4764_v6 = vld [vmem:[#allocation23 + $0x160] sm:$0xff]  ;;  %v4765_v2 = vld [vmem:[#allocation23 + $0x168] sm:$0xff] }
 0xc93   : > { %v5844_v10 = vpop.f32.mrb[32].mxu1 }
 0xc94   : > { %v5845_v1 = vpop.f32.mrb[33].mxu1 }
 0xc95   : > { %v5846_v12 = vadd.f32 %v5845_v1, %v5844_v10  ;;  %v4766_v10 = vld [vmem:[#allocation23 + $0x170] sm:$0xff]  ;;  %v4767_v1 = vld [vmem:[#allocation23 + $0x178] sm:$0xff] }
 0xc97   : > { %v4155_v13 = vadd.f32 %v5846_v12, %v5811_v9  ;;  %v4229_v36 = vpop.f32.mrb[34].mxu1  ;;  %v7263_v9 = vpack.c.bf16 %v4765_v2, %v4764_v6  ;;  %v7266_v12 = vpack.c.bf16 %v4767_v1, %v4766_v10  ;;  %v5713_v6 = vld [vmem:[%s9534_s4 + $0xc0] sm:$0xff]  ;;  %v5714_v2 = vld [vmem:[%s9534_s4 + $0xc8] sm:$0xff]  ;;  %v4860_v1 = vld [vmem:[%s9534_s4 + $0x50] sm:$0xff] }
 0xc98   : > { %v4231_v14 = vpop.f32.mrb[35].mxu1  ;;  %v7281_v10 = vpack.c.bf16 %v5714_v2, %v5713_v6  ;;  %v5730_v6 = vld [vmem:[%s9534_s4 + $0x148] sm:$0xff] }
 0xc99   : > { %4331 = vmatprep.mubr.f32.mxu1 %v4231_v14 }
 0xc9a   : > { %4332 = vmatmul.mubr.f32.vlgmr.msra.gmra.mrb[36].mxu1 %v4229_v36  ;;  %v4429_v36 = vld [vmem:[#allocation23 + $0x8] sm:$0xff] }
 0xc9b   : > { %6052 = vmatprep.mubr.msk.f32.mxu1 %vm8311_vm8, %v8310_v26 }
 0xd6d   : > { %v5879_v19 = vpop.f32.mrb[36].mxu1 }
 0xd6e   : > { %v5880_v15 = vpop.f32.mrb[37].mxu1 }
 0xd6f   : > { %v5881_v16 = vadd.f32 %v5880_v15, %v5879_v19 }
 0xd71   : > { %v4337_v18 = vadd.f32 %v5881_v16, %v4155_v13  ;;  %v4428_v13 = vld [vmem:[#allocation23] sm:$0xff] }
 0xd72   : > { %v7221_v15 = vpack.c.bf16 %v4429_v36, %v4428_v13  ;;  %v5715_v36 = vld [vmem:[%s9534_s4 + $0xd0] sm:$0xff] }
 0xd73   : > { %v4345_v20 = vadd.f32 %v5697_v17, %v4337_v18  ;;  %v4430_v17 = vld [vmem:[#allocation23 + $0x10] sm:$0xff]  ;;  %v4431_v18 = vld [vmem:[#allocation23 + $0x18] sm:$0xff] }
 0xd75   : > { %v4347_v21 = vmul.f32 0.2, %v4345_v20  ;;  %vm4346_vm9 = vcmp.ge.f32.partialorder %v4345_v20, 0.0 }
 0xd77   : > { %v4348_v23 = vsel %vm4346_vm9, %v4345_v20, %v4347_v21 }
 0xd78   : > { %6051 = vmatpush3.msk.msra.mxu1 %vm4354_vm10, %v4348_v23  ;;  %6131 = vmatpush3.msk.msra.mxu0 %vm4354_vm10, %v4348_v23 }
 0xd79   : > { %6053 = vmatmul.mubr.msk.f32.vlgmr.msra.gmra.mrb[38].mxu1 %vm4350_vm11, %v4349_v22  ;;  %6055 = vmatprep.subr.mxu1 %v8310_v26 }
 0xd7a   : > { %6056 = vmatpush3.msk.msra.mxu1 %vm4354_vm10, %v4348_v23  ;;  %6057 = vmatprep.mubr.msk.f32.mxu1 %vm8311_vm8, %v8310_v26  ;;  %v7224_v23 = vpack.c.bf16 %v4431_v18, %v4430_v17  ;;  %v5717_v18 = vld [vmem:[%s9534_s4 + $0xe0] sm:$0xff] }
 0xd7b   : > { %6133 = vmatmul.mubr.msk.f32.vlgmr.msra.gmra.mrb[10].mxu0 %vm4350_vm11, %v4677_v27  ;;  %7196 = vmatprep.subr.bf16.mxu1 %v8312_v30  ;;  %v7227_v27 = vpack.c.bf16 %v4433_v25, %v4432_v24  ;;  %v5719_v25 = vld [vmem:[%s9534_s4 + $0xf0] sm:$0xff] }
 0xd7c   : > { %7244 = vmatprep.subr.bf16.mxu0 %v8312_v30  ;;  %6167 = vmatprep.mubr.msk.f32.mxu0 %vm8311_vm8, %v8310_v26 }
 0xd7d   : > { %6058 = vmatmul.mubr.msk.f32.vlgmr.msra.gmra.mrb[40].mxu1 %vm4350_vm11, %v4445_v28  ;;  %7246 = vmatpush3.bf16.msra.mxu0 %v7245_v55  ;;  %v4434_v28 = vld [vmem:[#allocation23 + $0x30] sm:$0xff]  ;;  %v7296_v55 = vpack.c.bf16 %v4853_v51, %v4852_v49 }
 0xd7e   : > { %7198 = vmatpush3.bf16.msra.mxu1 %v7197_v29  ;;  %6092 = vmatprep.mubr.msk.f32.mxu1 %vm8311_vm8, %v8310_v26  ;;  %v4435_v29 = vld [vmem:[#allocation23 + $0x38] sm:$0xff] }
 0xd7f   : > { %7199 = vmatprep.subr.bf16.mxu1 %v8312_v30  ;;  %7247 = vmatprep.subr.bf16.mxu0 %v8312_v30  ;;  %v7230_v31 = vpack.c.bf16 %v4435_v29, %v4434_v28 }
 0xd81   : > { %7249 = vmatpush3.bf16.msra.mxu0 %v7248_v57  ;;  %v4855_v57 = vld [vmem:[%s9534_s4 + $0x28] sm:$0xff] }
 0xd82   : > { %7201 = vmatpush3.bf16.msra.mxu1 %v7200_v32  ;;  %7250 = vmatprep.subr.bf16.mxu0 %v8312_v30  ;;  %v4437_v32 = vld [vmem:[#allocation23 + $0x48] sm:$0xff] }
 0xd83   : > { %7202 = vmatprep.subr.bf16.mxu1 %v8312_v30  ;;  %v7233_v33 = vpack.c.bf16 %v4437_v32, %v4436_v45 }
 0xd85   : > { %7252 = vmatpush3.bf16.msra.mxu0 %v7251_v58  ;;  %v7299_v58 = vpack.c.bf16 %v4855_v57, %v4854_v0  ;;  %v5725_v57 = vld [vmem:[%s9534_s4 + $0x120] sm:$0xff] }
 0xd86   : > { %7204 = vmatpush3.bf16.msra.mxu1 %v7203_v34  ;;  %7253 = vmatprep.subr.bf16.mxu0 %v8312_v30  ;;  %v4439_v34 = vld [vmem:[#allocation23 + $0x58] sm:$0xff] }
 0xd87   : > { %7205 = vmatprep.subr.bf16.mxu1 %v8312_v30  ;;  %v7236_v35 = vpack.c.bf16 %v4439_v34, %v4438_v47 }
 0xd89   : > { %7255 = vmatpush3.bf16.msra.mxu0 %v7254_v60  ;;  %v4857_v60 = vld [vmem:[%s9534_s4 + $0x38] sm:$0xff] }
 0xd8a   : > { %7207 = vmatpush3.bf16.msra.mxu1 %v7206_v40  ;;  %7256 = vmatprep.subr.bf16.mxu0 %v8312_v30  ;;  %v4441_v40 = vld [vmem:[#allocation23 + $0x68] sm:$0xff] }
 0xd8b   : > { %7208 = vmatprep.subr.bf16.mxu1 %v8312_v30  ;;  %v7239_v38 = vpack.c.bf16 %v4441_v40, %v4440_v37  ;;  %v5737_v40 = vld [vmem:[%s9534_s4 + $0x180] sm:$0xff] }
 0xd8d   : > { %7258 = vmatpush3.bf16.msra.mxu0 %v7257_v63  ;;  %v7302_v63 = vpack.c.bf16 %v4857_v60, %v4856_v59  ;;  %v7323_v59 = vpack.c.bf16 %v5726_v4, %v5725_v57  ;;  %v5727_v60 = vld [vmem:[%s9534_s4 + $0x130] sm:$0xff]  ;;  %v5215_v4 = vld [vmem:[#allocation29] sm:$0x1] }
 0xd8e   : > { %7210 = vmatpush3.bf16.msra.mxu1 %v7209_v41  ;;  %7259 = vmatprep.subr.bf16.mxu0 %v8312_v30  ;;  %v4443_v41 = vld [vmem:[#allocation23 + $0x78] sm:$0xff] }
 0xd8f   : > { %7211 = vmatprep.subr.bf16.mxu1 %v8312_v30  ;;  %v7242_v42 = vpack.c.bf16 %v4443_v41, %v4442_v39  ;;  %v5721_v41 = vld [vmem:[%s9534_s4 + $0x100] sm:$0xff] }
 0xd91   : > { %7261 = vmatpush3.bf16.msra.mxu0 %v7260_v43  ;;  %v4859_v43 = vld [vmem:[%s9534_s4 + $0x48] sm:$0xff] }
 0xd92   : > { %7213 = vmatpush3.bf16.msra.mxu1 %v7212_v46  ;;  %7262 = vmatprep.subr.bf16.mxu0 %v8312_v30  ;;  %v4851_v46 = vld [vmem:[%s9534_s4 + $0x8] sm:$0xff] }
 0xd93   : > { %7214 = vmatprep.subr.bf16.mxu1 %v8312_v30  ;;  %v7293_v48 = vpack.c.bf16 %v4851_v46, %v4850_v44 }
 0xd95   : > { %7264 = vmatpush3.bf16.msra.mxu0 %v7263_v9  ;;  %v7305_v9 = vpack.c.bf16 %v4859_v43, %v4858_v7  ;;  %v7326_v7 = vpack.c.bf16 %v5728_v61, %v5727_v60  ;;  %v5729_v43 = vld [vmem:[%s9534_s4 + $0x140] sm:$0xff] }
 0xd96   : > { %7216 = vmatpush3.bf16.msra.mxu1 %v7215_v11  ;;  %7265 = vmatprep.subr.bf16.mxu0 %v8312_v30  ;;  %v5706_v11 = vld [vmem:[%s9534_s4 + $0x88] sm:$0xff] }
 0xd97   : > { %7217 = vmatprep.subr.bf16.mxu1 %v8312_v30 }
 0xd99   : > { %7267 = vmatpush3.bf16.msra.mxu0 %v7266_v12  ;;  %v4861_v12 = vld [vmem:[%s9534_s4 + $0x58] sm:$0xff] }
 0xd9a   : > { %7219 = vmatpush3.bf16.msra.mxu1 %v7218_v52  ;;  %7292 = vmatprep.subr.bf16.mxu0 %v8312_v30  ;;  %v7269_v52 = vpack.c.bf16 %v5706_v11, %v5705_v8  ;;  %v7308_v13 = vpack.c.bf16 %v4861_v12, %v4860_v1  ;;  %v5739_v8 = vld [vmem:[%s9534_s4 + $0x190] sm:$0xff]  ;;  %v7329_v1 = vpack.c.bf16 %v5730_v6, %v5729_v43 }
 0xd9b   : > { %7220 = vmatprep.subr.bf16.mxu1 %v8312_v30  ;;  %v5731_v12 = vld [vmem:[%s9534_s4 + $0x150] sm:$0xff] }
 0xe4c   : > { %v4424_v14 = vpop.f32.mrb[38].mxu1 }
 0xe4d   : > { %v6054_v19 = vpop.f32.mrb[39].mxu1 }
 0xe4e   : > { %v4747_v16 = vpop.f32.mrb[10].mxu0 }
 0xe4f   : > { %6168 = vmatmul.mubr.f32.vlgmr.msra.gmra.mrb[12].mxu0 %v4747_v16  ;;  %v6134_v20 = vpop.f32.mrb[11].mxu0  ;;  %v4863_v16 = vld [vmem:[%s9534_s4 + $0x68] sm:$0xff] }
 0xe50   : > { %v4515_v21 = vpop.f32.mrb[40].mxu1  ;;  %6237 = vmatprep.mubr.msk.f32.mxu0 %vm8311_vm8, %v8310_v26  ;;  %7294 = vmatpush3.bf16.msra.mxu0 %v7293_v48  ;;  %v5718_v20 = vld [vmem:[%s9534_s4 + $0xe8] sm:$0xff]  ;;  %v5740_v48 = vld [vmem:[%s9534_s4 + $0x198] sm:$0xff] }
 0xe51   : > { %6093 = vmatmul.mubr.f32.vlgmr.msra.gmra.mrb[42].mxu1 %v4515_v21  ;;  %v6059_v22 = vpop.f32.mrb[41].mxu1  ;;  %7295 = vmatprep.subr.bf16.mxu0 %v8312_v30  ;;  %v7287_v21 = vpack.c.bf16 %v5718_v20, %v5717_v18  ;;  %v7344_v54 = vpack.c.bf16 %v5740_v48, %v5739_v8  ;;  %v5751_v20 = vld [vmem:[%s9534_s4 + $0x1f0] sm:$0xff]  ;;  %v5206_v48 = vld [vmem:[#allocation26] sm:$0x1] }
 0xe52   : > { %7222 = vmatpush3.bf16.msra.mxu1 %v7221_v15  ;;  %6127 = vmatprep.mubr.msk.f32.mxu1 %vm8311_vm8, %v8310_v26  ;;  %v4862_v15 = vld [vmem:[%s9534_s4 + $0x60] sm:$0xff]  ;;  %v4864_v22 = vld [vmem:[%s9534_s4 + $0x70] sm:$0xff] }
 0xe53   : > { %7223 = vmatprep.subr.bf16.mxu1 %v8312_v30  ;;  %v7311_v17 = vpack.c.bf16 %v4863_v16, %v4862_v15  ;;  %v5733_v16 = vld [vmem:[%s9534_s4 + $0x160] sm:$0xff] }
 0xe54   : > { %7297 = vmatpush3.bf16.msra.mxu0 %v7296_v55  ;;  %v5741_v55 = vld [vmem:[%s9534_s4 + $0x1a0] sm:$0xff] }
 0xe55   : > { %7298 = vmatprep.subr.bf16.mxu0 %v8312_v30 }
 0xe56   : > { %7225 = vmatpush3.bf16.msra.mxu1 %v7224_v23  ;;  %v4865_v23 = vld [vmem:[%s9534_s4 + $0x78] sm:$0xff] }
 0xe57   : > { %7226 = vmatprep.subr.bf16.mxu1 %v8312_v30  ;;  %v7314_v24 = vpack.c.bf16 %v4865_v23, %v4864_v22  ;;  %v5735_v23 = vld [vmem:[%s9534_s4 + $0x170] sm:$0xff] }
 0xe58   : > { %7300 = vmatpush3.bf16.msra.mxu0 %v7299_v58  ;;  %v5743_v58 = vld [vmem:[%s9534_s4 + $0x1b0] sm:$0xff] }
 0xe59   : > { %7301 = vmatprep.subr.bf16.mxu0 %v8312_v30 }
 0xe5a   : > { %7228 = vmatpush3.bf16.msra.mxu1 %v7227_v27  ;;  %v5720_v27 = vld [vmem:[%s9534_s4 + $0xf8] sm:$0xff] }
 0xe5b   : > { %7229 = vmatprep.subr.bf16.mxu1 %v8312_v30  ;;  %v7290_v28 = vpack.c.bf16 %v5720_v27, %v5719_v25 }
 0xe5c   : > { %7303 = vmatpush3.bf16.msra.mxu0 %v7302_v63  ;;  %v5745_v63 = vld [vmem:[%s9534_s4 + $0x1c0] sm:$0xff] }
 0xe5d   : > { %7304 = vmatprep.subr.bf16.mxu0 %v8312_v30 }
 0xe5e   : > { %7231 = vmatpush3.bf16.msra.mxu1 %v7230_v31 }
 0xe5f   : > { %7232 = vmatprep.subr.bf16.mxu1 %v8312_v30 }
 0xe60   : > { %7306 = vmatpush3.bf16.msra.mxu0 %v7305_v9  ;;  %v5747_v9 = vld [vmem:[%s9534_s4 + $0x1d0] sm:$0xff] }
 0xe61   : > { %7307 = vmatprep.subr.bf16.mxu0 %v8312_v30 }
 0xe62   : > { %7234 = vmatpush3.bf16.msra.mxu1 %v7233_v33 }
 0xe63   : > { %7235 = vmatprep.subr.bf16.mxu1 %v8312_v30 }
 0xe64   : > { %7309 = vmatpush3.bf16.msra.mxu0 %v7308_v13  ;;  %v5732_v13 = vld [vmem:[%s9534_s4 + $0x158] sm:$0xff] }
 0xe65   : > { %7310 = vmatprep.subr.bf16.mxu0 %v8312_v30  ;;  %v7332_v15 = vpack.c.bf16 %v5732_v13, %v5731_v12 }
 0xe66   : > { %7237 = vmatpush3.bf16.msra.mxu1 %v7236_v35  ;;  %v5704_v35 = vld [vmem:[#allocation25] ss:$0 sm:$0xff] }
 0xe67   : > { %7238 = vmatprep.subr.bf16.mxu1 %v8312_v30 }
 0xe68   : > { %7312 = vmatpush3.bf16.msra.mxu0 %v7311_v17  ;;  %v5734_v17 = vld [vmem:[%s9534_s4 + $0x168] sm:$0xff] }
 0xe69   : > { %7313 = vmatprep.subr.bf16.mxu0 %v8312_v30  ;;  %v7335_v22 = vpack.c.bf16 %v5734_v17, %v5733_v16 }
 0xe6a   : > { %7240 = vmatpush3.bf16.msra.mxu1 %v7239_v38  ;;  %v5738_v38 = vld [vmem:[%s9534_s4 + $0x188] sm:$0xff] }
 0xe6b   : > { %7241 = vmatprep.subr.bf16.mxu1 %v8312_v30  ;;  %v7341_v46 = vpack.c.bf16 %v5738_v38, %v5737_v40 }
 0xe6c   : > { %7315 = vmatpush3.bf16.msra.mxu0 %v7314_v24  ;;  %v5736_v24 = vld [vmem:[%s9534_s4 + $0x178] sm:$0xff] }
 0xe6d   : > { %7340 = vmatprep.subr.bf16.mxu0 %v8312_v30  ;;  %v7338_v27 = vpack.c.bf16 %v5736_v24, %v5735_v23 }
 0xe6e   : > { %7243 = vmatpush3.bf16.msra.mxu1 %v7242_v42  ;;  %v5722_v42 = vld [vmem:[%s9534_s4 + $0x108] sm:$0xff] }
 0xe6f   : > { %7268 = vmatprep.subr.bf16.mxu1 %v8312_v30  ;;  %v7317_v49 = vpack.c.bf16 %v5722_v42, %v5721_v41 }
 0xe71   : > { %6128 = vmatmul.mubr.f32.vlgmr.msra.gmra.mrb[44].mxu1 %v4424_v14  ;;  %v5716_v14 = vld [vmem:[%s9534_s4 + $0xd8] sm:$0xff] }
 0xe72   : > { %6202 = vmatprep.mubr.msk.f32.mxu1 %vm8311_vm8, %v8310_v26  ;;  %7270 = vmatpush3.bf16.msra.mxu1 %v7269_v52  ;;  %v7284_v19 = vpack.c.bf16 %v5716_v14, %v5715_v36  ;;  %v5723_v52 = vld [vmem:[%s9534_s4 + $0x110] sm:$0xff]  ;;  %v5749_v14 = vld [vmem:[%s9534_s4 + $0x1e0] sm:$0xff] }
 0xe73   : > { %7271 = vmatprep.subr.bf16.mxu1 %v8312_v30  ;;  %v7320_v0 = vpack.c.bf16 %v5724_v53, %v5723_v52 }
 0xe76   : > { %7273 = vmatpush3.bf16.msra.mxu1 %v7272_v56  ;;  %v5742_v56 = vld [vmem:[%s9534_s4 + $0x1a8] sm:$0xff] }
 0xe77   : > { %7274 = vmatprep.subr.bf16.mxu1 %v8312_v30  ;;  %v7347_v50 = vpack.c.bf16 %v5742_v56, %v5741_v55  ;;  %v5294_v56 = vld [vmem:[%s9535_s2 + $0x10] sm:$0xff] }
 0xe7a   : > { %7276 = vmatpush3.bf16.msra.mxu1 %v7275_v3  ;;  %v5744_v3 = vld [vmem:[%s9534_s4 + $0x1b8] sm:$0xff] }
 0xe7b   : > { %7277 = vmatprep.subr.bf16.mxu1 %v8312_v30  ;;  %v7350_v62 = vpack.c.bf16 %v5744_v3, %v5743_v58 }
 0xe7e   : > { %7279 = vmatpush3.bf16.msra.mxu1 %v7278_v5  ;;  %v5746_v5 = vld [vmem:[%s9534_s4 + $0x1c8] sm:$0xff] }
 0xe7f   : > { %7280 = vmatprep.subr.bf16.mxu1 %v8312_v30  ;;  %v7353_v2 = vpack.c.bf16 %v5746_v5, %v5745_v63 }
 0xe82   : > { %7282 = vmatpush3.bf16.msra.mxu1 %v7281_v10  ;;  %v5748_v10 = vld [vmem:[%s9534_s4 + $0x1d8] sm:$0xff] }
 0xe83   : > { %7283 = vmatprep.subr.bf16.mxu1 %v8312_v30  ;;  %v7356_v36 = vpack.c.bf16 %v5748_v10, %v5747_v9 }
 0xe86   : > { %7285 = vmatpush3.bf16.msra.mxu1 %v7284_v19  ;;  %v5750_v19 = vld [vmem:[%s9534_s4 + $0x1e8] sm:$0xff] }
 0xe87   : > { %7286 = vmatprep.subr.bf16.mxu1 %v8312_v30  ;;  %v7359_v18 = vpack.c.bf16 %v5750_v19, %v5749_v14 }
 0xe8a   : > { %7288 = vmatpush3.bf16.msra.mxu1 %v7287_v21  ;;  %v5752_v21 = vld [vmem:[%s9534_s4 + $0x1f8] sm:$0xff] }
 0xe8b   : > { %7289 = vmatprep.subr.bf16.mxu1 %v8312_v30  ;;  %v7362_v25 = vpack.c.bf16 %v5752_v21, %v5751_v20 }
 0xe8e   : > { %7291 = vmatpush3.bf16.msra.mxu1 %v7290_v28 }
 0xe8f   : > { %7316 = vmatprep.subr.bf16.mxu1 %v8312_v30 }
 0xf22   : > { %v4834_v29 = vpop.f32.mrb[12].mxu0 }
 0xf23   : > { %v6169_v31 = vpop.f32.mrb[13].mxu0 }
 0xf24   : > { %v4602_v45 = vpop.f32.mrb[42].mxu1  ;;  %v5211_v31 = vld [vmem:[#allocation28] sm:$0xff] }
 0xf25   : > { %v6094_v32 = vpop.f32.mrb[43].mxu1 }
 0xf44   : > { %v4672_v33 = vpop.f32.mrb[44].mxu1 }
 0xf45   : > { %v4673_v47 = vadd.f32 %v4672_v33, %v4602_v45  ;;  %v6129_v34 = vpop.f32.mrb[45].mxu1  ;;  %v5212_v45 = vld [vmem:[#allocation28 + $0x8] sm:$0xff]  ;;  %v5213_v33 = vld [vmem:[#allocation28 + $0x10] sm:$0xff] }
 0xf46   : > { %v7365_v32 = vpack.c.bf16 %v5212_v45, %v5211_v31 }
 0xf47   : > { %v4838_v37 = vadd.f32 %v4834_v29, %v4673_v47  ;;  %v5214_v47 = vld [vmem:[#allocation28 + $0x18] sm:$0xff] }
 0xf48   : > { %v7368_v34 = vpack.c.bf16 %v5214_v47, %v5213_v33 }
 0xf49   : > { %v4846_v39 = vadd.f32 %v5704_v35, %v4838_v37 }
 0xf4b   : > { %v4848_v44 = vmul.f32 0.2, %v4846_v39  ;;  %vm4847_vm12 = vcmp.ge.f32.partialorder %v4846_v39, 0.0 }
 0xf4d   : > { %v9234_v11 = vsel %vm4847_vm12, %v4846_v39, %v4848_v44 }
 0xf4e   : > { %6238 = vmatmul.mubr.f32.vlgmr.msra.gmra.mrb[14].mxu0 %v9234_v11  ;;  %v4884_v51 = vrot.slane %v9234_v11, 1  ;;  %v5133_v28 = vrot.slane %v9234_v11, 3  ;;  %v5043_v29 = vrot.slane %v9234_v11, 2 }
 0xf4f   : > { %7342 = vmatpush3.bf16.msra.mxu0 %v7341_v46  ;;  %6307 = vmatprep.mubr.msk.f32.mxu0 %vm8311_vm8, %v8310_v26 }
 0xf50   : > { %6203 = vmatmul.mubr.f32.vlgmr.msra.gmra.mrb[46].mxu1 %v4884_v51  ;;  %7343 = vmatprep.subr.bf16.mxu0 %v8312_v30  ;;  %v5293_v51 = vld [vmem:[%s9535_s2 + $0x8] sm:$0xff] }
 0xf51   : > { %7318 = vmatpush3.bf16.msra.mxu1 %v7317_v49  ;;  %6272 = vmatprep.mubr.msk.f32.mxu1 %vm8311_vm8, %v8310_v26  ;;  %v5292_v49 = vld [vmem:[%s9535_s2] sm:$0xff] }
 0xf52   : > { %7319 = vmatprep.subr.bf16.mxu1 %v8312_v30 }
 0xf53   : > { %7345 = vmatpush3.bf16.msra.mxu0 %v7344_v54  ;;  %v7371_v54 = vpack.c.bf16 %v5293_v51, %v5292_v49 }
 0xf54   : > { %7346 = vmatprep.subr.bf16.mxu0 %v8312_v30 }
 0xf55   : > { %7321 = vmatpush3.bf16.msra.mxu1 %v7320_v0  ;;  %v5295_v0 = vld [vmem:[%s9535_s2 + $0x18] sm:$0xff] }
 0xf56   : > { %7322 = vmatprep.subr.bf16.mxu1 %v8312_v30  ;;  %v7374_v57 = vpack.c.bf16 %v5295_v0, %v5294_v56 }
 0xf57   : > { %7348 = vmatpush3.bf16.msra.mxu0 %v7347_v50 }
 0xf58   : > { %7349 = vmatprep.subr.bf16.mxu0 %v8312_v30 }
 0xf59   : > { %7324 = vmatpush3.bf16.msra.mxu1 %v7323_v59 }
 0xf5a   : > { %7325 = vmatprep.subr.bf16.mxu1 %v8312_v30 }
 0xf5b   : > { %7351 = vmatpush3.bf16.msra.mxu0 %v7350_v62 }
 0xf5c   : > { %7352 = vmatprep.subr.bf16.mxu0 %v8312_v30 }
 0xf5d   : > { %7327 = vmatpush3.bf16.msra.mxu1 %v7326_v7 }
 0xf5e   : > { %7328 = vmatprep.subr.bf16.mxu1 %v8312_v30 }
 0xf5f   : > { %7354 = vmatpush3.bf16.msra.mxu0 %v7353_v2 }
 0xf60   : > { %7355 = vmatprep.subr.bf16.mxu0 %v8312_v30 }
 0xf61   : > { %7330 = vmatpush3.bf16.msra.mxu1 %v7329_v1 }
 0xf62   : > { %7331 = vmatprep.subr.bf16.mxu1 %v8312_v30 }
 0xf63   : > { %7357 = vmatpush3.bf16.msra.mxu0 %v7356_v36 }
 0xf64   : > { %7358 = vmatprep.subr.bf16.mxu0 %v8312_v30 }
 0xf65   : > { %7333 = vmatpush3.bf16.msra.mxu1 %v7332_v15 }
 0xf66   : > { %7334 = vmatprep.subr.bf16.mxu1 %v8312_v30 }
 0xf67   : > { %7360 = vmatpush3.bf16.msra.mxu0 %v7359_v18 }
 0xf68   : > { %7361 = vmatprep.subr.bf16.mxu0 %v8312_v30 }
 0xf69   : > { %7336 = vmatpush3.bf16.msra.mxu1 %v7335_v22 }
 0xf6a   : > { %7337 = vmatprep.subr.bf16.mxu1 %v8312_v30 }
 0xf6b   : > { %7363 = vmatpush3.bf16.msra.mxu0 %v7362_v25 }
 0xf6d   : > { %7339 = vmatpush3.bf16.msra.mxu1 %v7338_v27 }
 0xf6e   : > { %6308 = vmatmul.mubr.f32.vlgmr.msra.gmra.mrb[16].mxu0 %v5133_v28  ;;  %7364 = vmatprep.subr.bf16.mxu1 %v8312_v30 }
 0xf70   : > { %6273 = vmatmul.mubr.f32.vlgmr.msra.gmra.mrb[48].mxu1 %v5043_v29 }
 0xf71   : > { %6318 = vmatprep.mubr.msk.f32.mxu1 %vm8311_vm8, %v8310_v26  ;;  %7366 = vmatpush3.bf16.msra.mxu1 %v7365_v32 }
 0xf72   : > { %7367 = vmatprep.subr.bf16.mxu1 %v8312_v30 }
 0xf75   : > { %7369 = vmatpush3.bf16.msra.mxu1 %v7368_v34 }
 0xf76   : > { %7370 = vmatprep.subr.bf16.mxu1 %v8312_v30 }
0x1021   : > { %v5022_v35 = vpop.f32.mrb[14].mxu0 }
0x1022   : > { %v6239_v37 = vpop.f32.mrb[15].mxu0 }
0x1023   : > { %v4952_v40 = vpop.f32.mrb[46].mxu1 }
0x1024   : > { %v5023_v38 = vadd.f32 %v5022_v35, %v4952_v40  ;;  %v6204_v39 = vpop.f32.mrb[47].mxu1 }
0x1041   : > { %v5201_v41 = vpop.f32.mrb[16].mxu0 }
0x1042   : > { %v6309_v42 = vpop.f32.mrb[17].mxu0 }
0x1043   : > { %v5111_v44 = vpop.f32.mrb[48].mxu1 }
0x1044   : > { %v5115_v46 = vadd.f32 %v5111_v44, %v5023_v38  ;;  %v6274_v8 = vpop.f32.mrb[49].mxu1 }
0x1046   : > { %v5205_v11 = vadd.f32 %v5201_v41, %v5115_v46 }
0x1048   : > { %v5207_v52 = vadd.f32 %v5206_v48, %v5205_v11 }
0x104a   : > { %v5209_v53 = vmul.f32 0.2, %v5207_v52  ;;  %vm5208_vm13 = vcmp.ge.f32.partialorder %v5207_v52, 0.0 }
0x104c   : > { %v5210_v55 = vsel %vm5208_vm13, %v5207_v52, %v5209_v53 }
0x104d   : > { %6319 = vmatmul.mubr.msk.f32.vlgmr.msra.gmra.mrb[50].mxu1 %vm947_vm0, %v5210_v55 }
0x104e   : > { %7372 = vmatpush3.bf16.msra.mxu1 %v7371_v54  ;;  %6329 = vmatprep.mubr.msk.f32.mxu1 %vm8311_vm8, %v8310_v26 }
0x104f   : > { %7373 = vmatprep.subr.bf16.mxu1 %v8312_v30  ;;  %v5296_v30 = vld [vmem:[#allocation31] sm:$0x1] }
0x1052   : > { %7375 = vmatpush3.bf16.msra.mxu1 %v7374_v57 }
0x1120   : > { %v5285_v50 = vpop.f32.mrb[50].mxu1 }
0x1121   : > { %v5286_v58 = vadd.f32 %v5285_v50, %v5215_v4  ;;  %v6320_v3 = vpop.f32.mrb[51].mxu1 }
0x1123   : > { %vm5289_vm14 = vcmp.ge.f32.partialorder %v5286_v58, 0.0  ;;  %v5290_v59 = vmul.f32 0.2, %v5286_v58 }
0x1125   : > { %v5291_v26 = vsel %vm5289_vm14, %v5286_v58, %v5290_v59 }
0x1126   : > { %6330 = vmatmul.mubr.msk.f32.vlgmr.msra.gmra.mrb[52].mxu1 %vm947_vm0, %v5291_v26 }
0x11f9   : > { %v5366_v60 = vpop.f32.mrb[52].mxu1 }
0x11fa   : > { %v5367_v61 = vadd.f32 %v5366_v60, %v5296_v30  ;;  %v6331_v62 = vpop.f32.mrb[53].mxu1 }
0x11fc   : > { %5371 = vst.msk [vmem:[%s935_s24] sm:$0x1] %vm5370_vm15, %v5367_v61 }
0x11fd   : > { %8192 = shalt.err (!%p8189_p6)
}
0x11fe   : > { %s8193_s3 = scalar_lea.hbm %s9363_s29, 16  ;;  %s8197_s24 = scalar_lea.hbm %s9538_s16, 32 }
0x11ff   : > { %p8194_p0 = scmp.ne.s32.totalorder %s9363_s29, %s8193_s3  ;;  %p8198_p13 = scmp.lt.u32.totalorder %s9363_s29, %s9538_s16 }
0x1200   : > { %p8199_p12 = scmp.lt.u32.totalorder %s8197_s24, %s8193_s3  ;;  %p8201_p2 = scmp.lt.u32.totalorder %s8193_s3, %s9363_s29 }
0x1201   : > { %p8195_p9 = pnand %p8194_p0, %p9539_p3 }
0x1202   : > { %p8200_p1 = por %p8199_p12, %p8198_p13 }
0x1203   : > { %p8196_p10 = pneg %p8195_p9 }
0x1204   : > { %p8202_p4 = por %p8201_p2, %p8200_p1 }
0x1206   : > { %p8203_p7 = pnand %p8202_p4, %p8196_p10 }
0x1208   : > { %8206 = shalt.err (!%p8203_p7)
}
0x1209   : > { %7482 = dma.vmem_to_hbm [thread:$0]  (%p9539_p3), %s9365_s6, 16, %s9363_s29, %s5373_s20  }
0x120a PF: > { %s9540_s10 = sld [smem:[#allocation47_spill]]  ;;  %s9541_s12 = sld [smem:[#allocation44_spill]] }
0x120b   : > { %s9542_s28 = sld [smem:[#allocation52_spill]] }
0x1210   : > { %p7584_p8 = scmp.ge.s32.totalorder %s9540_s10, 2  ;;  %s5397_s8 = sand.u32 1, %s9541_s12  }
0x1211   : > { %p9543_p11 = scmp.ne.s32.totalorder %s9542_s28, 0  ;;  %s5398_s30 = scalar_lea.sflag [#allocation4], %s5397_s8 }
0x1213   : > { %p7543_p5 = pnand %p7584_p8, %p9543_p11 }
0x1215   : > { %8264 = dma.done.wait (!%p7543_p5), %s5398_s30, 16  }
0x1216   : > { %8266 = vsyncadd (!%p7543_p5), %s5398_s30, 4294967280  ;;  %s9544_s30 = sld [smem:[#allocation49_spill]]  ;;  %s9545_s3 = sld [smem:[#allocation45_spill]] }
0x1217   : > { %s9546_s28 = sld [smem:[#allocation46_spill]]  ;;  %s9547_s29 = sld [smem:[#allocation50_spill]] }
0x121c   : > { %p42_p6 = scmp.ge.s32.totalorder %s9544_s30, 4  }
0x121e   :  { %44 = sbr.rel (!%p42_p6) target bundleno = 28 (0x1c), region = 243 }
0x1225   :  { %5402 = vsyncpa [#allocation3], 1 }
0x1226   :  { %5404 = vsyncpa [#allocation3 + $0x1], 1 }
0x1227   :  { %5405 = vsyncpa [#allocation6], 1 }
0x1228   :  { %5406 = vsyncpa [#allocation9], 1 }
0x1229   :  { %5407 = vsyncpa [#allocation12], 1 }
0x122a   :  { %5408 = vsyncpa [#allocation15], 1 }
0x122b   :  { %5409 = vsyncpa [#allocation18], 1 }
0x122c   :  { %5410 = vsyncpa [#allocation21], 1 }
0x122d   :  { %5411 = vsyncpa [#allocation24], 1 }
0x122e   :  { %5412 = vsyncpa [#allocation27], 1 }
0x122f   :  { %5413 = vsyncpa [#allocation30], 1 }
0x1230   :  { %5414 = vsyncpa [#allocation4], 1 }
0x1231   :  { %5416 = vsyncpa [#allocation4 + $0x1], 1 }

</bundles_post_ra>
